<compile_context>
chip_gen: v5e
topology: v5e:2x2
jax: 0.10.0
libtpu: 0.0.40
codegen_flags: <defaults>
</compile_context>

<pallas_src>
import numpy as np
import jax
import jax.numpy as jnp
from jax import lax
from jax.experimental import pallas as pl
from jax.experimental.pallas import tpu as pltpu


def _round_up(x, m):
    return (x + m - 1) // m * m


def _conv_tap_offsets(Hp, Wp):
    # flat-index offsets of the 27 taps, (kd, kh, kw) row-major
    return tuple((kd - 1) * Hp * Wp + (kh - 1) * Wp + (kw - 1)
                 for kd in range(3) for kh in range(3) for kw in range(3))


def _make_conv_kernel(offsets, T, apply_relu, use_mask):
    """Computes one (C_out, T) lane-tile of a 3x3x3 conv on the flattened grid.

    refs: x_left, x_centre, x_right -- three consecutive (C_in, T) lane tiles,
          w (C_out, 27*C_in) folded weights, b (C_out, 1) bias,
          [mask (1, T)], out (C_out, T).
    """
    def kernel(*refs):
        if use_mask:
            xl, xc, xr, w_ref, b_ref, m_ref, o_ref = refs
        else:
            xl, xc, xr, w_ref, b_ref, o_ref = refs
        # 3T-wide window around the tile (halo = one full tile on each side)
        window = jnp.concatenate([xl[...], xc[...], xr[...]], axis=1)
        # im2col: 27 lane-shifted copies of the window stacked on sublanes
        slab = jnp.concatenate(
            [window[:, T + off: 2 * T + off] for off in offsets], axis=0)
        # whole conv tile = ONE MXU matmul, K = 27*C_in folded taps
        acc = jnp.dot(w_ref[...], slab, preferred_element_type=jnp.float32)
        acc = acc + b_ref[...]
        if apply_relu:
            acc = jnp.maximum(acc, 0.0)
        if use_mask:                       # zero conv-padding ring / guard lanes
            acc = acc * m_ref[...]
        o_ref[...] = acc.astype(o_ref.dtype)
    return kernel


def feature2segmentation_pallas(x, w1, b1, w2, b2, *, lane_tile=256):
    """x: (N, Cin, D, H, W); w1: (F, Cin, 3,3,3); w2: (Cout, F, 3,3,3).
    Returns (N, Cout, D, H, W), matching nn.Conv3d->ReLU->nn.Conv3d."""
    f32 = jnp.float32
    N, Cin, D, H, W = x.shape
    F_ = w1.shape[0]
    Cout = w2.shape[0]
    Dp, Hp, Wp = D + 2, H + 2, W + 2
    P = Dp * Hp * Wp                               # flattened padded volume
    max_off = Hp * Wp + Wp + 1                     # largest |flat tap offset|
    T = max(lane_tile, _round_up(max_off, 128))    # one-tile halo needs T >= max_off
    P_pad = _round_up(P, T)
    Lh = P_pad + 2 * T                             # intermediate lanes (+guard tiles)
    Lx = P_pad + 4 * T                             # conv1 input lanes (+guard tiles)
    nt1 = Lh // T                                  # conv1 also writes the guard tiles
    nt2 = P_pad // T
    offsets = _conv_tap_offsets(Hp, Wp)

    # pad tiny channel counts to a sublane multiple so all concats are aligned
    Cin_p = _round_up(Cin, 8)
    F_p = _round_up(F_, 8)

    # ---------------- JAX-side layout plumbing (no transposes needed) -------
    xp = jnp.pad(x.astype(f32),
                 ((0, 0), (0, Cin_p - Cin), (1, 1), (1, 1), (1, 1)))
    # position p (row-major d,h,w on the padded grid) lives at lane 2T + p
    x_cf = jnp.pad(xp.reshape(N, Cin_p, P),
                   ((0, 0), (0, 0), (2 * T, 2 * T + P_pad - P)))

    # folded 2D weights: (C_out, 27*C_in), tap k=(kd,kh,kw) row-major, c_in fastest
    w1p = jnp.pad(w1.astype(f32),
                  ((0, F_p - F_), (0, Cin_p - Cin), (0, 0), (0, 0), (0, 0)))
    w2p = jnp.pad(w2.astype(f32),
                  ((0, 0), (0, F_p - F_), (0, 0), (0, 0), (0, 0)))
    w1f = jnp.transpose(w1p, (0, 2, 3, 4, 1)).reshape(F_p, 27 * Cin_p)
    w2f = jnp.transpose(w2p, (0, 2, 3, 4, 1)).reshape(Cout, 27 * F_p)
    b1c = jnp.pad(b1.astype(f32), (0, F_p - F_)).reshape(F_p, 1)
    b2c = b2.astype(f32).reshape(Cout, 1)

    # interior mask on the intermediate lane axis (1 on real voxels, 0 on the
    # conv zero-padding ring, guard tiles and round-up lanes)
    dd, hh, ww = jnp.meshgrid(jnp.arange(Dp), jnp.arange(Hp), jnp.arange(Wp),
                              indexing="ij")
    interior = ((dd >= 1) & (dd <= D) & (hh >= 1) & (hh <= H)
                & (ww >= 1) & (ww <= W)).reshape(P).astype(f32)
    mask = jnp.pad(interior, (T, T + P_pad - P)).reshape(1, Lh)

    par = pltpu.CompilerParams(dimension_semantics=("parallel", "parallel"))

    # ---------------- pass 1: conv1 + bias + ReLU -> h (zero-guarded) -------
    h = pl.pallas_call(
        _make_conv_kernel(offsets, T, apply_relu=True, use_mask=True),
        out_shape=jax.ShapeDtypeStruct((N, F_p, Lh), f32),
        grid_spec=pltpu.PrefetchScalarGridSpec(
            num_scalar_prefetch=0,
            grid=(N, nt1),
            in_specs=[
                pl.BlockSpec((None, Cin_p, T), lambda n, t: (n, 0, t)),
                pl.BlockSpec((None, Cin_p, T), lambda n, t: (n, 0, t + 1)),
                pl.BlockSpec((None, Cin_p, T), lambda n, t: (n, 0, t + 2)),
                pl.BlockSpec((F_p, 27 * Cin_p), lambda n, t: (0, 0)),
                pl.BlockSpec((F_p, 1), lambda n, t: (0, 0)),
                pl.BlockSpec((1, T), lambda n, t: (0, t)),
            ],
            out_specs=pl.BlockSpec((None, F_p, T), lambda n, t: (n, 0, t)),
        ),
        compiler_params=par,
    )(x_cf, x_cf, x_cf, w1f, b1c, mask)

    # ---------------- pass 2: conv2 + bias (channel-first output) -----------
    out_flat = pl.pallas_call(
        _make_conv_kernel(offsets, T, apply_relu=False, use_mask=False),
        out_shape=jax.ShapeDtypeStruct((N, Cout, P_pad), f32),
        grid_spec=pltpu.PrefetchScalarGridSpec(
            num_scalar_prefetch=0,
            grid=(N, nt2),
            in_specs=[
                pl.BlockSpec((None, F_p, T), lambda n, t: (n, 0, t)),
                pl.BlockSpec((None, F_p, T), lambda n, t: (n, 0, t + 1)),
                pl.BlockSpec((None, F_p, T), lambda n, t: (n, 0, t + 2)),
                pl.BlockSpec((Cout, 27 * F_p), lambda n, t: (0, 0)),
                pl.BlockSpec((Cout, 1), lambda n, t: (0, 0)),
            ],
            out_specs=pl.BlockSpec((None, Cout, T), lambda n, t: (n, 0, t)),
        ),
        compiler_params=par,
    )(h, h, h, w2f, b2c)

    # drop halo / round-up lanes; output is already channel-first (NCDHW)
    out = out_flat[:, :, :P].reshape(N, Cout, Dp, Hp, Wp)
    return out[:, :, 1:1 + D, 1:1 + H, 1:1 + W]


def feature2segmentation_ref(x, w1, b1, w2, b2):
    """Pure-JAX reference matching torch.nn.Conv3d semantics."""
    dn = ("NCDHW", "OIDHW", "NCDHW")
    pad = ((1, 1), (1, 1), (1, 1))
    h = lax.conv_general_dilated(x, w1, (1, 1, 1), pad, dimension_numbers=dn,
                                 precision=lax.Precision.HIGHEST)
    h = jax.nn.relu(h + b1[None, :, None, None, None])
    o = lax.conv_general_dilated(h, w2, (1, 1, 1), pad, dimension_numbers=dn,
                                 precision=lax.Precision.HIGHEST)
    return o + b2[None, :, None, None, None]


if __name__ == "__main__":
    # in_channels=4, n_filters=16, out_channels=3, batch=2, volume 4x6x8
    N, Cin, Cout, F_ = 2, 4, 3, 16
    D, H, W = 4, 6, 8

    key = jax.random.PRNGKey(0)
    kx, kw1, kb1, kw2, kb2 = jax.random.split(key, 5)
    x = jax.random.normal(kx, (N, Cin, D, H, W), jnp.float32)
    w1 = jax.random.normal(kw1, (F_, Cin, 3, 3, 3), jnp.float32) * 0.1
    b1 = jax.random.normal(kb1, (F_,), jnp.float32) * 0.1
    w2 = jax.random.normal(kw2, (Cout, F_, 3, 3, 3), jnp.float32) * 0.1
    b2 = jax.random.normal(kb2, (Cout,), jnp.float32) * 0.1

    out = jax.jit(feature2segmentation_pallas)(x, w1, b1, w2, b2)
    out = jax.block_until_ready(out)
    assert out.shape == (N, Cout, D, H, W)

    ref = feature2segmentation_ref(x, w1, b1, w2, b2)
    np.testing.assert_allclose(np.asarray(out), np.asarray(ref),
                               atol=2e-2, rtol=2e-2)
    print("KERNEL_OK")
</pallas_src>

<mosaic_0001>
module attributes {stable_mosaic.version = 11 : i64} {
  func.func @kernel(%arg0: i32, %arg1: i32, %arg2: memref<1x8x256xf32, #tpu.memory_space<vmem>>, %arg3: memref<1x8x256xf32, #tpu.memory_space<vmem>>, %arg4: memref<1x8x256xf32, #tpu.memory_space<vmem>>, %arg5: memref<16x216xf32, #tpu.memory_space<vmem>>, %arg6: memref<16x1xf32, #tpu.memory_space<vmem>>, %arg7: memref<1x256xf32, #tpu.memory_space<vmem>>, %arg8: memref<1x16x256xf32, #tpu.memory_space<vmem>>) attributes {dimension_semantics = [#tpu.dimension_semantics<parallel>, #tpu.dimension_semantics<parallel>], iteration_bounds = array<i64: 2, 4>, scalar_prefetch = 0 : i64, scratch_operands = 0 : i64, tpu.core_type = #tpu.core_type<tc>, window_params = [{transform_indices = @transform_0, window_bounds = array<i64: 1, 8, 256>}, {transform_indices = @transform_1, window_bounds = array<i64: 1, 8, 256>}, {transform_indices = @transform_2, window_bounds = array<i64: 1, 8, 256>}, {pipeline_mode = #tpu.pipeline_mode<synchronous>, transform_indices = @transform_3, window_bounds = array<i64: 16, 216>}, {pipeline_mode = #tpu.pipeline_mode<synchronous>, transform_indices = @transform_4, window_bounds = array<i64: 16, 1>}, {transform_indices = @transform_5, window_bounds = array<i64: 1, 256>}, {transform_indices = @transform_6, window_bounds = array<i64: 1, 16, 256>}]} {
    %c0 = arith.constant 0 : index
    %c0_0 = arith.constant 0 : index
    %c0_1 = arith.constant 0 : index
    %0 = vector.load %arg2[%c0, %c0_0, %c0_1] : memref<1x8x256xf32, #tpu.memory_space<vmem>>, vector<1x8x256xf32>
    %1 = vector.shape_cast %0 : vector<1x8x256xf32> to vector<8x256xf32>
    %c0_2 = arith.constant 0 : index
    %c0_3 = arith.constant 0 : index
    %c0_4 = arith.constant 0 : index
    %2 = vector.load %arg3[%c0_2, %c0_3, %c0_4] : memref<1x8x256xf32, #tpu.memory_space<vmem>>, vector<1x8x256xf32>
    %3 = vector.shape_cast %2 : vector<1x8x256xf32> to vector<8x256xf32>
    %c0_5 = arith.constant 0 : index
    %c0_6 = arith.constant 0 : index
    %c0_7 = arith.constant 0 : index
    %4 = vector.load %arg4[%c0_5, %c0_6, %c0_7] : memref<1x8x256xf32, #tpu.memory_space<vmem>>, vector<1x8x256xf32>
    %5 = vector.shape_cast %4 : vector<1x8x256xf32> to vector<8x256xf32>
    %6 = tpu.concatenate %1, %3, %5 in 1 : vector<8x256xf32>, vector<8x256xf32>, vector<8x256xf32> -> vector<8x768xf32>
    %7 = vector.extract_strided_slice %6 {offsets = [0, 165], sizes = [8, 256], strides = [1, 1]} : vector<8x768xf32> to vector<8x256xf32>
    %8 = vector.extract_strided_slice %6 {offsets = [0, 166], sizes = [8, 256], strides = [1, 1]} : vector<8x768xf32> to vector<8x256xf32>
    %9 = vector.extract_strided_slice %6 {offsets = [0, 167], sizes = [8, 256], strides = [1, 1]} : vector<8x768xf32> to vector<8x256xf32>
    %10 = vector.extract_strided_slice %6 {offsets = [0, 175], sizes = [8, 256], strides = [1, 1]} : vector<8x768xf32> to vector<8x256xf32>
    %11 = vector.extract_strided_slice %6 {offsets = [0, 176], sizes = [8, 256], strides = [1, 1]} : vector<8x768xf32> to vector<8x256xf32>
    %12 = vector.extract_strided_slice %6 {offsets = [0, 177], sizes = [8, 256], strides = [1, 1]} : vector<8x768xf32> to vector<8x256xf32>
    %13 = vector.extract_strided_slice %6 {offsets = [0, 185], sizes = [8, 256], strides = [1, 1]} : vector<8x768xf32> to vector<8x256xf32>
    %14 = vector.extract_strided_slice %6 {offsets = [0, 186], sizes = [8, 256], strides = [1, 1]} : vector<8x768xf32> to vector<8x256xf32>
    %15 = vector.extract_strided_slice %6 {offsets = [0, 187], sizes = [8, 256], strides = [1, 1]} : vector<8x768xf32> to vector<8x256xf32>
    %16 = vector.extract_strided_slice %6 {offsets = [0, 245], sizes = [8, 256], strides = [1, 1]} : vector<8x768xf32> to vector<8x256xf32>
    %17 = vector.extract_strided_slice %6 {offsets = [0, 246], sizes = [8, 256], strides = [1, 1]} : vector<8x768xf32> to vector<8x256xf32>
    %18 = vector.extract_strided_slice %6 {offsets = [0, 247], sizes = [8, 256], strides = [1, 1]} : vector<8x768xf32> to vector<8x256xf32>
    %19 = vector.extract_strided_slice %6 {offsets = [0, 255], sizes = [8, 256], strides = [1, 1]} : vector<8x768xf32> to vector<8x256xf32>
    %20 = vector.extract_strided_slice %6 {offsets = [0, 256], sizes = [8, 256], strides = [1, 1]} : vector<8x768xf32> to vector<8x256xf32>
    %21 = vector.extract_strided_slice %6 {offsets = [0, 257], sizes = [8, 256], strides = [1, 1]} : vector<8x768xf32> to vector<8x256xf32>
    %22 = vector.extract_strided_slice %6 {offsets = [0, 265], sizes = [8, 256], strides = [1, 1]} : vector<8x768xf32> to vector<8x256xf32>
    %23 = vector.extract_strided_slice %6 {offsets = [0, 266], sizes = [8, 256], strides = [1, 1]} : vector<8x768xf32> to vector<8x256xf32>
    %24 = vector.extract_strided_slice %6 {offsets = [0, 267], sizes = [8, 256], strides = [1, 1]} : vector<8x768xf32> to vector<8x256xf32>
    %25 = vector.extract_strided_slice %6 {offsets = [0, 325], sizes = [8, 256], strides = [1, 1]} : vector<8x768xf32> to vector<8x256xf32>
    %26 = vector.extract_strided_slice %6 {offsets = [0, 326], sizes = [8, 256], strides = [1, 1]} : vector<8x768xf32> to vector<8x256xf32>
    %27 = vector.extract_strided_slice %6 {offsets = [0, 327], sizes = [8, 256], strides = [1, 1]} : vector<8x768xf32> to vector<8x256xf32>
    %28 = vector.extract_strided_slice %6 {offsets = [0, 335], sizes = [8, 256], strides = [1, 1]} : vector<8x768xf32> to vector<8x256xf32>
    %29 = vector.extract_strided_slice %6 {offsets = [0, 336], sizes = [8, 256], strides = [1, 1]} : vector<8x768xf32> to vector<8x256xf32>
    %30 = vector.extract_strided_slice %6 {offsets = [0, 337], sizes = [8, 256], strides = [1, 1]} : vector<8x768xf32> to vector<8x256xf32>
    %31 = vector.extract_strided_slice %6 {offsets = [0, 345], sizes = [8, 256], strides = [1, 1]} : vector<8x768xf32> to vector<8x256xf32>
    %32 = vector.extract_strided_slice %6 {offsets = [0, 346], sizes = [8, 256], strides = [1, 1]} : vector<8x768xf32> to vector<8x256xf32>
    %33 = vector.extract_strided_slice %6 {offsets = [0, 347], sizes = [8, 256], strides = [1, 1]} : vector<8x768xf32> to vector<8x256xf32>
    %34 = tpu.concatenate %7, %8, %9, %10, %11, %12, %13, %14, %15, %16, %17, %18, %19, %20, %21, %22 in 0 : vector<8x256xf32>, vector<8x256xf32>, vector<8x256xf32>, vector<8x256xf32>, vector<8x256xf32>, vector<8x256xf32>, vector<8x256xf32>, vector<8x256xf32>, vector<8x256xf32>, vector<8x256xf32>, vector<8x256xf32>, vector<8x256xf32>, vector<8x256xf32>, vector<8x256xf32>, vector<8x256xf32>, vector<8x256xf32> -> vector<128x256xf32>
    %35 = tpu.concatenate %23, %24, %25, %26, %27, %28, %29, %30, %31, %32, %33 in 0 : vector<8x256xf32>, vector<8x256xf32>, vector<8x256xf32>, vector<8x256xf32>, vector<8x256xf32>, vector<8x256xf32>, vector<8x256xf32>, vector<8x256xf32>, vector<8x256xf32>, vector<8x256xf32>, vector<8x256xf32> -> vector<88x256xf32>
    %36 = tpu.concatenate %34, %35 in 0 : vector<128x256xf32>, vector<88x256xf32> -> vector<216x256xf32>
    %c0_8 = arith.constant 0 : index
    %c0_9 = arith.constant 0 : index
    %37 = vector.load %arg5[%c0_8, %c0_9] : memref<16x216xf32, #tpu.memory_space<vmem>>, vector<16x216xf32>
    %cst = arith.constant dense<0.000000e+00> : vector<16x256xf32>
    %38 = tpu.matmul %37, %36, %cst {dimension_numbers = #tpu.dot_dimension_numbers<[1], [0], [0], [1], [0, 0, 1, 1], [], []>} : vector<16x216xf32>, vector<216x256xf32>, vector<16x256xf32> -> vector<16x256xf32>
    %c0_10 = arith.constant 0 : index
    %c0_11 = arith.constant 0 : index
    %39 = vector.load %arg6[%c0_10, %c0_11] : memref<16x1xf32, #tpu.memory_space<vmem>>, vector<16x1xf32>
    %40 = vector.broadcast %39 : vector<16x1xf32> to vector<16x256xf32>
    %41 = arith.addf %38, %40 : vector<16x256xf32>
    %cst_12 = arith.constant 0.000000e+00 : f32
    %42 = vector.broadcast %cst_12 : f32 to vector<16x256xf32>
    %43 = arith.maximumf %41, %42 : vector<16x256xf32>
    %c0_13 = arith.constant 0 : index
    %c0_14 = arith.constant 0 : index
    %44 = vector.load %arg7[%c0_13, %c0_14] : memref<1x256xf32, #tpu.memory_space<vmem>>, vector<1x256xf32>
    %45 = vector.broadcast %44 : vector<1x256xf32> to vector<16x256xf32>
    %46 = arith.mulf %43, %45 : vector<16x256xf32>
    %c0_15 = arith.constant 0 : index
    %c0_16 = arith.constant 0 : index
    %c0_17 = arith.constant 0 : index
    %47 = vector.load %arg8[%c0_15, %c0_16, %c0_17] : memref<1x16x256xf32, #tpu.memory_space<vmem>>, vector<1x16x256xf32>
    %48 = vector.shape_cast %47 : vector<1x16x256xf32> to vector<16x256xf32>
    %49 = vector.shape_cast %46 : vector<16x256xf32> to vector<1x16x256xf32>
    tpu.vector_store %arg8[%c0_15, %c0_16, %c0_17], %49 {strides = array<i32>} : memref<1x16x256xf32, #tpu.memory_space<vmem>>, vector<1x16x256xf32>,
    return
  }
  func.func @transform_0(%arg0: i32, %arg1: i32) -> (i32, i32, i32) {
    %c0_i32 = arith.constant 0 : i32
    %c0_i32_0 = arith.constant 0 : i32
    return %arg0, %c0_i32, %arg1 : i32, i32, i32
  }
  func.func @transform_1(%arg0: i32, %arg1: i32) -> (i32, i32, i32) {
    %c1_i32 = arith.constant 1 : i32
    %0 = arith.addi %arg1, %c1_i32 : i32
    %c0_i32 = arith.constant 0 : i32
    %c0_i32_0 = arith.constant 0 : i32
    return %arg0, %c0_i32, %0 : i32, i32, i32
  }
  func.func @transform_2(%arg0: i32, %arg1: i32) -> (i32, i32, i32) {
    %c2_i32 = arith.constant 2 : i32
    %0 = arith.addi %arg1, %c2_i32 : i32
    %c0_i32 = arith.constant 0 : i32
    %c0_i32_0 = arith.constant 0 : i32
    return %arg0, %c0_i32, %0 : i32, i32, i32
  }
  func.func @transform_3(%arg0: i32, %arg1: i32) -> (i32, i32) {
    %c0_i32 = arith.constant 0 : i32
    %c0_i32_0 = arith.constant 0 : i32
    %c0_i32_1 = arith.constant 0 : i32
    return %c0_i32, %c0_i32_0 : i32, i32
  }
  func.func @transform_4(%arg0: i32, %arg1: i32) -> (i32, i32) {
    %c0_i32 = arith.constant 0 : i32
    %c0_i32_0 = arith.constant 0 : i32
    %c0_i32_1 = arith.constant 0 : i32
    return %c0_i32, %c0_i32_0 : i32, i32
  }
  func.func @transform_5(%arg0: i32, %arg1: i32) -> (i32, i32) {
    %c0_i32 = arith.constant 0 : i32
    %c0_i32_0 = arith.constant 0 : i32
    return %c0_i32, %arg1 : i32, i32
  }
  func.func @transform_6(%arg0: i32, %arg1: i32) -> (i32, i32, i32) {
    %c0_i32 = arith.constant 0 : i32
    %c0_i32_0 = arith.constant 0 : i32
    return %arg0, %c0_i32, %arg1 : i32, i32, i32
  }
}

module attributes {stable_mosaic.version = 11 : i64} {
  func.func @kernel(%arg0: i32, %arg1: i32, %arg2: memref<1x16x256xf32, #tpu.memory_space<vmem>>, %arg3: memref<1x16x256xf32, #tpu.memory_space<vmem>>, %arg4: memref<1x16x256xf32, #tpu.memory_space<vmem>>, %arg5: memref<3x432xf32, #tpu.memory_space<vmem>>, %arg6: memref<3x1xf32, #tpu.memory_space<vmem>>, %arg7: memref<1x3x256xf32, #tpu.memory_space<vmem>>) attributes {dimension_semantics = [#tpu.dimension_semantics<parallel>, #tpu.dimension_semantics<parallel>], iteration_bounds = array<i64: 2, 2>, scalar_prefetch = 0 : i64, scratch_operands = 0 : i64, tpu.core_type = #tpu.core_type<tc>, window_params = [{transform_indices = @transform_0, window_bounds = array<i64: 1, 16, 256>}, {transform_indices = @transform_1, window_bounds = array<i64: 1, 16, 256>}, {transform_indices = @transform_2, window_bounds = array<i64: 1, 16, 256>}, {pipeline_mode = #tpu.pipeline_mode<synchronous>, transform_indices = @transform_3, window_bounds = array<i64: 3, 432>}, {pipeline_mode = #tpu.pipeline_mode<synchronous>, transform_indices = @transform_4, window_bounds = array<i64: 3, 1>}, {transform_indices = @transform_5, window_bounds = array<i64: 1, 3, 256>}]} {
    %c0 = arith.constant 0 : index
    %c0_0 = arith.constant 0 : index
    %c0_1 = arith.constant 0 : index
    %0 = vector.load %arg2[%c0, %c0_0, %c0_1] : memref<1x16x256xf32, #tpu.memory_space<vmem>>, vector<1x16x256xf32>
    %1 = vector.shape_cast %0 : vector<1x16x256xf32> to vector<16x256xf32>
    %c0_2 = arith.constant 0 : index
    %c0_3 = arith.constant 0 : index
    %c0_4 = arith.constant 0 : index
    %2 = vector.load %arg3[%c0_2, %c0_3, %c0_4] : memref<1x16x256xf32, #tpu.memory_space<vmem>>, vector<1x16x256xf32>
    %3 = vector.shape_cast %2 : vector<1x16x256xf32> to vector<16x256xf32>
    %c0_5 = arith.constant 0 : index
    %c0_6 = arith.constant 0 : index
    %c0_7 = arith.constant 0 : index
    %4 = vector.load %arg4[%c0_5, %c0_6, %c0_7] : memref<1x16x256xf32, #tpu.memory_space<vmem>>, vector<1x16x256xf32>
    %5 = vector.shape_cast %4 : vector<1x16x256xf32> to vector<16x256xf32>
    %6 = tpu.concatenate %1, %3, %5 in 1 : vector<16x256xf32>, vector<16x256xf32>, vector<16x256xf32> -> vector<16x768xf32>
    %7 = vector.extract_strided_slice %6 {offsets = [0, 165], sizes = [16, 256], strides = [1, 1]} : vector<16x768xf32> to vector<16x256xf32>
    %8 = vector.extract_strided_slice %6 {offsets = [0, 166], sizes = [16, 256], strides = [1, 1]} : vector<16x768xf32> to vector<16x256xf32>
    %9 = vector.extract_strided_slice %6 {offsets = [0, 167], sizes = [16, 256], strides = [1, 1]} : vector<16x768xf32> to vector<16x256xf32>
    %10 = vector.extract_strided_slice %6 {offsets = [0, 175], sizes = [16, 256], strides = [1, 1]} : vector<16x768xf32> to vector<16x256xf32>
    %11 = vector.extract_strided_slice %6 {offsets = [0, 176], sizes = [16, 256], strides = [1, 1]} : vector<16x768xf32> to vector<16x256xf32>
    %12 = vector.extract_strided_slice %6 {offsets = [0, 177], sizes = [16, 256], strides = [1, 1]} : vector<16x768xf32> to vector<16x256xf32>
    %13 = vector.extract_strided_slice %6 {offsets = [0, 185], sizes = [16, 256], strides = [1, 1]} : vector<16x768xf32> to vector<16x256xf32>
    %14 = vector.extract_strided_slice %6 {offsets = [0, 186], sizes = [16, 256], strides = [1, 1]} : vector<16x768xf32> to vector<16x256xf32>
    %15 = vector.extract_strided_slice %6 {offsets = [0, 187], sizes = [16, 256], strides = [1, 1]} : vector<16x768xf32> to vector<16x256xf32>
    %16 = vector.extract_strided_slice %6 {offsets = [0, 245], sizes = [16, 256], strides = [1, 1]} : vector<16x768xf32> to vector<16x256xf32>
    %17 = vector.extract_strided_slice %6 {offsets = [0, 246], sizes = [16, 256], strides = [1, 1]} : vector<16x768xf32> to vector<16x256xf32>
    %18 = vector.extract_strided_slice %6 {offsets = [0, 247], sizes = [16, 256], strides = [1, 1]} : vector<16x768xf32> to vector<16x256xf32>
    %19 = vector.extract_strided_slice %6 {offsets = [0, 255], sizes = [16, 256], strides = [1, 1]} : vector<16x768xf32> to vector<16x256xf32>
    %20 = vector.extract_strided_slice %6 {offsets = [0, 256], sizes = [16, 256], strides = [1, 1]} : vector<16x768xf32> to vector<16x256xf32>
    %21 = vector.extract_strided_slice %6 {offsets = [0, 257], sizes = [16, 256], strides = [1, 1]} : vector<16x768xf32> to vector<16x256xf32>
    %22 = vector.extract_strided_slice %6 {offsets = [0, 265], sizes = [16, 256], strides = [1, 1]} : vector<16x768xf32> to vector<16x256xf32>
    %23 = vector.extract_strided_slice %6 {offsets = [0, 266], sizes = [16, 256], strides = [1, 1]} : vector<16x768xf32> to vector<16x256xf32>
    %24 = vector.extract_strided_slice %6 {offsets = [0, 267], sizes = [16, 256], strides = [1, 1]} : vector<16x768xf32> to vector<16x256xf32>
    %25 = vector.extract_strided_slice %6 {offsets = [0, 325], sizes = [16, 256], strides = [1, 1]} : vector<16x768xf32> to vector<16x256xf32>
    %26 = vector.extract_strided_slice %6 {offsets = [0, 326], sizes = [16, 256], strides = [1, 1]} : vector<16x768xf32> to vector<16x256xf32>
    %27 = vector.extract_strided_slice %6 {offsets = [0, 327], sizes = [16, 256], strides = [1, 1]} : vector<16x768xf32> to vector<16x256xf32>
    %28 = vector.extract_strided_slice %6 {offsets = [0, 335], sizes = [16, 256], strides = [1, 1]} : vector<16x768xf32> to vector<16x256xf32>
    %29 = vector.extract_strided_slice %6 {offsets = [0, 336], sizes = [16, 256], strides = [1, 1]} : vector<16x768xf32> to vector<16x256xf32>
    %30 = vector.extract_strided_slice %6 {offsets = [0, 337], sizes = [16, 256], strides = [1, 1]} : vector<16x768xf32> to vector<16x256xf32>
    %31 = vector.extract_strided_slice %6 {offsets = [0, 345], sizes = [16, 256], strides = [1, 1]} : vector<16x768xf32> to vector<16x256xf32>
    %32 = vector.extract_strided_slice %6 {offsets = [0, 346], sizes = [16, 256], strides = [1, 1]} : vector<16x768xf32> to vector<16x256xf32>
    %33 = vector.extract_strided_slice %6 {offsets = [0, 347], sizes = [16, 256], strides = [1, 1]} : vector<16x768xf32> to vector<16x256xf32>
    %34 = tpu.concatenate %7, %8, %9, %10, %11, %12, %13, %14, %15, %16, %17, %18, %19, %20, %21, %22 in 0 : vector<16x256xf32>, vector<16x256xf32>, vector<16x256xf32>, vector<16x256xf32>, vector<16x256xf32>, vector<16x256xf32>, vector<16x256xf32>, vector<16x256xf32>, vector<16x256xf32>, vector<16x256xf32>, vector<16x256xf32>, vector<16x256xf32>, vector<16x256xf32>, vector<16x256xf32>, vector<16x256xf32>, vector<16x256xf32> -> vector<256x256xf32>
    %35 = tpu.concatenate %23, %24, %25, %26, %27, %28, %29, %30, %31, %32, %33 in 0 : vector<16x256xf32>, vector<16x256xf32>, vector<16x256xf32>, vector<16x256xf32>, vector<16x256xf32>, vector<16x256xf32>, vector<16x256xf32>, vector<16x256xf32>, vector<16x256xf32>, vector<16x256xf32>, vector<16x256xf32> -> vector<176x256xf32>
    %36 = tpu.concatenate %34, %35 in 0 : vector<256x256xf32>, vector<176x256xf32> -> vector<432x256xf32>
    %c0_8 = arith.constant 0 : index
    %c0_9 = arith.constant 0 : index
    %37 = vector.load %arg5[%c0_8, %c0_9] : memref<3x432xf32, #tpu.memory_space<vmem>>, vector<3x432xf32>
    %cst = arith.constant dense<0.000000e+00> : vector<3x256xf32>
    %38 = tpu.matmul %37, %36, %cst {dimension_numbers = #tpu.dot_dimension_numbers<[1], [0], [0], [1], [0, 0, 1, 1], [], []>} : vector<3x432xf32>, vector<432x256xf32>, vector<3x256xf32> -> vector<3x256xf32>
    %c0_10 = arith.constant 0 : index
    %c0_11 = arith.constant 0 : index
    %39 = vector.load %arg6[%c0_10, %c0_11] : memref<3x1xf32, #tpu.memory_space<vmem>>, vector<3x1xf32>
    %40 = vector.broadcast %39 : vector<3x1xf32> to vector<3x256xf32>
    %41 = arith.addf %38, %40 : vector<3x256xf32>
    %c0_12 = arith.constant 0 : index
    %c0_13 = arith.constant 0 : index
    %c0_14 = arith.constant 0 : index
    %42 = vector.load %arg7[%c0_12, %c0_13, %c0_14] : memref<1x3x256xf32, #tpu.memory_space<vmem>>, vector<1x3x256xf32>
    %43 = vector.shape_cast %42 : vector<1x3x256xf32> to vector<3x256xf32>
    %44 = vector.shape_cast %41 : vector<3x256xf32> to vector<1x3x256xf32>
    tpu.vector_store %arg7[%c0_12, %c0_13, %c0_14], %44 {strides = array<i32>} : memref<1x3x256xf32, #tpu.memory_space<vmem>>, vector<1x3x256xf32>,
    return
  }
  func.func @transform_0(%arg0: i32, %arg1: i32) -> (i32, i32, i32) {
    %c0_i32 = arith.constant 0 : i32
    %c0_i32_0 = arith.constant 0 : i32
    return %arg0, %c0_i32, %arg1 : i32, i32, i32
  }
  func.func @transform_1(%arg0: i32, %arg1: i32) -> (i32, i32, i32) {
    %c1_i32 = arith.constant 1 : i32
    %0 = arith.addi %arg1, %c1_i32 : i32
    %c0_i32 = arith.constant 0 : i32
    %c0_i32_0 = arith.constant 0 : i32
    return %arg0, %c0_i32, %0 : i32, i32, i32
  }
  func.func @transform_2(%arg0: i32, %arg1: i32) -> (i32, i32, i32) {
    %c2_i32 = arith.constant 2 : i32
    %0 = arith.addi %arg1, %c2_i32 : i32
    %c0_i32 = arith.constant 0 : i32
    %c0_i32_0 = arith.constant 0 : i32
    return %arg0, %c0_i32, %0 : i32, i32, i32
  }
  func.func @transform_3(%arg0: i32, %arg1: i32) -> (i32, i32) {
    %c0_i32 = arith.constant 0 : i32
    %c0_i32_0 = arith.constant 0 : i32
    %c0_i32_1 = arith.constant 0 : i32
    return %c0_i32, %c0_i32_0 : i32, i32
  }
  func.func @transform_4(%arg0: i32, %arg1: i32) -> (i32, i32) {
    %c0_i32 = arith.constant 0 : i32
    %c0_i32_0 = arith.constant 0 : i32
    %c0_i32_1 = arith.constant 0 : i32
    return %c0_i32, %c0_i32_0 : i32, i32
  }
  func.func @transform_5(%arg0: i32, %arg1: i32) -> (i32, i32, i32) {
    %c0_i32 = arith.constant 0 : i32
    %c0_i32_0 = arith.constant 0 : i32
    return %arg0, %c0_i32, %arg1 : i32, i32, i32
  }
}

</mosaic_0001>

<bundles_post_ra>
// kernel: feature2segmentation_pallas.2
= control target key start
LH: loop header
LB: loop body
LE: loop exit
PB: predicated region body
PF: predicated region fallthrough
CT: control target
= control target key end

     0   :  { %s1870_s21 = smov 0   ;;  %s1872_s22 = smov 0   ;;  %s2611_s0 = inlined_call_operand.vmem [shape: f32[2,8,1536], index: 0, kind: input, shape index: {}, may-alias: {0,1,2}]   ;;  %s2612_s1 = inlined_call_operand.vmem [shape: f32[2,8,1536], index: 1, kind: input, shape index: {}, may-alias: {0,1,2}]   ;;  %s2613_s2 = inlined_call_operand.vmem [shape: f32[2,8,1536], index: 2, kind: input, shape index: {}, may-alias: {0,1,2}]   ;;  %s2614_s3 = inlined_call_operand.vmem [shape: f32[16,216], index: 3, kind: input, shape index: {}]   ;;  %s2615_s4 = inlined_call_operand.vmem [shape: f32[16,1], index: 4, kind: input, shape index: {}]   ;;  %s2616_s5 = inlined_call_operand.vmem [shape: f32[1,1024], index: 5, kind: input, shape index: {}]   ;;  %s2617_s6 = inlined_call_operand.vmem [shape: f32[2,16,1024], index: 6, kind: output, shape index: {}]  }
   0x1   :  { %s1874_s23 = smov 0   ;;  %s1876_s24 = smov 0  }
   0x2   :  { %s1878_s25 = smov 0   ;;  %s1880_s26 = smov 0  }
   0x3   :  { %s1882_s27 = smov 0  }
   0x4 LB: > { %2626 = sst [smem:[#allocation3_spill]] %s1800_s25  ;;  %s25_s28 = sadd.s32 1, %s1800_s25  ;;  %s1808_s27 = sphi %s1882_s27, %s16_s27   ;;  %s1804_s26 = sphi %s1880_s26, %s2658_s26   ;;  %s1800_s25 = sphi %s1878_s25, %s2657_s25   ;;  %s1796_s24 = sphi %s1876_s24, %s2656_s24   ;;  %s1792_s23 = sphi %s1874_s23, %s2655_s23   ;;  %s1788_s22 = sphi %s1872_s22, %s2660_s22   ;;  %s1784_s21 = sphi %s1870_s21, %s2659_s21  }
   0x5   : > { %2627 = sst [smem:[#allocation4_spill]] %s1804_s26  ;;  %p26_p0 = scmp.ge.s32.totalorder %s25_s28, 4 }
   0x6   : > { %s28_s29 = sadd.s32 1, %s1804_s26  ;;  %s1238_s30 = sadd.s32 4294967295, %s1808_s27  }
   0x7   : > { %p203_p1 = scmp.ne.s32.totalorder %s1788_s22, %s1784_s21  ;;  %s2662_s28 = smov (%p26_p0, %s25_s28), 0 }
   0x8   : > { %2628 = sst [smem:[#allocation5_spill]] %s2662_s28  ;;  %s2664_s29 = smov (!%p26_p0, %s28_s29), %s1804_s26 }
   0x9   : > { %s189_s7 = ssub.s32 %s1800_s25, %s2662_s28  ;;  %p204_p2 = scmp.eq.s32.totalorder %s1238_s30, 7 }
   0xa   : > { %p30_p3 = scmp.ge.s32.totalorder %s2664_s29, 2  ;;  %p1242_p4 = scmp.ge.s32.totalorder %s1808_s27, 1 }
   0xb   : > { %p1914_p5 = por %p204_p2, %p203_p1  ;;  %p285_p6 = scmp.lt.s32.totalorder %s1808_s27, 9 }
   0xc   : > { %s2666_s29 = smov (%p30_p3, %s2664_s29), 0  ;;  %s193_s11 = sadd.s32 1, %s1788_s22 }
   0xd   : > { %2630 = sst [smem:[#allocation6_spill]] %s2666_s29  ;;  %p286_p7 = pnand %p1242_p4, %p285_p6 }
   0xe   : > { %s188_s9 = ssub.s32 %s1804_s26, %s2666_s29 }
   0xf   : > { %s190_s10 = sor.u32 %s189_s7, %s188_s9  ;;  %289 = sbr.rel (%p286_p7) target bundleno = 723 (0x2d3), region = 44 }
  0x10   : > { %p191_p8 = scmp.eq.s32.totalorder %s190_s10, 0 }
  0x12   : > { %s1925_s12 = scalar_select %p191_p8, %s1788_s22, %s193_s11  }
  0x14   : > { %s1927_s13 = sshll.u32 %s1792_s23, 1  ;;  %p343_p9 = scmp.lt.s32.totalorder %s1796_s24, 1  ;;  %vm413_vm0 = vcmask 965632   ;;  %vm431_vm1 = vcmask 949248   ;;  %vm395_vm2 = vcmask 1039360   ;;  %vm404_vm3 = vcmask 1031168  }
  0x15   : > { %p345_p10 = scmp.lt.s32.totalorder %s1927_s13, 11  ;;  %s1262_s14 = sadd.s32 2, %s1927_s13  ;;  %vm458_vm4 = vcmask 867328   ;;  %vm422_vm5 = vcmask 957440   ;;  %vm440_vm6 = vcmask 883712   ;;  %vm485_vm7 = vcmask 375808  }
  0x16   : > { %s344_s15 = scalar_select %p343_p9, %s1796_s24, 1  ;;  %vm449_vm8 = vcmask 875520   ;;  %vm467_vm9 = vcmask 392192   ;;  %vm476_vm10 = vcmask 384000   ;;  %vm494_vm11 = vcmask 310272  }
  0x17   : > { %s346_s16 = scalar_select %p345_p10, %s1927_s13, 11  ;;  %vm510_vm12 = vcmask 293888   ;;  %vm519_vm13 = vcmask 228352   ;;  %vm531_vm14 = vcmask 564224   ;;  %vm540_vm15 = vcmask 556032  }
  0x18   : > { %s1265_s17 = smul.u32 12, %s344_s15  ;;  %p356_p11 = scmp.lt.s32.totalorder %s1262_s14, 11 }
  0x19   : > { %s1264_s19 = sadd.s32 4, %s1927_s13  ;;  %s1810_s30 = smov 126  }
  0x1a   : > { %s348_s18 = sadd.s32 %s1265_s17, %s346_s16  ;;  %p368_p12 = scmp.lt.s32.totalorder %s1264_s19, 11 }
  0x1b   : > { %s1245_s20 = sshll.u32 %s348_s18, 3  ;;  %s2668_s14 = smov (!%p356_p11, %s1262_s14), 11 }
  0x1c   : > { %s350_s7 = scalar_lea.vmem %s2611_s0, %s1245_s20  ;;  %s2670_s19 = smov (!%p368_p12, %s1264_s19), 11 }
  0x1d   : > { %s359_s9 = sadd.s32 %s1265_s17, %s2668_s14  ;;  %v382_v0 = vld [vmem:[%s350_s7 + $0x8] sm:$0xff]  ;;  %s371_s11 = sadd.s32 %s1265_s17, %s2670_s19 }
  0x1e   : > { %s1247_s10 = sshll.u32 %s359_s9, 3  ;;  %s1249_s15 = sshll.u32 %s371_s11, 3 }
  0x1f   : > { %s361_s26 = scalar_lea.vmem %s2612_s1, %s1247_s10  ;;  %s373_s25 = scalar_lea.vmem %s2613_s2, %s1249_s15 }
  0x20   : > { %v383_v1 = vld [vmem:[%s361_s26] sm:$0xff]  ;;  %s1811_s20 = smov 127   ;;  %v1948_v3 = vld [vmem:[%s361_s26 + $0x8] sm:$0xff]  ;;  %s1812_s28 = smov 118  }
  0x21   : > { %v1941_v2 = vpack.i.bf16 %v383_v1, %v382_v0  ;;  %v1950_v4 = vld [vmem:[%s373_s25] sm:$0xff]  ;;  %s1813_s29 = smov 117   ;;  %s1814_s26 = smov 116   ;;  %v1427_v6 = vpack.i.bf16 %v1948_v3, %v383_v1 }
  0x22   : > { %v1352_v5 = vpack.i.bf16 %v1950_v4, %v1948_v3  ;;  %s1815_s25 = smov 108   ;;  %s1816_s14 = smov 107  }
  0x23   : > { %1358 = vrot.lane.b32.xlu1 %v1941_v2, %s1810_s30  ;;  %1348 = vrot.lane.b32.xlu0 %v1941_v2, %s1811_s20  ;;  %s1817_s17 = smov 106   ;;  %s1818_s19 = smov 48  }
  0x24   : > { %1363 = vrot.lane.b32.xlu2 %v1941_v2, %s1812_s28  ;;  %s1819_s23 = smov 47   ;;  %s1820_s7 = smov 46  }
  0x25   : > { %s1821_s9 = smov 38   ;;  %s1822_s10 = smov 36  }
  0x26   : > { %s1823_s11 = smov 37   ;;  %s1824_s15 = smov 28  }
  0x27   : > { %s1825_s16 = smov 69   ;;  %s1826_s18 = smov 68  }
  0x28   : > { %p377_p13 = scmp.lt.s32.totalorder %s1927_s13, 7 }
  0x2b   : > { %402 = vrot.lane.b32.xlu1 %v1948_v3, %s1810_s30  ;;  %1353 = vrot.lane.b32.xlu0 %v1352_v5, %s1811_s20  ;;  %s1827_s30 = smov 67   ;;  %s1828_s20 = smov 59  }
  0x2c   : > { %411 = vrot.lane.b32.xlu2 %v1948_v3, %s1812_s28  ;;  %s1829_s28 = smov 58  }
  0x33   : > { %420 = vrot.lane.b32.xlu1 %v1948_v3, %s1813_s29  ;;  %1368 = vrot.lane.b32.xlu0 %v1941_v2, %s1813_s29  ;;  %s1830_s29 = smov 57  }
  0x34   : > { %1373 = vrot.lane.b32.xlu2 %v1941_v2, %s1814_s26 }
  0x3b   : > { %1378 = vrot.lane.b32.xlu1 %v1941_v2, %s1815_s25  ;;  %429 = vrot.lane.b32.xlu0 %v1948_v3, %s1814_s26  ;;  %s1831_s26 = smov 49  }
  0x3c   : > { %438 = vrot.lane.b32.xlu2 %v1948_v3, %s1815_s25  ;;  %s1832_s25 = smov 27  }
  0x43   : > { %447 = vrot.lane.b32.xlu1 %v1948_v3, %s1816_s14  ;;  %1383 = vrot.lane.b32.xlu0 %v1941_v2, %s1816_s14  ;;  %s339_s14 = sand.u32 1, %s1784_s21   ;;  %s1257_s21 = sshll.u32 (%p1914_p5), %s1796_s24, 4 }
  0x44   : > { %1388 = vrot.lane.b32.xlu2 %v1941_v2, %s1817_s17 }
  0x4b   : > { %1393 = vrot.lane.b32.xlu1 %v1941_v2, %s1818_s19  ;;  %456 = vrot.lane.b32.xlu0 %v1948_v3, %s1817_s17  ;;  %s1243_s17 = sshll.u32 %s339_s14, 5 }
  0x4c   : > { %1398 = vrot.lane.b32.xlu2 %v1352_v5, %s1818_s19  ;;  %s341_s19 = scalar_lea.vmem [#allocation2], %s1243_s17 }
  0x53   : > { %1408 = vrot.lane.b32.xlu1 %v1352_v5, %s1819_s23  ;;  %1403 = vrot.lane.b32.xlu0 %v1941_v2, %s1819_s23  ;;  %s1096_s23 = sadd.s32 (%p1914_p5), %s1257_s21, %s1927_s13 }
  0x54   : > { %1413 = vrot.lane.b32.xlu2 %v1941_v2, %s1820_s7 }
  0x5b   : > { %1418 = vrot.lane.b32.xlu1 %v1941_v2, %s1821_s9  ;;  %483 = vrot.lane.b32.xlu0 %v1948_v3, %s1820_s7  ;;  %s1834_s7 = smov 91  }
  0x5c   : > { %492 = vrot.lane.b32.xlu2 %v1948_v3, %s1821_s9 }
  0x63   : > { %1428 = vrot.lane.b32.xlu1 %v1427_v6, %s1822_s10  ;;  %1423 = vrot.lane.b32.xlu0 %v1427_v6, %s1823_s11 }
  0x64   : > { %508 = vrot.lane.b32.xlu2 %v1950_v4, %s1822_s10 }
  0x6b   : > { %517 = vrot.lane.b32.xlu1 %v1950_v4, %s1824_s15  ;;  %1433 = vrot.lane.b32.xlu0 %v1427_v6, %s1824_s15 }
  0x6c   : > { %1438 = vrot.lane.b32.xlu2 %v1427_v6, %s1825_s16 }
  0x73   : > { %1443 = vrot.lane.b32.xlu1 %v1427_v6, %s1826_s18  ;;  %529 = vrot.lane.b32.xlu0 %v1950_v4, %s1825_s16 }
  0x74   : > { %538 = vrot.lane.b32.xlu2 %v1950_v4, %s1826_s18 }
  0x7b   : > { %547 = vrot.lane.b32.xlu1 %v1950_v4, %s1827_s30  ;;  %1448 = vrot.lane.b32.xlu0 %v1427_v6, %s1827_s30 }
  0x7c   : > { %1453 = vrot.lane.b32.xlu2 %v1427_v6, %s1828_s20 }
  0x7e   : > { %v1364_v7 = vpop.permute.xlu2 %1363 }
  0x7f   : > { %v1366_v8 = vunpack.i.h.bf16 %v1364_v7  ;;  %v1365_v9 = vunpack.i.l.bf16 %v1364_v7 }
  0x81   : > { %v1979_v10 = vsel %vm413_vm0, %v1365_v9, %v1366_v8 }
  0x82   : > { %2631 = vst [vmem:[#allocation7_spill] sm:$0xff] %v1979_v10 }
  0x83   : > { %1458 = vrot.lane.b32.xlu1 %v1427_v6, %s1829_s28  ;;  %556 = vrot.lane.b32.xlu0 %v1950_v4, %s1828_s20 }
  0x84   : > { %565 = vrot.lane.b32.xlu2 %v1950_v4, %s1829_s28  ;;  %s378_s28 = scalar_select %p377_p13, %s1927_s13, 7 }
  0x86   : > { %v1983_v11 = vpop.permute.xlu2 %411 }
  0x87   : > { %v1986_v12 = vsel %vm413_vm0, %v1366_v8, %v1983_v11  ;;  %vm558_vm0 = vcmask 482304  }
  0x8b   : > { %574 = vrot.lane.b32.xlu1 %v1950_v4, %s1830_s29  ;;  %1463 = vrot.lane.b32.xlu0 %v1427_v6, %s1830_s29 }
  0x8c   : > { %1468 = vrot.lane.b32.xlu2 %v1427_v6, %s1831_s26 }
  0x8e   : > { %v1374_v14 = vpop.permute.xlu2 %1373 }
  0x8f   : > { %v1376_v15 = vunpack.i.h.bf16 %v1374_v14  ;;  %v1375_v16 = vunpack.i.l.bf16 %v1374_v14 }
  0x91   : > { %v1992_v17 = vsel %vm431_vm1, %v1375_v16, %v1376_v15 }
  0x93   : > { %1473 = vrot.lane.b32.xlu1 %v1427_v6, %s1832_s25  ;;  %583 = vrot.lane.b32.xlu0 %v1950_v4, %s1831_s26 }
  0x95   : > { %v1359_v18 = vpop.permute.xlu1 %1358  ;;  %v1349_v19 = vpop.permute.xlu0 %1348 }
  0x96   : > { %v1351_v20 = vunpack.i.h.bf16 %v1349_v19  ;;  %v1350_v21 = vunpack.i.l.bf16 %v1349_v19  ;;  %v1996_v22 = vpop.permute.xlu2 %438  ;;  %v1361_v24 = vunpack.i.h.bf16 %v1359_v18  ;;  %v1360_v25 = vunpack.i.l.bf16 %v1359_v18 }
  0x98   : > { %v1999_v23 = vsel %vm395_vm2, %v1350_v21, %v1351_v20  ;;  %v2003_v27 = vsel %vm404_vm3, %v1360_v25, %v1361_v24 }
  0x9d   : > { %v2001_v26 = vpop.permute.xlu1 %402  ;;  %v1354_v28 = vpop.permute.xlu0 %1353 }
  0x9e   : > { %2632 = vst [vmem:[#allocation8_spill] sm:$0xff] %v2001_v26  ;;  %v2008_v30 = vsel %vm404_vm3, %v1361_v24, %v2001_v26  ;;  %v1356_v31 = vunpack.i.h.bf16 %v1354_v28  ;;  %v2010_v32 = vunpack.i.l.bf16 %v1354_v28  ;;  %v1389_v33 = vpop.permute.xlu2 %1388  ;;  %vm576_vm3 = vcmask 465920  }
  0x9f   : > { %v1391_v35 = vunpack.i.h.bf16 %v1389_v33  ;;  %v1390_v36 = vunpack.i.l.bf16 %v1389_v33 }
  0xa0   : > { %v524_v37 = vsel %vm395_vm2, %v2010_v32, %v1356_v31  ;;  %v2018_v38 = vsel %vm395_vm2, %v1351_v20, %v2010_v32  ;;  %vm567_vm2 = vcmask 474112  }
  0xa1   : > { %v1482_v39 = vpack.i.bf16 %v1356_v31, %v524_v37  ;;  %v1477_v40 = vpack.i.bf16 %v2018_v38, %v1950_v4  ;;  %v2025_v42 = vsel %vm458_vm4, %v1390_v36, %v1391_v35 }
  0xa3   : > { %1483 = vrot.lane.b32.xlu0 %v1482_v39, %s1832_s25  ;;  %1478 = vrot.lane.b32.xlu2 %v1477_v40, %s1832_s25 }
  0xa5   : > { %v2029_v43 = vpop.permute.xlu1 %420  ;;  %v1369_v44 = vpop.permute.xlu0 %1368 }
  0xa6   : > { %v1371_v45 = vunpack.i.h.bf16 %v1369_v44  ;;  %v1370_v46 = vunpack.i.l.bf16 %v1369_v44  ;;  %v2031_v47 = vpop.permute.xlu2 %1398 }
  0xa7   : > { %v2070_v6 = vunpack.i.l.bf16 %v2031_v47 }
  0xa8   : > { %v2034_v48 = vsel %vm422_vm5, %v1371_v45, %v2029_v43  ;;  %v2036_v49 = vsel %vm422_vm5, %v1370_v46, %v1371_v45  ;;  %vm501_vm5 = vcmask 302080  }
  0xa9   : > { %2633 = vst [vmem:[#allocation9_spill] sm:$0xff] %v2036_v49 }
  0xad   : > { %v1379_v51 = vpop.permute.xlu1 %1378  ;;  %v2040_v52 = vpop.permute.xlu0 %429 }
  0xae   : > { %v1381_v53 = vunpack.i.h.bf16 %v1379_v51  ;;  %v1380_v54 = vunpack.i.l.bf16 %v1379_v51  ;;  %v2044_v55 = vsel %vm431_vm1, %v1376_v15, %v2040_v52  ;;  %v1414_v56 = vpop.permute.xlu2 %1413  ;;  %vm549_vm1 = vcmask 547840  }
  0xaf   : > { %v1416_v58 = vunpack.i.h.bf16 %v1414_v56  ;;  %v1415_v59 = vunpack.i.l.bf16 %v1414_v56 }
  0xb0   : > { %v2049_v60 = vsel %vm440_vm6, %v1381_v53, %v1996_v22  ;;  %v2051_v61 = vsel %vm440_vm6, %v1380_v54, %v1381_v53  ;;  %vm660_vm6 = vcmask 220160  }
  0xb1   : > { %v2056_v63 = vsel %vm485_vm7, %v1415_v59, %v1416_v58 }
  0xb5   : > { %v2058_v0 = vpop.permute.xlu1 %447  ;;  %v2060_v1 = vpop.permute.xlu0 %1383 }
  0xb6   : > { %v2622_v4 = vunpack.i.h.bf16 %v2060_v1  ;;  %v2078_v16 = vpop.permute.xlu2 %492 }
  0xb8   : > { %v2067_v5 = vsel %vm449_vm8, %v2622_v4, %v2058_v0 }
  0xbd   : > { %v1394_v7 = vpop.permute.xlu1 %1393  ;;  %v2072_v8 = vpop.permute.xlu0 %456 }
  0xbe   : > { %v1396_v9 = vunpack.i.h.bf16 %v1394_v7  ;;  %v1395_v14 = vunpack.i.l.bf16 %v1394_v7  ;;  %v2076_v15 = vsel %vm458_vm4, %v1391_v35, %v2072_v8  ;;  %v509_v35 = vpop.permute.xlu2 %508  ;;  %vm585_vm4 = vcmask 400384  }
  0xc0   : > { %v2084_v19 = vsel %vm467_vm9, %v1396_v9, %v2070_v6  ;;  %v2087_v20 = vsel %vm467_vm9, %v1395_v14, %v1396_v9 }
  0xc5   : > { %v2089_v21 = vpop.permute.xlu1 %1408  ;;  %v1404_v24 = vpop.permute.xlu0 %1403 }
  0xc6   : > { %v2624_v25 = vunpack.i.h.bf16 %v2089_v21  ;;  %v2093_v28 = vunpack.i.l.bf16 %v2089_v21  ;;  %v1406_v31 = vunpack.i.h.bf16 %v1404_v24  ;;  %v1405_v33 = vunpack.i.l.bf16 %v1404_v24  ;;  %v1439_v24 = vpop.permute.xlu2 %1438 }
  0xc7   : > { %v1440_v44 = vunpack.i.l.bf16 %v1439_v24 }
  0xc8   : > { %v2096_v36 = vsel %vm476_vm10, %v1406_v31, %v2093_v28  ;;  %v2101_v37 = vsel %vm476_vm10, %v2093_v28, %v2624_v25  ;;  %v2103_v39 = vsel %vm476_vm10, %v1405_v33, %v1406_v31 }
  0xcd   : > { %v1419_v46 = vpop.permute.xlu1 %1418  ;;  %v484_v51 = vpop.permute.xlu0 %483 }
  0xce   : > { %v1421_v53 = vunpack.i.h.bf16 %v1419_v46  ;;  %v1420_v54 = vunpack.i.l.bf16 %v1419_v46  ;;  %v487_v56 = vsel %vm485_vm7, %v1416_v58, %v484_v51  ;;  %v539_v45 = vpop.permute.xlu2 %538  ;;  %vm861_vm7 = vcmask 744448  }
  0xd0   : > { %v2113_v59 = vsel %vm494_vm11, %v1421_v53, %v2078_v16  ;;  %v2115_v7 = vsel %vm494_vm11, %v1420_v54, %v1421_v53 }
  0xd5   : > { %v1429_v31 = vpop.permute.xlu1 %1428  ;;  %v2121_v33 = vpop.permute.xlu0 %1423 }
  0xd6   : > { %v1431_v29 = vunpack.i.h.bf16 %v1429_v31  ;;  %v1430_v46 = vunpack.i.l.bf16 %v1429_v31  ;;  %v2623_v58 = vunpack.i.l.bf16 %v2121_v33 }
  0xd8   : > { %v2124_v4 = vpack.i.bf16 %v1430_v46, %v484_v51  ;;  %v2129_v53 = vpack.i.bf16 %v2084_v19, %v2623_v58  ;;  %v2131_v54 = vsel %vm510_vm12, %v1430_v46, %v1431_v29  ;;  %v2133_v13 = vsel %vm510_vm12, %v1431_v29, %v509_v35 }
  0xd9   : > { %v1441_v51 = vunpack.i.h.bf16 %v1439_v24 }
  0xdb   : > { %v532_v35 = vsel %vm531_vm14, %v1440_v44, %v1441_v51 }
  0xdd   : > { %v518_v57 = vpop.permute.xlu1 %517  ;;  %v1434_v18 = vpop.permute.xlu0 %1433 }
  0xde   : > { %v1436_v31 = vunpack.i.h.bf16 %v1434_v18  ;;  %v1435_v62 = vunpack.i.l.bf16 %v1434_v18  ;;  %v1454_v18 = vpop.permute.xlu2 %1453 }
  0xdf   : > { %v1456_v24 = vunpack.i.h.bf16 %v1454_v18 }
  0xe0   : > { %v2137_v14 = vpack.i.bf16 %v487_v56, %v1435_v62  ;;  %v2139_v9 = vsel %vm519_vm13, %v1435_v62, %v1436_v31  ;;  %v2141_v41 = vsel %vm519_vm13, %v1436_v31, %v518_v57  ;;  %v1455_v56 = vunpack.i.l.bf16 %v1454_v18 }
  0xe2   : > { %v559_v44 = vsel %vm558_vm0, %v1455_v56, %v1456_v24 }
  0xe5   : > { %v1444_v46 = vpop.permute.xlu1 %1443  ;;  %v530_v50 = vpop.permute.xlu0 %529 }
  0xe6   : > { %v1446_v58 = vunpack.i.h.bf16 %v1444_v46  ;;  %v1445_v34 = vunpack.i.l.bf16 %v1444_v46  ;;  %v533_v25 = vsel %vm531_vm14, %v1441_v51, %v530_v50 }
  0xe7   : > { %v1487_v40 = vpack.i.bf16 %v533_v25, %v532_v35 }
  0xe8   : > { %v541_v49 = vsel %vm540_vm15, %v1445_v34, %v1446_v58  ;;  %v542_v62 = vsel %vm540_vm15, %v1446_v58, %v539_v45 }
  0xe9   : > { %v1492_v10 = vpack.i.bf16 %v541_v49, %v530_v50  ;;  %1488 = vrot.lane.b32.xlu1 %v1487_v40, %s1832_s25  ;;  %v1497_v57 = vpack.i.bf16 %v539_v45, %v542_v62  ;;  %v1833_v49 = vmov 0   ;;  %v566_v50 = vpop.permute.xlu2 %565 }
  0xea   : > { %1552 = vset.pattern.permute.xlu0 %v1833_v49  ;;  %1553 = vset.pattern.permute.xlu1 %v1833_v49 }
  0xeb   : > { %1498 = vrot.lane.b32.xlu0 %v1497_v57, %s1832_s25  ;;  %1493 = vrot.lane.b32.xlu2 %v1492_v10, %s1832_s25 }
  0xed   : > { %v548_v31 = vpop.permute.xlu1 %547  ;;  %v1449_v46 = vpop.permute.xlu0 %1448 }
  0xee   : > { %v1451_v51 = vunpack.i.h.bf16 %v1449_v46  ;;  %v1450_v25 = vunpack.i.l.bf16 %v1449_v46  ;;  %v1507_v35 = vpack.i.bf16 %v559_v44, %v548_v31 }
  0xf0   : > { %v550_v18 = vsel %vm549_vm1, %v1450_v25, %v1451_v51  ;;  %v551_v34 = vsel %vm549_vm1, %v1451_v51, %v548_v31 }
  0xf1   : > { %v1502_v58 = vpack.i.bf16 %v551_v34, %v550_v18  ;;  %v1469_v18 = vpop.permute.xlu2 %1468 }
  0xf2   : > { %v1470_v49 = vunpack.i.l.bf16 %v1469_v18 }
  0xf3   : > { %1503 = vrot.lane.b32.xlu1 %v1502_v58, %s1832_s25  ;;  %1508 = vrot.lane.b32.xlu2 %v1507_v35, %s1832_s25  ;;  %v1471_v58 = vunpack.i.h.bf16 %v1469_v18  ;;  %v2638_v18 = vpack.i.bf16 %v2010_v32, %v2018_v38  ;;  %v2645_v38 = vpack.i.bf16 %v2072_v8, %v2076_v15 }
  0xf5   : > { %v1459_v10 = vpop.permute.xlu1 %1458  ;;  %v557_v40 = vpop.permute.xlu0 %556 }
  0xf6   : > { %v1461_v45 = vunpack.i.h.bf16 %v1459_v10  ;;  %v1460_v56 = vunpack.i.l.bf16 %v1459_v10  ;;  %v560_v62 = vsel %vm558_vm0, %v1456_v24, %v557_v40 }
  0xf7   : > { %v1512_v57 = vpack.i.bf16 %v557_v40, %v560_v62  ;;  %v1401_v40 = vunpack.i.h.bf16 %v2031_v47  ;;  %v2634_v47 = vpack.i.bf16 %v2101_v37, %v2096_v36 }
  0xf8   : > { %v568_v44 = vsel %vm567_vm2, %v1460_v56, %v1461_v45  ;;  %v569_v46 = vsel %vm567_vm2, %v1461_v45, %v566_v50  ;;  %v586_v45 = vsel %vm585_vm4, %v1470_v49, %v1471_v58 }
  0xf9   : > { %1513 = vrot.lane.b32.xlu0 %v1512_v57, %s1832_s25  ;;  %v1517_v31 = vpack.i.bf16 %v569_v46, %v568_v44  ;;  %v590_v62 = vsel %vm467_vm9, %v2070_v6, %v1401_v40 }
  0xfa   : > { %v1542_v46 = vpack.i.bf16 %v1401_v40, %v590_v62 }
  0xfb   : > { %1518 = vrot.lane.b32.xlu1 %v1517_v31, %s1832_s25 }
  0xfd   : > { %v1464_v51 = vpop.permute.xlu0 %1463  ;;  %v575_v34 = vpop.permute.xlu1 %574 }
  0xfe   : > { %v1466_v25 = vunpack.i.h.bf16 %v1464_v51  ;;  %v1465_v35 = vunpack.i.l.bf16 %v1464_v51  ;;  %v2636_v51 = vpack.i.bf16 %v2008_v30, %v2003_v27  ;;  %v2642_v27 = vpack.i.bf16 %v2115_v7, %v2070_v6  ;;  %v2223_v32 = vpop.permute.xlu2 %1478 }
  0xff   : > { %v2643_v30 = vpack.i.bf16 %v2093_v28, %v2096_v36  ;;  %v2647_v6 = vpack.i.bf16 %v2103_v39, %v2058_v0 }
 0x100   : > { %v578_v29 = vsel %vm576_vm3, %v1466_v25, %v575_v34  ;;  %v577_v10 = vsel %vm576_vm3, %v1465_v35, %v1466_v25  ;;  %v1559_v25 = vpack.i.bf16 %v1999_v23, %v1948_v3  ;;  %v2640_v3 = vpack.i.bf16 %v2133_v13, %v2131_v54 }
 0x101   : > { %v1527_v26 = vpack.i.bf16 %v575_v34, %v578_v29  ;;  %v1522_v24 = vpack.i.bf16 %v577_v10, %v566_v50  ;;  %v2635_v29 = vunpack.i.h.bf16 %v2089_v21  ;;  %v1426_v50 = vunpack.i.h.bf16 %v2121_v33 }
 0x102   : > { %v2637_v21 = vunpack.i.l.bf16 %v2121_v33  ;;  %v2641_v23 = vpack.i.bf16 %v2078_v16, %v2113_v59  ;;  %v2644_v13 = vpack.i.bf16 %v1996_v22, %v2049_v60  ;;  %v2648_v22 = vpack.i.bf16 %v2029_v43, %v2034_v48 }
 0x103   : > { %1528 = vrot.lane.b32.xlu0 %v1527_v26, %s1832_s25  ;;  %1523 = vrot.lane.b32.xlu2 %v1522_v24, %s1832_s25  ;;  %v687_v26 = vld [vmem:[%s2615_s4] sm:$0xff] }
 0x104   : > { %v502_v37 = vsel %vm501_vm5, %v2637_v21, %v1426_v50 }
 0x105   : > { %v584_v56 = vpop.permute.xlu0 %583  ;;  %v1584_v35 = vpack.i.bf16 %v1426_v50, %v502_v37  ;;  %v2245_v8 = vpop.permute.xlu1 %1473 }
 0x106   : > { %v587_v57 = vsel %vm585_vm4, %v1471_v58, %v584_v56  ;;  %v1537_v31 = vpack.i.bf16 %v2084_v19, %v584_v56  ;;  %v688_v19 = vld [vmem:[%s2615_s4 + $0x8] sm:$0xff] }
 0x107   : > { %v1532_v44 = vpack.i.bf16 %v587_v57, %v586_v45 }
 0x109   : > { %1533 = vrot.lane.b32.xlu1 %v1532_v44, %s1832_s25  ;;  %v1385_v44 = vunpack.i.l.bf16 %v2060_v1 }
 0x10b   : > { %1543 = vrot.lane.b32.xlu0 %v1542_v46, %s1832_s25  ;;  %1538 = vrot.lane.b32.xlu2 %v1537_v31, %s1832_s25 }
 0x111   : > { %1548 = vrot.lane.b32.xlu1 %v2634_v47, %s1832_s25 }
 0x113   : > { %691 = vperm.xlu0 %1552, %v687_v26   ;;  %658 = vrot.lane.b32.xlu2 %v2635_v29, %s1832_s25  ;;  %s379_s25 = scalar_lea.vmem %s2616_s5, %s378_s28 }
 0x119   : > { %696 = vperm.xlu1 %1553, %v688_v19  }
 0x11b   : > { %1570 = vrot.lane.b32.xlu0 %v2636_v51, %s1834_s7  ;;  %1555 = vrot.lane.b32.xlu2 %v1941_v2, %s1834_s7  ;;  %v2639_v2 = vpack.i.bf16 %v2141_v41, %v2139_v9  ;;  %v2646_v41 = vpack.i.bf16 %v2040_v52, %v2044_v55  ;;  %v2649_v52 = vpack.i.bf16 %v1983_v11, %v1986_v12  ;;  %v2251_v55 = vpop.permute.xlu0 %1483 }
 0x121   : > { %1560 = vrot.lane.b32.xlu1 %v1559_v25, %s1834_s7 }
 0x123   : > { %1585 = vrot.lane.b32.xlu0 %v1584_v35, %s1834_s7  ;;  %1565 = vrot.lane.b32.xlu2 %v2638_v18, %s1834_s7  ;;  %v2650_v35 = vunpack.i.h.bf16 %v2060_v1 }
 0x125   : > { %v450_v18 = vsel %vm449_vm8, %v1385_v44, %v2650_v35  ;;  %vm970_vm8 = vcmask 719872  }
 0x129   : > { %1575 = vrot.lane.b32.xlu1 %v2639_v2, %s1834_s7 }
 0x12b   : > { %1600 = vrot.lane.b32.xlu0 %v2124_v4, %s1834_s7  ;;  %1580 = vrot.lane.b32.xlu2 %v2640_v3, %s1834_s7 }
 0x131   : > { %1590 = vrot.lane.b32.xlu1 %v2641_v23, %s1834_s7 }
 0x133   : > { %1615 = vrot.lane.b32.xlu0 %v2642_v27, %s1834_s7  ;;  %1595 = vrot.lane.b32.xlu2 %v2137_v14, %s1834_s7 }
 0x139   : > { %1605 = vrot.lane.b32.xlu1 %v2643_v30, %s1834_s7 }
 0x13b   : > { %1610 = vrot.lane.b32.xlu2 %v2129_v53, %s1834_s7 }
 0x141   : > { %1630 = vrot.lane.b32.xlu1 %v2644_v13, %s1834_s7 }
 0x143   : > { %1620 = vrot.lane.b32.xlu2 %v2645_v38, %s1834_s7 }
 0x145   : > { %v2233_v4 = vpop.permute.xlu2 %1493 }
 0x149   : > { %1635 = vrot.lane.b32.xlu1 %v2646_v41, %s1834_s7 }
 0x14b   : > { %1625 = vrot.lane.b32.xlu2 %v2647_v6, %s1834_s7 }
 0x14d   : > { %v2243_v60 = vpop.permute.xlu2 %1508 }
 0x14e   : > { %v1511_v31 = vunpack.i.h.bf16 %v2243_v60 }
 0x151   : > { %1640 = vrot.lane.b32.xlu1 %v2648_v22, %s1834_s7 }
 0x159   : > { %1645 = vrot.lane.b32.xlu1 %v2649_v52, %s1834_s7 }
 0x15b   : > { %v2255_v0 = vpop.permute.xlu1 %1488 }
 0x15d   : > { %v2253_v15 = vpop.permute.xlu2 %1523  ;;  %v2257_v16 = vpop.permute.xlu0 %1498 }
 0x15e   : > { %v1526_v12 = vunpack.i.h.bf16 %v2253_v15 }
 0x165   : > { %v2259_v28 = vpop.permute.xlu2 %1538  ;;  %v2261_v43 = vpop.permute.xlu1 %1503 }
 0x166   : > { %v1541_v58 = vunpack.i.h.bf16 %v2259_v28  ;;  %v1540_v26 = vunpack.i.l.bf16 %v2259_v28  ;;  %v1506_v27 = vunpack.i.h.bf16 %v2261_v43  ;;  %v1505_v30 = vunpack.i.l.bf16 %v2261_v43 }
 0x168   : > { %v669_v6 = vsel %vm660_vm6, %v1505_v30, %v1506_v27 }
 0x16b   : > { %v2263_v48 = vpop.permute.xlu0 %1513 }
 0x16c   : > { %v1515_v56 = vunpack.i.l.bf16 %v2263_v48 }
 0x16d   : > { %v659_v36 = vpop.permute.xlu2 %658  ;;  %v2265_v39 = vpop.permute.xlu1 %1518 }
 0x16e   : > { %v1521_v33 = vunpack.i.h.bf16 %v2265_v39  ;;  %v1520_v53 = vunpack.i.l.bf16 %v2265_v39  ;;  %v671_v51 = vsel %vm660_vm6, %v1511_v31, %v1515_v56 }
 0x16f   : > { %v1689_v23 = vpack.i.bf16 %v671_v51, %v450_v18  ;;  %v1495_v51 = vunpack.i.l.bf16 %v2233_v4 }
 0x175   : > { %v1529_v59 = vpop.permute.xlu0 %1528  ;;  %v2267_v11 = vpop.permute.xlu2 %1555 }
 0x176   : > { %v1530_v7 = vunpack.i.l.bf16 %v1529_v59  ;;  %v1531_v38 = vunpack.i.h.bf16 %v1529_v59  ;;  %v1500_v59 = vunpack.i.l.bf16 %v2257_v16 }
 0x178   : > { %v675_v9 = vsel %vm660_vm6, %v1526_v12, %v1530_v7  ;;  %v676_v22 = vsel %vm660_vm6, %v1530_v7, %v1531_v38 }
 0x179   : > { %v1669_v14 = vpack.i.bf16 %v675_v9, %v2087_v20  ;;  %v673_v20 = vsel %vm660_vm6, %v1520_v53, %v1521_v33  ;;  %v1699_v9 = vpack.i.bf16 %v669_v6, %v2051_v61 }
 0x17a   : > { %v1679_v45 = vpack.i.bf16 %v673_v20, %v2025_v42  ;;  %v1525_v20 = vunpack.i.l.bf16 %v2253_v15 }
 0x17b   : > { %v2276_v54 = vpop.permute.xlu1 %1533  ;;  %1670 = vrot.lane.b32.xlu2 %v1669_v14, %s1834_s7  ;;  %v1501_v14 = vunpack.i.h.bf16 %v2257_v16 }
 0x17c   : > { %v1536_v62 = vunpack.i.h.bf16 %v2276_v54  ;;  %v1535_v57 = vunpack.i.l.bf16 %v2276_v54  ;;  %v1510_v54 = vunpack.i.l.bf16 %v2243_v60 }
 0x17d   : > { %v1544_v34 = vpop.permute.xlu0 %1543  ;;  %v2280_v10 = vpop.permute.xlu2 %1565  ;;  %v668_v44 = vsel %vm660_vm6, %v1500_v59, %v1501_v14 }
 0x17e   : > { %v1545_v49 = vunpack.i.l.bf16 %v1544_v34  ;;  %v677_v19 = vsel %vm660_vm6, %v1535_v57, %v1536_v62  ;;  %v678_v50 = vsel %vm660_vm6, %v1536_v62, %v1540_v26  ;;  %v1546_v2 = vunpack.i.h.bf16 %v1544_v34 }
 0x17f   : > { %v1664_v3 = vpack.i.bf16 %v678_v50, %v677_v19  ;;  %v2651_v19 = vld [vmem:[#allocation8_spill] sm:$0xff] }
 0x180   : > { %v679_v24 = vsel %vm660_vm6, %v1541_v58, %v1545_v49  ;;  %v680_v1 = vsel %vm660_vm6, %v1545_v49, %v1546_v2  ;;  %v1558_v49 = vunpack.i.h.bf16 %v2267_v11  ;;  %v2652_v50 = vpack.i.bf16 %v1992_v17, %v2651_v19 }
 0x181   : > { %v1654_v40 = vpack.i.bf16 %v679_v24, %v2056_v63  ;;  %v1659_v52 = vpack.i.bf16 %v2067_v5, %v680_v1  ;;  %v1496_v5 = vunpack.i.h.bf16 %v2233_v4  ;;  %v1480_v19 = vunpack.i.l.bf16 %v2223_v32 }
 0x183   : > { %v1549_v46 = vpop.permute.xlu1 %1548  ;;  %1655 = vrot.lane.b32.xlu0 %v1654_v40, %s1834_s7  ;;  %1680 = vrot.lane.b32.xlu2 %v1679_v45, %s1834_s7  ;;  %v1567_v40 = vunpack.i.l.bf16 %v2280_v10  ;;  %v674_v45 = vsel %vm660_vm6, %v1521_v33, %v1525_v20  ;;  %v667_v62 = vsel %vm660_vm6, %v1496_v5, %v1500_v59  ;;  %v1490_v33 = vunpack.i.l.bf16 %v2255_v0 }
 0x184   : > { %v1551_v63 = vunpack.i.h.bf16 %v1549_v46  ;;  %v1550_v47 = vunpack.i.l.bf16 %v1549_v46 }
 0x185   : > { %v2300_v42 = vpop.permute.xlu0 %691  ;;  %v2313_v37 = vpop.permute.xlu2 %1580 }
 0x186   : > { %v681_v29 = vsel %vm660_vm6, %v1550_v47, %v1551_v63  ;;  %v682_v21 = vsel %vm660_vm6, %v1551_v63, %v659_v36  ;;  %v1674_v36 = vpack.i.bf16 %v1550_v47, %v676_v22  ;;  %v1491_v63 = vunpack.i.h.bf16 %v2255_v0 }
 0x187   : > { %v1649_v25 = vpack.i.bf16 %v682_v21, %v681_v29  ;;  %v1684_v47 = vpack.i.bf16 %v1541_v58, %v674_v45  ;;  %v1714_v29 = vpack.i.bf16 %v668_v44, %v667_v62  ;;  %v1582_v38 = vunpack.i.l.bf16 %v2313_v37 }
 0x188   : > { %v665_v17 = vsel %vm660_vm6, %v1490_v33, %v1491_v63 }
 0x189   : > { %1650 = vrot.lane.b32.xlu1 %v1649_v25, %s1834_s7  ;;  %v1516_v25 = vunpack.i.h.bf16 %v2263_v48 }
 0x18b   : > { %v2321_v13 = vpop.permute.xlu1 %696  ;;  %1665 = vrot.lane.b32.xlu0 %v1664_v3, %s1834_s7  ;;  %1690 = vrot.lane.b32.xlu2 %v1689_v23, %s1834_s7  ;;  %v666_v3 = vsel %vm660_vm6, %v1491_v63, %v1495_v51  ;;  %v1583_v23 = vunpack.i.h.bf16 %v2313_v37  ;;  %v1475_v37 = vunpack.i.l.bf16 %v2245_v8 }
 0x18c   : > { %v1724_v59 = vpack.i.bf16 %v666_v3, %v665_v17 }
 0x18d   : > { %v2325_v41 = vpop.permute.xlu0 %1570  ;;  %v2338_v34 = vpop.permute.xlu2 %1595  ;;  %v891_v48 = vsel %vm861_vm7, %v1582_v38, %v1583_v23 }
 0x18e   : > { %v1597_v58 = vunpack.i.l.bf16 %v2338_v34  ;;  %v1598_v60 = vunpack.i.h.bf16 %v2338_v34 }
 0x191   : > { %1660 = vrot.lane.b32.xlu1 %v1659_v52, %s1834_s7 }
 0x193   : > { %1675 = vrot.lane.b32.xlu0 %v1674_v36, %s1834_s7  ;;  %1700 = vrot.lane.b32.xlu2 %v1699_v9, %s1834_s7  ;;  %v1561_v7 = vpop.permute.xlu1 %1560  ;;  %v672_v9 = vsel %vm660_vm6, %v1515_v56, %v1516_v25  ;;  %v1476_v56 = vunpack.i.h.bf16 %v2245_v8 }
 0x194   : > { %v1563_v61 = vunpack.i.h.bf16 %v1561_v7  ;;  %v1562_v24 = vunpack.i.l.bf16 %v1561_v7  ;;  %v1694_v20 = vpack.i.bf16 %v1535_v57, %v672_v9 }
 0x195   : > { %v1586_v16 = vpop.permute.xlu0 %1585  ;;  %v2376_v35 = vpop.permute.xlu2 %1610  ;;  %v661_v44 = vsel %vm660_vm6, %v1475_v37, %v1476_v56  ;;  %v662_v25 = vsel %vm660_vm6, %v1476_v56, %v1480_v19 }
 0x196   : > { %v2357_v46 = vsel %vm861_vm7, %v1558_v49, %v1562_v24  ;;  %v2362_v26 = vsel %vm861_vm7, %v1563_v61, %v1567_v40  ;;  %v1587_v6 = vunpack.i.l.bf16 %v1586_v16  ;;  %v1612_v22 = vunpack.i.l.bf16 %v2376_v35  ;;  %v2653_v61 = vld [vmem:[#allocation7_spill] sm:$0xff] }
 0x197   : > { %v1588_v14 = vunpack.i.h.bf16 %v1586_v16  ;;  %v1729_v24 = vpack.i.bf16 %v2653_v61, %v1511_v31  ;;  %v1739_v51 = vpack.i.bf16 %v661_v44, %v1505_v30  ;;  %v1613_v17 = vunpack.i.h.bf16 %v2376_v35 }
 0x198   : > { %v888_v45 = vsel %vm861_vm7, %v1612_v22, %v1587_v6 }
 0x199   : > { %1710 = vrot.lane.b32.xlu1 %v2652_v50, %s1834_s7  ;;  %v889_v31 = vsel %vm861_vm7, %v1587_v6, %v1588_v14  ;;  %v1481_v6 = vunpack.i.h.bf16 %v2223_v32 }
 0x19b   : > { %1685 = vrot.lane.b32.xlu0 %v1684_v47, %s1834_s7  ;;  %1715 = vrot.lane.b32.xlu2 %v1714_v29, %s1834_s7  ;;  %v1576_v21 = vpop.permute.xlu1 %1575  ;;  %v670_v29 = vsel %vm660_vm6, %v1506_v27, %v1510_v54 }
 0x19c   : > { %v1578_v18 = vunpack.i.h.bf16 %v1576_v21  ;;  %v1577_v28 = vunpack.i.l.bf16 %v1576_v21  ;;  %v1704_v27 = vpack.i.bf16 %v1526_v12, %v670_v29 }
 0x19d   : > { %v1601_v2 = vpop.permute.xlu0 %1600  ;;  %v1621_v34 = vpop.permute.xlu2 %1620 }
 0x19e   : > { %v1603_v1 = vunpack.i.h.bf16 %v1601_v2  ;;  %v892_v52 = vsel %vm861_vm7, %v1597_v58, %v1577_v28  ;;  %v893_v36 = vsel %vm861_vm7, %v1577_v28, %v1578_v18  ;;  %v1602_v63 = vunpack.i.l.bf16 %v1601_v2 }
 0x19f   : > { %977 = vmatpush.msra.mxu0 %v892_v52  ;;  %1023 = vmatpush.msra.mxu2 %v893_v36  ;;  %v1744_v28 = vpack.i.bf16 %v1496_v5, %v662_v25  ;;  %v1623_v3 = vunpack.i.h.bf16 %v1621_v34  ;;  %v1622_v15 = vunpack.i.l.bf16 %v1621_v34  ;;  %v2654_v5 = vld [vmem:[#allocation9_spill] sm:$0xff] }
 0x1a0   : > { %v890_v7 = vsel %vm861_vm7, %v1603_v1, %v1582_v38  ;;  %v885_v18 = vsel %vm861_vm7, %v1598_v60, %v1602_v63  ;;  %v1719_v23 = vpack.i.bf16 %v2654_v5, %v1520_v53  ;;  %v1486_v38 = vunpack.i.h.bf16 %v2251_v55 }
 0x1a1   : > { %1725 = vrot.lane.b32.xlu1 %v1724_v59, %s1834_s7  ;;  %978 = vmatpush.msra.mxu0 %v890_v7  ;;  %v1485_v1 = vunpack.i.l.bf16 %v2251_v55  ;;  %v879_v35 = vsel %vm861_vm7, %v1622_v15, %v1623_v3  ;;  %v1749_v53 = vpack.i.bf16 %v1481_v6, %v1490_v33 }
 0x1a2   : > { %1024 = vmatpush.msra.mxu2 %v891_v48 }
 0x1a3   : > { %1695 = vrot.lane.b32.xlu0 %v1694_v20, %s1834_s7  ;;  %v1591_v16 = vpop.permute.xlu1 %1590  ;;  %1730 = vrot.lane.b32.xlu2 %v1729_v24, %s1834_s7  ;;  %v663_v22 = vsel %vm660_vm6, %v1481_v6, %v1485_v1  ;;  %v664_v39 = vsel %vm660_vm6, %v1485_v1, %v1486_v38 }
 0x1a4   : > { %v1593_v57 = vunpack.i.h.bf16 %v1591_v16  ;;  %v1592_v62 = vunpack.i.l.bf16 %v1591_v16  ;;  %979 = vmatpush.msra.mxu0 %v888_v45  ;;  %1025 = vmatpush.msra.mxu2 %v889_v31  ;;  %v1734_v52 = vpack.i.bf16 %v664_v39, %v663_v22 }
 0x1a5   : > { %v1616_v8 = vpop.permute.xlu0 %1615  ;;  %v1626_v36 = vpop.permute.xlu2 %1625 }
 0x1a6   : > { %v1618_v47 = vunpack.i.h.bf16 %v1616_v8  ;;  %v887_v50 = vsel %vm861_vm7, %v1592_v62, %v1593_v57  ;;  %v1617_v30 = vunpack.i.l.bf16 %v1616_v8  ;;  %v1628_v0 = vunpack.i.h.bf16 %v1626_v36 }
 0x1a7   : > { %1026 = vmatpush.msra.mxu2 %v887_v50  ;;  %v1627_v8 = vunpack.i.l.bf16 %v1626_v36 }
 0x1a8   : > { %v886_v21 = vsel %vm861_vm7, %v1618_v47, %v1592_v62  ;;  %v881_v4 = vsel %vm861_vm7, %v1613_v17, %v1617_v30 }
 0x1a9   : > { %980 = vmatpush.msra.mxu0 %v886_v21  ;;  %1740 = vrot.lane.b32.xlu1 %v1739_v51, %s1834_s7 }
 0x1aa   : > { %1027 = vmatpush.msra.mxu2 %v885_v18 }
 0x1ab   : > { %1705 = vrot.lane.b32.xlu0 %v1704_v27, %s1834_s7  ;;  %v1606_v43 = vpop.permute.xlu1 %1605  ;;  %1745 = vrot.lane.b32.xlu2 %v1744_v28, %s1834_s7 }
 0x1ac   : > { %v1608_v58 = vunpack.i.h.bf16 %v1606_v43  ;;  %v1607_v2 = vunpack.i.l.bf16 %v1606_v43 }
 0x1ae   : > { %v883_v12 = vsel %vm861_vm7, %v1607_v2, %v1608_v58  ;;  %v882_v56 = vsel %vm861_vm7, %v1628_v0, %v1607_v2  ;;  %v1568_v0 = vunpack.i.h.bf16 %v2280_v10 }
 0x1af   : > { %1028 = vmatpush.msra.mxu2 %v883_v12 }
 0x1b1   : > { %1029 = vmatpush.msra.mxu2 %v881_v4  ;;  %795 = vrot.lane.b32.xlu1 %v1475_v37, %s1834_s7 }
 0x1b3   : > { %1720 = vrot.lane.b32.xlu0 %v1719_v23, %s1834_s7  ;;  %1030 = vmatpush.msra.mxu2 %v879_v35  ;;  %v1631_v55 = vpop.permute.xlu1 %1630 }
 0x1b4   : > { %v1633_v47 = vunpack.i.h.bf16 %v1631_v55  ;;  %v1632_v29 = vunpack.i.l.bf16 %v1631_v55 }
 0x1b6   : > { %v875_v23 = vsel %vm861_vm7, %v1632_v29, %v1633_v47 }
 0x1bb   : > { %1735 = vrot.lane.b32.xlu0 %v1734_v52, %s1834_s7  ;;  %v2443_v9 = vpop.permute.xlu1 %1635 }
 0x1bc   : > { %v1638_v43 = vunpack.i.h.bf16 %v2443_v9  ;;  %v1637_v30 = vunpack.i.l.bf16 %v2443_v9 }
 0x1be   : > { %v873_v22 = vsel %vm861_vm7, %v1637_v30, %v1638_v43 }
 0x1c3   : > { %1750 = vrot.lane.b32.xlu0 %v1749_v53, %s1834_s7  ;;  %v2447_v59 = vpop.permute.xlu1 %1640  ;;  %s1258_s7 = sshll.u32 (%p1914_p5), %s1096_s23, 3 }
 0x1c4   : > { %v1643_v12 = vunpack.i.h.bf16 %v2447_v59  ;;  %v1642_v4 = vunpack.i.l.bf16 %v2447_v59  ;;  %s1098_s11 = scalar_lea.vmem (%p1914_p5), %s2617_s6, %s1258_s7 }
 0x1c6   : > { %v871_v9 = vsel %vm861_vm7, %v1642_v4, %v1643_v12  ;;  %v1572_v12 = vunpack.i.l.bf16 %v2325_v41 }
 0x1cb   : > { %v2451_v7 = vpop.permute.xlu1 %1645 }
 0x1cc   : > { %v1648_v35 = vunpack.i.h.bf16 %v2451_v7  ;;  %v1647_v6 = vunpack.i.l.bf16 %v2451_v7 }
 0x1d5   : > { %v2445_v14 = vpop.permute.xlu2 %1670 }
 0x1d6   : > { %v1672_v33 = vunpack.i.l.bf16 %v2445_v14  ;;  %v1673_v38 = vunpack.i.h.bf16 %v2445_v14 }
 0x1d8   : > { %v880_v45 = vsel %vm861_vm7, %v1672_v33, %v1613_v17  ;;  %v1573_v33 = vunpack.i.h.bf16 %v2325_v41 }
 0x1da   : > { %v866_v59 = vsel %vm861_vm7, %v1572_v12, %v1573_v33 }
 0x1dd   : > { %v2449_v32 = vpop.permute.xlu2 %1680 }
 0x1de   : > { %v1682_v48 = vunpack.i.l.bf16 %v2449_v32  ;;  %v1683_v14 = vunpack.i.h.bf16 %v2449_v32 }
 0x1e0   : > { %v878_v31 = vsel %vm861_vm7, %v1682_v48, %v1622_v15  ;;  %v869_v48 = vsel %vm861_vm7, %v1647_v6, %v1648_v35 }
 0x1e5   : > { %v2457_v61 = vpop.permute.xlu2 %1690 }
 0x1ed   : > { %v2467_v63 = vpop.permute.xlu2 %1700 }
 0x1ee   : > { %v1702_v50 = vunpack.i.l.bf16 %v2467_v63 }
 0x1f0   : > { %v874_v5 = vsel %vm861_vm7, %v1702_v50, %v1632_v29  ;;  %v2525_v29 = vld [vmem:[%s2614_s3 + $0x10] sm:$0xff] }
 0x1f5   : > { %v2453_v37 = vpop.permute.xlu0 %1655 }
 0x1f6   : > { %v1657_v20 = vunpack.i.l.bf16 %v2453_v37  ;;  %v1658_v18 = vunpack.i.h.bf16 %v2453_v37 }
 0x1f8   : > { %v884_v24 = vsel %vm861_vm7, %v1657_v20, %v1598_v60  ;;  %v1692_v60 = vunpack.i.l.bf16 %v2457_v61 }
 0x1f9   : > { %981 = vmatpush.msra.mxu0 %v884_v24 }
 0x1fb   : > { %982 = vmatpush.msra.mxu0 %v882_v56  ;;  %v1651_v16 = vpop.permute.xlu1 %1650 }
 0x1fc   : > { %v1653_v54 = vunpack.i.h.bf16 %v1651_v16  ;;  %v1652_v57 = vunpack.i.l.bf16 %v1651_v16 }
 0x1fd   : > { %v2463_v62 = vpop.permute.xlu0 %1665  ;;  %983 = vmatpush.msra.mxu0 %v880_v45  ;;  %v2505_v45 = vpop.permute.xlu2 %1715 }
 0x1fe   : > { %v915_v44 = vsel %vm861_vm7, %v1652_v57, %v1653_v54  ;;  %v1668_v27 = vunpack.i.h.bf16 %v2463_v62  ;;  %v1667_v28 = vunpack.i.l.bf16 %v2463_v62  ;;  %v865_v54 = vsel %vm861_vm7, %v1567_v40, %v1568_v0 }
 0x1ff   : > { %984 = vmatpush.msra.mxu0 %v878_v31  ;;  %1051 = vmatpush.msra.mxu3 %v915_v44  ;;  %v1693_v31 = vunpack.i.h.bf16 %v2457_v61  ;;  %v1703_v61 = vunpack.i.h.bf16 %v2467_v63  ;;  %v1717_v50 = vunpack.i.l.bf16 %v2505_v45 }
 0x200   : > { %v911_v1 = vsel %vm861_vm7, %v1667_v28, %v1668_v27 }
 0x203   : > { %v1661_v19 = vpop.permute.xlu1 %1660 }
 0x204   : > { %v1663_v51 = vunpack.i.h.bf16 %v1661_v19  ;;  %v1662_v21 = vunpack.i.l.bf16 %v1661_v19 }
 0x205   : > { %v1676_v25 = vpop.permute.xlu0 %1675  ;;  %v1731_v19 = vpop.permute.xlu2 %1730 }
 0x206   : > { %v1678_v34 = vunpack.i.h.bf16 %v1676_v25  ;;  %v876_v58 = vsel %vm861_vm7, %v1692_v60, %v1663_v51  ;;  %v877_v2 = vsel %vm861_vm7, %v1663_v51, %v1627_v8  ;;  %v1677_v17 = vunpack.i.l.bf16 %v1676_v25 }
 0x207   : > { %985 = vmatpush.msra.mxu0 %v876_v58  ;;  %1031 = vmatpush.msra.mxu2 %v877_v2  ;;  %v913_v3 = vsel %vm861_vm7, %v1658_v18, %v1662_v21  ;;  %v1733_v58 = vunpack.i.h.bf16 %v1731_v19  ;;  %v1732_v2 = vunpack.i.l.bf16 %v1731_v19 }
 0x208   : > { %v914_v15 = vsel %vm861_vm7, %v1678_v34, %v1652_v57  ;;  %1052 = vmatpush.msra.mxu3 %v913_v3  ;;  %v909_v52 = vsel %vm861_vm7, %v1673_v38, %v1677_v17  ;;  %v2513_v57 = vld [vmem:[%s2614_s3] sm:$0xff] }
 0x209   : > { %1005 = vmatpush.msra.mxu1 %v914_v15  ;;  %986 = vmatpush.msra.mxu0 %v874_v5  ;;  %v868_v35 = vsel %vm861_vm7, %v1733_v58, %v1647_v6 }
 0x20a   : > { %1032 = vmatpush.msra.mxu2 %v875_v23  ;;  %1053 = vmatpush.msra.mxu3 %v911_v1 }
 0x20b   : > { %v1711_v39 = vpop.permute.xlu1 %1710 }
 0x20c   : > { %1033 = vmatpush.msra.mxu2 %v873_v22  ;;  %v1713_v53 = vunpack.i.h.bf16 %v1711_v39  ;;  %v1712_v55 = vunpack.i.l.bf16 %v1711_v39  ;;  %1054 = vmatpush.msra.mxu3 %v909_v52  ;;  %v904_v22 = vsel %vm861_vm7, %v1732_v2, %v1693_v31  ;;  %v1557_v39 = vunpack.i.l.bf16 %v2267_v11 }
 0x20d   : > { %v1686_v36 = vpop.permute.xlu0 %1685  ;;  %v1746_v15 = vpop.permute.xlu2 %1745 }
 0x20e   : > { %v1688_v37 = vunpack.i.h.bf16 %v1686_v36  ;;  %v1687_v20 = vunpack.i.l.bf16 %v1686_v36  ;;  %1034 = vmatpush.msra.mxu2 %v871_v9  ;;  %v872_v24 = vsel %vm861_vm7, %v1713_v53, %v1637_v30  ;;  %v867_v32 = vsel %vm861_vm7, %v1573_v33, %v1712_v55  ;;  %v686_v33 = vld [vmem:[%s2614_s3 + $0x18] sm:$0xff] }
 0x20f   : > { %987 = vmatpush.msra.mxu0 %v872_v24  ;;  %v1748_v1 = vunpack.i.h.bf16 %v1746_v15  ;;  %v1747_v36 = vunpack.i.l.bf16 %v1746_v15  ;;  %v862_v41 = vsel %vm861_vm7, %v1557_v39, %v1558_v49 }
 0x210   : > { %1035 = vmatpush.msra.mxu2 %v869_v48  ;;  %v912_v56 = vsel %vm861_vm7, %v1688_v37, %v1658_v18  ;;  %v907_v16 = vsel %vm861_vm7, %v1683_v14, %v1687_v20 }
 0x211   : > { %1006 = vmatpush.msra.mxu1 %v912_v56  ;;  %1055 = vmatpush.msra.mxu3 %v907_v16  ;;  %v900_v6 = vsel %vm861_vm7, %v1748_v1, %v1717_v50 }
 0x212   : > { %1036 = vmatpush.msra.mxu2 %v867_v32  ;;  %v1073_v32 = vld [vmem:[%s379_s25] sm:$0x3] }
 0x213   : > { %v2520_v40 = vpop.permute.xlu1 %1725 }
 0x214   : > { %1037 = vmatpush.msra.mxu2 %v865_v54  ;;  %v1728_v25 = vunpack.i.h.bf16 %v2520_v40  ;;  %v1727_v18 = vunpack.i.l.bf16 %v2520_v40 }
 0x215   : > { %v1696_v62 = vpop.permute.xlu0 %1695 }
 0x216   : > { %v1698_v44 = vunpack.i.h.bf16 %v1696_v62  ;;  %v1697_v8 = vunpack.i.l.bf16 %v1696_v62  ;;  %1038 = vmatpush.msra.mxu2 %v2357_v46  ;;  %v1718_v46 = vunpack.i.h.bf16 %v2505_v45  ;;  %v899_v34 = vsel %vm861_vm7, %v1727_v18, %v1728_v25 }
 0x217   : > { %1039 = vmatmul.f32.vlgmr.msra.gmra.mxu2 %v2513_v57  ;;  %v1076_v62 = vperm.slane %v1073_v32, 1 }
 0x218   : > { %v910_v47 = vsel %vm861_vm7, %v1698_v44, %v1667_v28  ;;  %v905_v10 = vsel %vm861_vm7, %v1693_v31, %v1697_v8  ;;  %v901_v63 = vsel %vm861_vm7, %v1717_v50, %v1718_v46 }
 0x219   : > { %1007 = vmatpush.msra.mxu1 %v910_v47  ;;  %1056 = vmatpush.msra.mxu3 %v905_v10 }
 0x21b   : > { %v1741_v43 = vpop.permute.xlu1 %1740 }
 0x21c   : > { %v1742_v5 = vunpack.i.l.bf16 %v1741_v43  ;;  %v1743_v53 = vunpack.i.h.bf16 %v1741_v43 }
 0x21d   : > { %v1706_v60 = vpop.permute.xlu0 %1705 }
 0x21e   : > { %v1708_v51 = vunpack.i.h.bf16 %v1706_v60  ;;  %v1707_v21 = vunpack.i.l.bf16 %v1706_v60  ;;  %v895_v37 = vsel %vm861_vm7, %v1743_v53, %v1747_v36 }
 0x21f   : > { %1042 = vmatmul.f32.gmra.mxu2 %v2525_v29 }
 0x220   : > { %v908_v27 = vsel %vm861_vm7, %v1708_v51, %v1673_v38  ;;  %v903_v28 = vsel %vm861_vm7, %v1703_v61, %v1707_v21 }
 0x221   : > { %1008 = vmatpush.msra.mxu1 %v908_v27  ;;  %1057 = vmatpush.msra.mxu3 %v903_v28 }
 0x223   : > { %1058 = vmatpush.msra.mxu3 %v901_v63  ;;  %v796_v0 = vpop.permute.xlu1 %795 }
 0x224   : > { %v894_v48 = vsel %vm861_vm7, %v796_v0, %v1743_v53 }
 0x225   : > { %v1721_v30 = vpop.permute.xlu0 %1720  ;;  %1059 = vmatpush.msra.mxu3 %v899_v34 }
 0x226   : > { %v1723_v17 = vunpack.i.h.bf16 %v1721_v30  ;;  %v1722_v3 = vunpack.i.l.bf16 %v1721_v30 }
 0x228   : > { %v870_v23 = vsel %vm861_vm7, %v1723_v17, %v1642_v4  ;;  %v906_v38 = vsel %vm861_vm7, %v1722_v3, %v1683_v14  ;;  %v902_v4 = vsel %vm861_vm7, %v1742_v5, %v1703_v61  ;;  %v684_v14 = vld [vmem:[%s2614_s3 + $0x8] sm:$0xff] }
 0x229   : > { %988 = vmatpush.msra.mxu0 %v870_v23  ;;  %1009 = vmatpush.msra.mxu1 %v906_v38 }
 0x22b   : > { %989 = vmatpush.msra.mxu0 %v868_v35  ;;  %1010 = vmatpush.msra.mxu1 %v904_v22 }
 0x22d   : > { %v1736_v52 = vpop.permute.xlu0 %1735  ;;  %990 = vmatpush.msra.mxu0 %v866_v59  ;;  %1011 = vmatpush.msra.mxu1 %v902_v4 }
 0x22e   : > { %v1738_v55 = vunpack.i.h.bf16 %v1736_v52  ;;  %v1737_v7 = vunpack.i.l.bf16 %v1736_v52 }
 0x22f   : > { %991 = vmatpush.msra.mxu0 %v2362_v26  ;;  %1012 = vmatpush.msra.mxu1 %v900_v6 }
 0x230   : > { %v897_v9 = vsel %vm861_vm7, %v1737_v7, %v1738_v55 }
 0x231   : > { %992 = vmatpush.msra.mxu0 %v862_v41  ;;  %1060 = vmatpush.msra.mxu3 %v897_v9 }
 0x232   : > { %993 = vmatmul.f32.vlgmr.msra.gmra.mxu0 %v2513_v57 }
 0x233   : > { %1061 = vmatpush.msra.mxu3 %v895_v37 }
 0x234   : > { %1253 = vmatmul.msk.f32.vlgmr.msra.gmra.mxu3 %vm970_vm8, %v684_v14 }
 0x235   : > { %v1751_v11 = vpop.permute.xlu0 %1750 }
 0x236   : > { %v1753_v49 = vunpack.i.h.bf16 %v1751_v11  ;;  %v1752_v26 = vunpack.i.l.bf16 %v1751_v11 }
 0x238   : > { %v898_v20 = vsel %vm861_vm7, %v1752_v26, %v1727_v18  ;;  %v896_v24 = vsel %vm861_vm7, %v1753_v49, %v1737_v7 }
 0x239   : > { %1013 = vmatpush.msra.mxu1 %v898_v20 }
 0x23a   : > { %996 = vmatmul.f32.gmra.mxu0 %v2525_v29  ;;  %v1075_v29 = vperm.slane %v1073_v32, 0 }
 0x23b   : > { %1014 = vmatpush.msra.mxu1 %v896_v24 }
 0x23c   : > { %1254 = vmatmul.msk.f32.gmra.mxu3 %vm970_vm8, %v686_v33 }
 0x23d   : > { %1015 = vmatpush.msra.mxu1 %v894_v48 }
 0x23e   : > { %1251 = vmatmul.msk.f32.vlgmr.msra.gmra.mxu1 %vm970_vm8, %v684_v14 }
 0x246   : > { %1252 = vmatmul.msk.f32.gmra.mxu1 %vm970_vm8, %v686_v33 }
 0x29a   : > { %v1040_v56 = vpop.f32.mrf.mxu2 }
 0x29b   : > { %v1041_v45 = vadd.f32 %v1040_v56, %v2300_v42 }
 0x2a2   : > { %v1043_v8 = vpop.f32.mrf.mxu2 }
 0x2a3   : > { %v1044_v61 = vadd.f32 %v1043_v8, %v2321_v13 }
 0x2af   : > { %v994_v16 = vpop.f32.mrf.mxu0 }
 0x2b0   : > { %v995_v31 = vadd.f32 %v994_v16, %v2300_v42 }
 0x2b7   : > { %v1063_v54 = vpop.f32.mrf.mxu3  ;;  %v997_v60 = vpop.f32.mrf.mxu0 }
 0x2b8   : > { %v1064_v57 = vadd.f32 %v1063_v54, %v1041_v45  ;;  %v998_v21 = vadd.f32 %v997_v60, %v2321_v13 }
 0x2ba   : > { %v1070_v44 = vmax.f32 %v1064_v57, 0.0 }
 0x2bb   : > { %v1017_v47 = vpop.f32.mrf.mxu1 }
 0x2bc   : > { %v1080_v10 = vmul.f32 %v1076_v62, %v1070_v44  ;;  %v1018_v40 = vadd.f32 %v1017_v47, %v995_v31 }
 0x2be   : > { %1084 = vst [vmem:[%s341_s19 + $0x8] sm:$0xff] %v1080_v10  ;;  %v1069_v19 = vmax.f32 %v1018_v40, 0.0 }
 0x2bf   : > { %v1066_v46 = vpop.f32.mrf.mxu3 }
 0x2c0   : > { %v1079_v50 = vmul.f32 %v1075_v29, %v1069_v19  ;;  %v1067_v51 = vadd.f32 %v1066_v46, %v1044_v61 }
 0x2c2   : > { %1083 = vst [vmem:[%s341_s19] sm:$0xff] %v1079_v50  ;;  %v1072_v25 = vmax.f32 %v1067_v51, 0.0 }
 0x2c3   : > { %v1020_v42 = vpop.f32.mrf.mxu1 }
 0x2c4   : > { %v1082_v18 = vmul.f32 %v1076_v62, %v1072_v25  ;;  %v1021_v27 = vadd.f32 %v1020_v42, %v998_v21 }
 0x2c5   : > { %v1113_v43 = vld [vmem:[%s341_s19 + $0x8] sm:$0xff] (%p1914_p5) }
 0x2c6   : > { %1086 = vst [vmem:[%s341_s19 + $0x18] sm:$0xff] %v1082_v18  ;;  %v1071_v28 = vmax.f32 %v1021_v27, 0.0  ;;  %1093 = sbr.rel (!%p1914_p5) target bundleno = 723 (0x2d3), region = 48 }
 0x2c7   : > { %1114 = vst [vmem:[%s1098_s11 + $0x8] sm:$0xff] (%p1914_p5), %v1113_v43 }
 0x2c8   : > { %v1081_v63 = vmul.f32 %v1075_v29, %v1071_v28 }
 0x2c9   : > { %v1111_v34 = vld [vmem:[%s341_s19] sm:$0xff] (%p1914_p5) }
 0x2ca   : > { %1085 = vst [vmem:[%s341_s19 + $0x10] sm:$0xff] %v1081_v63 }
 0x2cb   : > { %1112 = vst [vmem:[%s1098_s11] sm:$0xff] %v1111_v34 }
 0x2cd   : > { %v1117_v30 = vld [vmem:[%s341_s19 + $0x18] sm:$0xff] }
 0x2ce   : > { %1118 = vst [vmem:[%s1098_s11 + $0x48] sm:$0xff] %v1117_v30 }
 0x2d1   : > { %v1115_v13 = vld [vmem:[%s341_s19 + $0x10] sm:$0xff] }
 0x2d2   : > { %1116 = vst [vmem:[%s1098_s11 + $0x40] sm:$0xff] %v1115_v13 }
 0x2d3 PF: > { %s16_s27 = sadd.s32 1, %s1808_s27   ;;  %s2655_s23 = sld [smem:[#allocation3_spill]] }
 0x2d4   : > { %p13_p0 = scmp.ge.s32.totalorder %s16_s27, 10   ;;  %s2656_s24 = sld [smem:[#allocation4_spill]] }
 0x2d5   : > { %s2657_s25 = sld [smem:[#allocation5_spill]]  ;;  %s2659_s21 = smov %s1788_s22 }
 0x2d6   : > { %s2658_s26 = sld [smem:[#allocation6_spill]]  ;;  %s2660_s22 = smov %s1925_s12 }
 0x2d7   :  { %15 = sbr.rel (!%p13_p0) target bundleno = 4 (0x4), region = 106 }

// kernel: feature2segmentation_pallas.3
= control target key start
LH: loop header
LB: loop body
LE: loop exit
PB: predicated region body
PF: predicated region fallthrough
CT: control target
= control target key end

     0   :  { %s4787_s0 = inlined_call_operand.vmem [shape: f32[2,16,1024], index: 0, kind: input, shape index: {}, may-alias: {0,1,2}]   ;;  %s4788_s1 = inlined_call_operand.vmem [shape: f32[2,16,1024], index: 1, kind: input, shape index: {}, may-alias: {0,1,2}]   ;;  %s4789_s2 = inlined_call_operand.vmem [shape: f32[2,16,1024], index: 2, kind: input, shape index: {}, may-alias: {0,1,2}]   ;;  %s4790_s3 = inlined_call_operand.vmem [shape: f32[3,432], index: 3, kind: input, shape index: {}]   ;;  %s4791_s4 = inlined_call_operand.vmem [shape: f32[3,1], index: 4, kind: input, shape index: {}]   ;;  %s4792_s5 = inlined_call_operand.vmem [shape: f32[2,3,512], index: 5, kind: output, shape index: {}]  }
   0x1   :  { %4866 = sst [smem:[#allocation27_spill]] %s4790_s3 }
   0x2   :  { %4867 = sst [smem:[#allocation28_spill]] %s4792_s5 }
   0x3   :  { %s3038_s18 = smov 0   ;;  %s3040_s19 = smov 0  }
   0x4   :  { %s3042_s20 = smov 0   ;;  %s3044_s21 = smov 0  }
   0x5   :  { %s3046_s22 = smov 0   ;;  %s3048_s23 = smov 0  }
   0x6   :  { %s3050_s24 = smov 0   ;;  %s3052_s25 = smov 0  }
   0x7   :  { %s3054_s26 = smov 0   ;;  %s3056_s27 = smov 0  }
   0x8   :  { %s3058_s28 = smov 0  }
   0x9 LB: > { %4868 = sst [smem:[#allocation5_spill]] %s2965_s24  ;;  %s24_s29 = sadd.s32 1, %s2973_s26  ;;  %s2981_s28 = sphi %s3058_s28, %s15_s28   ;;  %s2977_s27 = sphi %s3056_s27, %s5011_s27   ;;  %s2973_s26 = sphi %s3054_s26, %s5010_s26   ;;  %s2969_s25 = sphi %s3052_s25, %s5009_s25   ;;  %s2965_s24 = sphi %s3050_s24, %s5008_s24   ;;  %s2961_s23 = sphi %s3048_s23, %s5007_s23   ;;  %s2957_s22 = sphi %s3046_s22, %s5006_s22   ;;  %s2953_s21 = sphi %s3044_s21, %s5005_s21   ;;  %s2949_s20 = sphi %s3042_s20, %s5004_s20   ;;  %s2945_s19 = sphi %s3040_s19, %s5003_s19   ;;  %s2941_s18 = sphi %s3038_s18, %s5002_s18  }
   0xa   : > { %4869 = sst [smem:[#allocation6_spill]] %s2969_s25  ;;  %s27_s30 = sadd.s32 1, %s2977_s27 }
   0xb   : > { %p25_p0 = scmp.ge.s32.totalorder %s24_s29, 2  ;;  %s36_s6 = sadd.s32 1, %s2961_s23 }
   0xc   : > { %p43_p1 = scmp.ne.s32.totalorder %s2961_s23, %s2957_s22  ;;  %p44_p2 = scmp.eq.s32.totalorder %s2981_s28, 0 }
   0xd   : > { %s3099_s7 = scalar_select %p25_p0, 0, %s24_s29  }
   0xe   : > { %s5013_s30 = smov (!%p25_p0, %s27_s30), %s2977_s27  ;;  %p3106_p3 = por %p44_p2, %p43_p1 }
   0xf   : > { %s32_s8 = ssub.s32 %s2973_s26, %s3099_s7  ;;  %p29_p4 = scmp.ge.s32.totalorder %s5013_s30, 2 }
  0x10   : > { %s60_s10 = sadd.s32 1, %s3099_s7  ;;  %s66_s12 = sadd.s32 1, %s2953_s21 }
  0x11   : > { %s62_s11 = ssub.s32 %s24_s29, %s60_s10  ;;  %s5015_s30 = smov (%p29_p4, %s5013_s30), 0 }
  0x12   : > { %4871 = sst [smem:[#allocation7_spill]] %s5015_s30  ;;  %p73_p5 = scmp.ne.s32.totalorder %s2953_s21, %s2949_s20 }
  0x13   : > { %s89_s13 = sadd.s32 2, %s2973_s26  ;;  %s31_s14 = ssub.s32 %s2977_s27, %s5015_s30 }
  0x14   : > { %s90_s15 = sadd.s32 2, %s3099_s7  ;;  %s33_s16 = sor.u32 %s32_s8, %s31_s14 }
  0x15   : > { %s63_s17 = sor.u32 %s62_s11, %s31_s14  ;;  %p34_p6 = scmp.eq.s32.totalorder %s33_s16, 0 }
  0x16   : > { %p64_p7 = scmp.eq.s32.totalorder %s63_s17, 0  ;;  %p3122_p8 = por %p73_p5, %p44_p2 }
  0x17   : > { %s92_s10 = ssub.s32 %s89_s13, %s90_s15  ;;  %s96_s3 = sadd.s32 1, %s2945_s19 }
  0x18   : > { %s3127_s5 = scalar_select %p34_p6, %s2961_s23, %s36_s6  }
  0x19   : > { %s3130_s25 = scalar_select %p64_p7, %s2953_s21, %s66_s12  }
  0x1a   : > { %s93_s24 = sor.u32 %s92_s10, %s31_s14  ;;  %p103_p10 = scmp.ne.s32.totalorder %s2945_s19, %s2941_s18 }
  0x1b   : > { %p94_p9 = scmp.eq.s32.totalorder %s93_s24, 0  ;;  %p1838_p12 = scmp.ge.s32.totalorder %s2981_s28, 4 }
  0x1c   : > { %p3140_p11 = por %p103_p10, %p44_p2 }
  0x1d   : > { %s3136_s30 = scalar_select %p94_p9, %s2945_s19, %s96_s3  }
  0x1e   : > { %205 = sbr.rel (%p1838_p12) target bundleno = 68 (0x44), region = 24 }
  0x23   : > { %208 = sbr.rel (!%p3106_p3) target bundleno = 46 (0x2e), region = 28  ;;  %s210_s6 = sand.u32 (%p3106_p3), 1, %s2961_s23  }
  0x24   : > { %s1840_s11 = sshll.u32 (%p3106_p3), %s2973_s26, 1  ;;  %s1839_s24 = sshll.u32 (%p3106_p3), %s210_s6, 5 }
  0x25   : > { %s1841_s12 = sshll.u32 (%p3106_p3), %s2977_s27, 4  ;;  %s212_s17 = scalar_lea.vmem (%p3106_p3), [#allocation2], %s1839_s24 }
  0x26   : > { %s215_s3 = sadd.s32 (%p3106_p3), %s1841_s12, %s1840_s11 }
  0x27   : > { %s1842_s13 = sshll.u32 (%p3106_p3), %s215_s3, 3 }
  0x28   : > { %s217_s16 = scalar_lea.vmem %s4787_s0, %s1842_s13 }
  0x29   : > { %v230_v0 = vld [vmem:[%s217_s16] sm:$0xff]  ;;  %v232_v1 = vld [vmem:[%s217_s16 + $0x8] sm:$0xff] }
  0x2a   : > { %v234_v2 = vld [vmem:[%s217_s16 + $0x40] sm:$0xff]  ;;  %231 = vst [vmem:[%s212_s17] sm:$0xff] %v230_v0  ;;  %v236_v3 = vld [vmem:[%s217_s16 + $0x48] sm:$0xff] }
  0x2b   : > { %233 = vst [vmem:[%s212_s17 + $0x8] sm:$0xff] %v232_v1 }
  0x2c   : > { %235 = vst [vmem:[%s212_s17 + $0x10] sm:$0xff] %v234_v2 }
  0x2d   : > { %237 = vst [vmem:[%s212_s17 + $0x18] sm:$0xff] %v236_v3 }
  0x2e PF: > { %243 = sbr.rel (!%p3122_p8) target bundleno = 57 (0x39), region = 51  ;;  %s245_s9 = sand.u32 (%p3122_p8), 1, %s2953_s21  }
  0x2f   : > { %s1844_s10 = sshll.u32 (%p3122_p8), %s2973_s26, 1  ;;  %s1843_s6 = sshll.u32 (%p3122_p8), %s245_s9, 5 }
  0x30   : > { %s1845_s11 = sshll.u32 (%p3122_p8), %s2977_s27, 4  ;;  %s247_s15 = scalar_lea.vmem (%p3122_p8), [#allocation3], %s1843_s6 }
  0x31   : > { %s1739_s12 = sadd.s32 (%p3122_p8), %s1845_s11, %s1844_s10 }
  0x32   : > { %s1846_s3 = sshll.u32 (%p3122_p8), %s1739_s12, 3 }
  0x33   : > { %s1741_s14 = scalar_lea.vmem %s4788_s1, %s1846_s3 }
  0x34   : > { %v1847_v4 = vld [vmem:[%s1741_s14 + $0x10] sm:$0xff]  ;;  %v1848_v5 = vld [vmem:[%s1741_s14 + $0x18] sm:$0xff] }
  0x35   : > { %v1849_v6 = vld [vmem:[%s1741_s14 + $0x50] sm:$0xff]  ;;  %267 = vst [vmem:[%s247_s15] sm:$0xff] %v1847_v4  ;;  %v1850_v7 = vld [vmem:[%s1741_s14 + $0x58] sm:$0xff] }
  0x36   : > { %269 = vst [vmem:[%s247_s15 + $0x8] sm:$0xff] %v1848_v5 }
  0x37   : > { %271 = vst [vmem:[%s247_s15 + $0x10] sm:$0xff] %v1849_v6 }
  0x38   : > { %273 = vst [vmem:[%s247_s15 + $0x18] sm:$0xff] %v1850_v7 }
  0x39 PF: > { %279 = sbr.rel (!%p3140_p11) target bundleno = 68 (0x44), region = 74  ;;  %s281_s29 = sand.u32 (%p3140_p11), 1, %s2945_s19  }
  0x3a   : > { %s1852_s16 = sshll.u32 (%p3140_p11), %s2973_s26, 1  ;;  %s1851_s17 = sshll.u32 (%p3140_p11), %s281_s29, 5 }
  0x3b   : > { %s1853_s9 = sshll.u32 (%p3140_p11), %s2977_s27, 4  ;;  %s283_s13 = scalar_lea.vmem (%p3140_p11), [#allocation4], %s1851_s17 }
  0x3c   : > { %s1747_s10 = sadd.s32 (%p3140_p11), %s1853_s9, %s1852_s16 }
  0x3d   : > { %s1854_s11 = sshll.u32 (%p3140_p11), %s1747_s10, 3 }
  0x3e   : > { %s1749_s3 = scalar_lea.vmem %s4789_s2, %s1854_s11 }
  0x3f   : > { %v1855_v8 = vld [vmem:[%s1749_s3 + $0x20] sm:$0xff]  ;;  %v1856_v9 = vld [vmem:[%s1749_s3 + $0x28] sm:$0xff] }
  0x40   : > { %v1857_v10 = vld [vmem:[%s1749_s3 + $0x60] sm:$0xff]  ;;  %303 = vst [vmem:[%s283_s13] sm:$0xff] %v1855_v8  ;;  %v1858_v11 = vld [vmem:[%s1749_s3 + $0x68] sm:$0xff] }
  0x41   : > { %305 = vst [vmem:[%s283_s13 + $0x8] sm:$0xff] %v1856_v9 }
  0x42   : > { %307 = vst [vmem:[%s283_s13 + $0x10] sm:$0xff] %v1857_v10 }
  0x43   : > { %309 = vst [vmem:[%s283_s13 + $0x18] sm:$0xff] %v1858_v11 }
  0x44 PF: > { %p1859_p13 = scmp.ge.s32.totalorder %s2981_s28, 1  ;;  %p314_p0 = scmp.lt.s32.totalorder %s2981_s28, 5 }
  0x46   : > { %p315_p1 = pnand %p1859_p13, %p314_p0 }
  0x48   : > { %318 = sbr.rel (%p315_p1) target bundleno = 875 (0x36b), region = 97 }
  0x4d   : > { %s328_s8 = sand.u32 1, %s2949_s20   ;;  %s321_s14 = sand.u32 1, %s2957_s22   ;;  %vm415_vm0 = vcmask 1039360   ;;  %vm672_vm1 = vcmask 564224   ;;  %vm632_vm2 = vcmask 293888   ;;  %vm689_vm3 = vcmask 556032  }
  0x4e   : > { %s1861_s24 = sshll.u32 %s328_s8, 5  ;;  %s1860_s15 = sshll.u32 %s321_s14, 5  ;;  %vm706_vm4 = vcmask 547840   ;;  %vm649_vm5 = vcmask 228352   ;;  %vm723_vm6 = vcmask 482304   ;;  %vm740_vm7 = vcmask 474112  }
  0x4f   : > { %s330_s29 = scalar_lea.vmem [#allocation3], %s1861_s24  ;;  %s323_s16 = scalar_lea.vmem [#allocation2], %s1860_s15  ;;  %vm757_vm8 = vcmask 465920   ;;  %vm774_vm9 = vcmask 400384   ;;  %vm551_vm10 = vcmask 392192   ;;  %vm568_vm11 = vcmask 384000  }
  0x50   : > { %v3173_v12 = vld [vmem:[%s330_s29 + $0x10] sm:$0xff]  ;;  %v3175_v13 = vld [vmem:[%s330_s29 + $0x18] sm:$0xff]  ;;  %v392_v14 = vld [vmem:[%s330_s29 + $0x8] sm:$0xff]  ;;  %s2983_s20 = smov 127   ;;  %s2984_s22 = smov 126   ;;  %vm923_vm12 = vcmask 220160  }
  0x51   : > { %v3179_v15 = vpack.i.bf16 %v3175_v13, %v3173_v12  ;;  %v390_v16 = vld [vmem:[%s323_s16 + $0x18] sm:$0xff]  ;;  %v389_v17 = vld [vmem:[%s323_s16 + $0x8] sm:$0xff]  ;;  %v391_v18 = vld [vmem:[%s330_s29] sm:$0xff]  ;;  %s2985_s17 = smov 118   ;;  %s2986_s9 = smov 117   ;;  %vm432_vm13 = vcmask 1031168  }
  0x52   : > { %v3181_v19 = vpack.i.bf16 %v390_v16, %v392_v14  ;;  %v3183_v20 = vpack.i.bf16 %v391_v18, %v389_v17  ;;  %s2987_s10 = smov 116   ;;  %s2988_s11 = smov 108   ;;  %v3233_v22 = vpack.i.bf16 %v392_v14, %v391_v18  ;;  %vm449_vm14 = vcmask 965632  }
  0x53   : > { %1994 = vrot.lane.b32.xlu1 %v3179_v15, %s2983_s20  ;;  %s2989_s12 = smov 107   ;;  %s2990_s6 = smov 106   ;;  %vm466_vm15 = vcmask 957440  }
  0x54   : > { %2004 = vrot.lane.b32.xlu2 %v3181_v19, %s2984_s22  ;;  %1984 = vrot.lane.b32.xlu0 %v3183_v20, %s2983_s20  ;;  %s2991_s3 = smov 48   ;;  %s2992_s13 = smov 47  }
  0x55   : > { %s2993_s8 = smov 46   ;;  %s2994_s24 = smov 38  }
  0x56   : > { %s335_s14 = sand.u32 1, %s2941_s18   ;;  %s2995_s29 = smov 37  }
  0x57   : > { %s1862_s15 = sshll.u32 %s335_s14, 5  ;;  %s2996_s16 = smov 36  }
  0x58   : > { %s2997_s18 = smov 28  }
  0x5b   : > { %1999 = vrot.lane.b32.xlu1 %v3183_v20, %s2984_s22 }
  0x5c   : > { %2009 = vrot.lane.b32.xlu2 %v3179_v15, %s2984_s22  ;;  %1989 = vrot.lane.b32.xlu0 %v3181_v19, %s2983_s20  ;;  %s337_s22 = scalar_lea.vmem [#allocation4], %s1862_s15 }
  0x5d   : > { %v396_v23 = vld [vmem:[%s337_s22 + $0x10] sm:$0xff]  ;;  %v395_v24 = vld [vmem:[%s337_s22] sm:$0xff] }
  0x5e   : > { %v3241_v26 = vpack.i.bf16 %v396_v23, %v3175_v13  ;;  %v3244_v27 = vpack.i.bf16 %v3173_v12, %v395_v24  ;;  %v2203_v29 = vpack.i.bf16 %v396_v23, %v395_v24 }
  0x63   : > { %2019 = vrot.lane.b32.xlu1 %v3181_v19, %s2985_s17 }
  0x64   : > { %2024 = vrot.lane.b32.xlu2 %v3179_v15, %s2985_s17  ;;  %2014 = vrot.lane.b32.xlu0 %v3183_v20, %s2985_s17  ;;  %s2998_s17 = smov 69  }
  0x6b   : > { %2034 = vrot.lane.b32.xlu1 %v3181_v19, %s2986_s9 }
  0x6c   : > { %2039 = vrot.lane.b32.xlu2 %v3179_v15, %s2986_s9  ;;  %2029 = vrot.lane.b32.xlu0 %v3183_v20, %s2986_s9  ;;  %s3000_s9 = smov 67  }
  0x73   : > { %2049 = vrot.lane.b32.xlu1 %v3181_v19, %s2987_s10 }
  0x74   : > { %2054 = vrot.lane.b32.xlu2 %v3179_v15, %s2987_s10  ;;  %2044 = vrot.lane.b32.xlu0 %v3183_v20, %s2987_s10  ;;  %s3001_s10 = smov 59  }
  0x7b   : > { %2064 = vrot.lane.b32.xlu1 %v3181_v19, %s2988_s11 }
  0x7c   : > { %2069 = vrot.lane.b32.xlu2 %v3179_v15, %s2988_s11  ;;  %2059 = vrot.lane.b32.xlu0 %v3183_v20, %s2988_s11  ;;  %s3002_s11 = smov 58  }
  0x83   : > { %2079 = vrot.lane.b32.xlu1 %v3181_v19, %s2989_s12 }
  0x84   : > { %2084 = vrot.lane.b32.xlu2 %v3179_v15, %s2989_s12  ;;  %2074 = vrot.lane.b32.xlu0 %v3183_v20, %s2989_s12  ;;  %s3003_s12 = smov 57  }
  0x8b   : > { %2094 = vrot.lane.b32.xlu1 %v3181_v19, %s2990_s6 }
  0x8c   : > { %2099 = vrot.lane.b32.xlu2 %v3179_v15, %s2990_s6  ;;  %2089 = vrot.lane.b32.xlu0 %v3183_v20, %s2990_s6  ;;  %s3004_s6 = smov 49  }
  0x93   : > { %2109 = vrot.lane.b32.xlu1 %v3181_v19, %s2991_s3 }
  0x94   : > { %2114 = vrot.lane.b32.xlu2 %v3179_v15, %s2991_s3  ;;  %2104 = vrot.lane.b32.xlu0 %v3183_v20, %s2991_s3 }
  0x9b   : > { %2124 = vrot.lane.b32.xlu1 %v3181_v19, %s2992_s13 }
  0x9c   : > { %2129 = vrot.lane.b32.xlu2 %v3179_v15, %s2992_s13  ;;  %2119 = vrot.lane.b32.xlu0 %v3183_v20, %s2992_s13 }
  0xa3   : > { %2139 = vrot.lane.b32.xlu1 %v3181_v19, %s2993_s8 }
  0xa4   : > { %2144 = vrot.lane.b32.xlu2 %v3179_v15, %s2993_s8  ;;  %2134 = vrot.lane.b32.xlu0 %v3183_v20, %s2993_s8  ;;  %s3005_s8 = smov 27  }
  0xab   : > { %2154 = vrot.lane.b32.xlu1 %v3181_v19, %s2994_s24 }
  0xac   : > { %2159 = vrot.lane.b32.xlu2 %v3179_v15, %s2994_s24  ;;  %2149 = vrot.lane.b32.xlu0 %v3183_v20, %s2994_s24  ;;  %s3007_s24 = smov 91  }
  0xae   : > { %v3231_v21 = vpop.permute.xlu2 %2004 }
  0xb3   : > { %2169 = vrot.lane.b32.xlu1 %v3179_v15, %s2995_s29 }
  0xb4   : > { %2174 = vrot.lane.b32.xlu2 %v3233_v22, %s2996_s16  ;;  %2164 = vrot.lane.b32.xlu0 %v3233_v22, %s2995_s29  ;;  %s4951_s29 = sld [smem:[#allocation27_spill]] }
  0xb6   : > { %v3238_v25 = vpop.permute.xlu2 %2009 }
  0xbb   : > { %2184 = vrot.lane.b32.xlu1 %v3241_v26, %s2996_s16 }
  0xbc   : > { %2189 = vrot.lane.b32.xlu2 %v3233_v22, %s2997_s18  ;;  %2179 = vrot.lane.b32.xlu0 %v3244_v27, %s2996_s16 }
  0xbe   : > { %v3249_v28 = vpop.permute.xlu2 %2024 }
  0xc3   : > { %2199 = vrot.lane.b32.xlu1 %v3241_v26, %s2997_s18 }
  0xc4   : > { %2204 = vrot.lane.b32.xlu2 %v2203_v29, %s2983_s20  ;;  %2194 = vrot.lane.b32.xlu0 %v3244_v27, %s2997_s18  ;;  %s2999_s20 = smov 68   ;;  %s4994_s18 = sld [smem:[#allocation5_spill]] }
  0xc5   : > { %v3254_v30 = vpop.permute.xlu1 %1994 }
  0xc6   : > { %v3256_v31 = vpop.permute.xlu2 %2039  ;;  %v3258_v32 = vpop.permute.xlu0 %1984  ;;  %v3350_v63 = vunpack.i.h.bf16 %v3254_v30  ;;  %v4799_v0 = vunpack.i.l.bf16 %v3254_v30 }
  0xc7   : > { %v4796_v5 = vunpack.i.h.bf16 %v3258_v32 }
  0xc8   : > { %v3365_v8 = vsel %vm415_vm0, %v4799_v0, %v3350_v63 }
  0xcb   : > { %2214 = vrot.lane.b32.xlu1 %v3244_v27, %s2998_s17 }
  0xcc   : > { %2219 = vrot.lane.b32.xlu2 %v3241_v26, %s2998_s17  ;;  %2209 = vrot.lane.b32.xlu0 %v3233_v22, %s2998_s17  ;;  %s4995_s17 = sld [smem:[#allocation6_spill]] }
  0xcd   : > { %v3263_v33 = vpop.permute.xlu1 %1999 }
  0xce   : > { %v3265_v34 = vpop.permute.xlu2 %2054  ;;  %v3267_v35 = vpop.permute.xlu0 %1989 }
  0xcf   : > { %v3354_v1 = vunpack.i.l.bf16 %v3267_v35 }
  0xd1   : > { %v3374_v11 = vsel %vm415_vm0, %v4796_v5, %v3354_v1 }
  0xd2   : > { %p380_p2 = scmp.lt.s32.totalorder %s4995_s17, 1 }
  0xd3   : > { %2229 = vrot.lane.b32.xlu1 %v3244_v27, %s2999_s20 }
  0xd4   : > { %2234 = vrot.lane.b32.xlu2 %v3241_v26, %s2999_s20  ;;  %2224 = vrot.lane.b32.xlu0 %v3233_v22, %s2999_s20  ;;  %s1863_s20 = sshll.u32 %s4994_s18, 1  ;;  %s5017_s17 = smov (!%p380_p2, %s4995_s17), 1 }
  0xd5   : > { %v3272_v36 = vpop.permute.xlu1 %2019  ;;  %p382_p3 = scmp.lt.s32.totalorder %s1863_s20, 3 }
  0xd6   : > { %v3274_v37 = vpop.permute.xlu2 %2069  ;;  %v3276_v38 = vpop.permute.xlu0 %2014 }
  0xd7   : > { %s5019_s20 = smov (!%p382_p3, %s1863_s20), 3 }
  0xdb   : > { %2244 = vrot.lane.b32.xlu1 %v3244_v27, %s3000_s9 }
  0xdc   : > { %2249 = vrot.lane.b32.xlu2 %v3241_v26, %s3000_s9  ;;  %2239 = vrot.lane.b32.xlu0 %v3233_v22, %s3000_s9  ;;  %s1864_s9 = sshll.u32 %s5017_s17, 2 }
  0xdd   : > { %v3281_v39 = vpop.permute.xlu1 %2034 }
  0xde   : > { %v3283_v40 = vpop.permute.xlu2 %2084  ;;  %v3285_v41 = vpop.permute.xlu0 %2029 }
  0xe3   : > { %2259 = vrot.lane.b32.xlu1 %v3244_v27, %s3001_s10 }
  0xe4   : > { %2264 = vrot.lane.b32.xlu2 %v3241_v26, %s3001_s10  ;;  %2254 = vrot.lane.b32.xlu0 %v3233_v22, %s3001_s10  ;;  %s385_s10 = sadd.s32 %s1864_s9, %s5019_s20 }
  0xe5   : > { %v3290_v42 = vpop.permute.xlu1 %2049 }
  0xe6   : > { %v3292_v43 = vpop.permute.xlu2 %2099  ;;  %v3294_v44 = vpop.permute.xlu0 %2044 }
  0xeb   : > { %2274 = vrot.lane.b32.xlu1 %v3244_v27, %s3002_s11 }
  0xec   : > { %2279 = vrot.lane.b32.xlu2 %v3241_v26, %s3002_s11  ;;  %2269 = vrot.lane.b32.xlu0 %v3233_v22, %s3002_s11  ;;  %s1865_s11 = sshll.u32 %s385_s10, 2 }
  0xed   : > { %v3299_v45 = vpop.permute.xlu1 %2064 }
  0xee   : > { %v3301_v46 = vpop.permute.xlu2 %2114  ;;  %v3303_v47 = vpop.permute.xlu0 %2059 }
  0xf3   : > { %2289 = vrot.lane.b32.xlu1 %v3244_v27, %s3003_s12 }
  0xf4   : > { %2294 = vrot.lane.b32.xlu2 %v3241_v26, %s3003_s12  ;;  %2284 = vrot.lane.b32.xlu0 %v3233_v22, %s3003_s12 }
  0xf5   : > { %v3308_v48 = vpop.permute.xlu1 %2079 }
  0xf6   : > { %v3310_v49 = vpop.permute.xlu2 %2129  ;;  %v3312_v50 = vpop.permute.xlu0 %2074 }
  0xfb   : > { %2304 = vrot.lane.b32.xlu1 %v3244_v27, %s3004_s6 }
  0xfc   : > { %2309 = vrot.lane.b32.xlu2 %v3241_v26, %s3004_s6  ;;  %2299 = vrot.lane.b32.xlu0 %v3233_v22, %s3004_s6 }
  0xfd   : > { %v3317_v51 = vpop.permute.xlu1 %2094 }
  0xfe   : > { %v3319_v52 = vpop.permute.xlu2 %2144  ;;  %v3321_v53 = vpop.permute.xlu0 %2089 }
 0x103   : > { %2319 = vrot.lane.b32.xlu1 %v2203_v29, %s2992_s13 }
 0x104   : > { %2314 = vrot.lane.b32.xlu0 %v2203_v29, %s2991_s3  ;;  %2324 = vrot.lane.b32.xlu2 %v3233_v22, %s3005_s8 }
 0x105   : > { %v3327_v54 = vpop.permute.xlu1 %2109 }
 0x106   : > { %v3329_v55 = vpop.permute.xlu2 %2159  ;;  %v3331_v56 = vpop.permute.xlu0 %2104 }
 0x107   : > { %4874 = vst [vmem:[#allocation8_spill] sm:$0xff] %v3329_v55 }
 0x10b   : > { %2334 = vrot.lane.b32.xlu1 %v3241_v26, %s3005_s8 }
 0x10c   : > { %2329 = vrot.lane.b32.xlu0 %v3244_v27, %s3005_s8 }
 0x10d   : > { %v3337_v57 = vpop.permute.xlu1 %2124 }
 0x10e   : > { %v3339_v58 = vpop.permute.xlu2 %2174  ;;  %v3341_v59 = vpop.permute.xlu0 %2119 }
 0x10f   : > { %4875 = vst [vmem:[#allocation9_spill] sm:$0xff] %v3339_v58 }
 0x115   : > { %v3343_v60 = vpop.permute.xlu1 %2139 }
 0x116   : > { %4876 = vst [vmem:[#allocation10_spill] sm:$0xff] %v3343_v60  ;;  %v3345_v61 = vpop.permute.xlu2 %2189  ;;  %v3347_v62 = vpop.permute.xlu0 %2134 }
 0x117   : > { %4877 = vst [vmem:[#allocation11_spill] sm:$0xff] %v3345_v61 }
 0x118   : > { %4878 = vst [vmem:[#allocation12_spill] sm:$0xff] %v3347_v62 }
 0x11d   : > { %v3356_v2 = vpop.permute.xlu1 %2154 }
 0x11e   : > { %4879 = vst [vmem:[#allocation13_spill] sm:$0xff] %v3356_v2  ;;  %v2205_v3 = vpop.permute.xlu2 %2204  ;;  %v3358_v4 = vpop.permute.xlu0 %2149 }
 0x11f   : > { %4880 = vst [vmem:[#allocation14_spill] sm:$0xff] %v3358_v4  ;;  %v2207_v6 = vunpack.i.h.bf16 %v2205_v3  ;;  %v2206_v7 = vunpack.i.l.bf16 %v2205_v3 }
 0x121   : > { %v659_v9 = vsel %vm415_vm0, %v3350_v63, %v2207_v6  ;;  %v2343_v10 = vpack.i.bf16 %v3365_v8, %v2206_v7  ;;  %v658_v12 = vsel %vm415_vm0, %v3354_v1, %v2206_v7  ;;  %v4800_v7 = vunpack.i.h.bf16 %v3339_v58 }
 0x122   : > { %v2348_v13 = vpack.i.bf16 %v2207_v6, %v659_v9  ;;  %v2338_v14 = vpack.i.bf16 %v658_v12, %v3374_v11 }
 0x123   : > { %2344 = vrot.lane.b32.xlu0 %v2343_v10, %s3005_s8 }
 0x124   : > { %2349 = vrot.lane.b32.xlu1 %v2348_v13, %s3005_s8  ;;  %2339 = vrot.lane.b32.xlu2 %v2338_v14, %s3005_s8 }
 0x125   : > { %v3382_v16 = vpop.permute.xlu1 %2169 }
 0x126   : > { %4881 = vst [vmem:[#allocation15_spill] sm:$0xff] %v3382_v16  ;;  %v2220_v17 = vpop.permute.xlu2 %2219  ;;  %v4797_v18 = vunpack.i.l.bf16 %v3382_v16  ;;  %v3385_v22 = vpop.permute.xlu0 %2164 }
 0x127   : > { %4882 = vst [vmem:[#allocation16_spill] sm:$0xff] %v3385_v22  ;;  %v2222_v23 = vunpack.i.h.bf16 %v2220_v17  ;;  %v2221_v24 = vunpack.i.l.bf16 %v2220_v17  ;;  %v4798_v26 = vunpack.i.h.bf16 %v3385_v22 }
 0x129   : > { %v676_v27 = vsel %vm672_vm1, %v2221_v24, %v2222_v23  ;;  %v3393_v29 = vpack.i.bf16 %v4797_v18, %v4798_v26 }
 0x12a   : > { %v2363_v3 = vpack.i.bf16 %v2222_v23, %v676_v27 }
 0x12b   : > { %4883 = vst [vmem:[#allocation17_spill] sm:$0xff] %v3393_v29 }
 0x12c   : > { %2364 = vrot.lane.b32.xlu1 %v2363_v3, %s3005_s8 }
 0x12d   : > { %v2185_v6 = vpop.permute.xlu1 %2184 }
 0x12e   : > { %v3397_v9 = vpop.permute.xlu2 %2234  ;;  %v2187_v10 = vunpack.i.h.bf16 %v2185_v6  ;;  %v2186_v12 = vunpack.i.l.bf16 %v2185_v6  ;;  %v2180_v13 = vpop.permute.xlu0 %2179 }
 0x12f   : > { %v2237_v14 = vunpack.i.h.bf16 %v3397_v9  ;;  %v2236_v17 = vunpack.i.l.bf16 %v3397_v9  ;;  %v2182_v5 = vunpack.i.h.bf16 %v2180_v13  ;;  %v2181_v18 = vunpack.i.l.bf16 %v2180_v13 }
 0x130   : > { %v3402_v23 = vsel %vm632_vm2, %v2186_v12, %v2187_v10  ;;  %v4813_v10 = vunpack.i.h.bf16 %v3345_v61 }
 0x131   : > { %4884 = vst [vmem:[#allocation18_spill] sm:$0xff] %v3402_v23  ;;  %v693_v27 = vsel %vm689_vm3, %v2236_v17, %v2237_v14  ;;  %v634_v3 = vsel %vm632_vm2, %v4800_v7, %v2181_v18  ;;  %v3409_v26 = vsel %vm632_vm2, %v2182_v5, %v2186_v12 }
 0x132   : > { %4885 = vst [vmem:[#allocation19_spill] sm:$0xff] %v3409_v26  ;;  %v2378_v6 = vpack.i.bf16 %v2237_v14, %v693_v27  ;;  %v3411_v0 = vpack.i.bf16 %v2182_v5, %v634_v3 }
 0x134   : > { %4886 = vst [vmem:[#allocation20_spill] sm:$0xff] %v3411_v0  ;;  %2379 = vrot.lane.b32.xlu1 %v2378_v6, %s3005_s8 }
 0x135   : > { %v3416_v13 = vpop.permute.xlu1 %2199 }
 0x136   : > { %v3419_v29 = vpop.permute.xlu2 %2249  ;;  %v4809_v18 = vunpack.i.l.bf16 %v3416_v13  ;;  %v2195_v7 = vpop.permute.xlu0 %2194 }
 0x137   : > { %v2252_v12 = vunpack.i.h.bf16 %v3419_v29  ;;  %v2251_v5 = vunpack.i.l.bf16 %v3419_v29  ;;  %v2197_v14 = vunpack.i.h.bf16 %v2195_v7  ;;  %v2196_v27 = vunpack.i.l.bf16 %v2195_v7 }
 0x139   : > { %v710_v3 = vsel %vm706_vm4, %v2251_v5, %v2252_v12  ;;  %v652_v6 = vsel %vm649_vm5, %v2197_v14, %v4809_v18  ;;  %v3431_v9 = vsel %vm649_vm5, %v4813_v10, %v2196_v27 }
 0x13a   : > { %v2393_v26 = vpack.i.bf16 %v2252_v12, %v710_v3  ;;  %v3433_v23 = vpack.i.bf16 %v652_v6, %v2197_v14 }
 0x13c   : > { %4887 = vst [vmem:[#allocation21_spill] sm:$0xff] %v3433_v23  ;;  %2394 = vrot.lane.b32.xlu1 %v2393_v26, %s3005_s8 }
 0x13d   : > { %v2215_v29 = vpop.permute.xlu1 %2214 }
 0x13e   : > { %v3436_v7 = vpop.permute.xlu2 %2264  ;;  %v2217_v0 = vunpack.i.h.bf16 %v2215_v29  ;;  %v2216_v16 = vunpack.i.l.bf16 %v2215_v29  ;;  %v2210_v58 = vpop.permute.xlu0 %2209 }
 0x13f   : > { %v2267_v22 = vunpack.i.h.bf16 %v3436_v7  ;;  %v4814_v18 = vunpack.i.l.bf16 %v3436_v7  ;;  %v2212_v61 = vunpack.i.h.bf16 %v2210_v58  ;;  %v2211_v55 = vunpack.i.l.bf16 %v2210_v58 }
 0x140   : > { %v675_v27 = vsel %vm672_vm1, %v2217_v0, %v2221_v24 }
 0x141   : > { %v727_v12 = vsel %vm723_vm6, %v4814_v18, %v2267_v22  ;;  %v2358_v26 = vpack.i.bf16 %v675_v27, %v2216_v16  ;;  %v673_v14 = vsel %vm672_vm1, %v2211_v55, %v2212_v61  ;;  %v674_v3 = vsel %vm672_vm1, %v2212_v61, %v2216_v16 }
 0x142   : > { %v2408_v6 = vpack.i.bf16 %v2267_v22, %v727_v12  ;;  %v2353_v29 = vpack.i.bf16 %v674_v3, %v673_v14  ;;  %vm500_vm1 = vcmask 883712  }
 0x143   : > { %2359 = vrot.lane.b32.xlu0 %v2358_v26, %s3005_s8 }
 0x144   : > { %2409 = vrot.lane.b32.xlu1 %v2408_v6, %s3005_s8  ;;  %2354 = vrot.lane.b32.xlu2 %v2353_v29, %s3005_s8 }
 0x145   : > { %v2230_v58 = vpop.permute.xlu1 %2229 }
 0x146   : > { %v3449_v0 = vpop.permute.xlu2 %2279  ;;  %v2232_v24 = vunpack.i.h.bf16 %v2230_v58  ;;  %v2231_v10 = vunpack.i.l.bf16 %v2230_v58  ;;  %v2225_v18 = vpop.permute.xlu0 %2224 }
 0x147   : > { %v2282_v27 = vunpack.i.h.bf16 %v3449_v0  ;;  %v2281_v55 = vunpack.i.l.bf16 %v3449_v0  ;;  %v2227_v61 = vunpack.i.h.bf16 %v2225_v18  ;;  %v2226_v16 = vunpack.i.l.bf16 %v2225_v18 }
 0x148   : > { %v692_v22 = vsel %vm689_vm3, %v2232_v24, %v2236_v17 }
 0x149   : > { %v744_v12 = vsel %vm740_vm7, %v2281_v55, %v2282_v27  ;;  %v2373_v26 = vpack.i.bf16 %v692_v22, %v2231_v10  ;;  %v690_v14 = vsel %vm689_vm3, %v2226_v16, %v2227_v61  ;;  %v691_v3 = vsel %vm689_vm3, %v2227_v61, %v2231_v10 }
 0x14a   : > { %v2423_v6 = vpack.i.bf16 %v2282_v27, %v744_v12  ;;  %v2368_v29 = vpack.i.bf16 %v691_v3, %v690_v14  ;;  %vm517_vm3 = vcmask 875520  }
 0x14b   : > { %2374 = vrot.lane.b32.xlu0 %v2373_v26, %s3005_s8 }
 0x14c   : > { %2424 = vrot.lane.b32.xlu1 %v2423_v6, %s3005_s8  ;;  %2369 = vrot.lane.b32.xlu2 %v2368_v29, %s3005_s8 }
 0x14d   : > { %v2245_v58 = vpop.permute.xlu1 %2244 }
 0x14e   : > { %v2295_v18 = vpop.permute.xlu2 %2294  ;;  %v2247_v0 = vunpack.i.h.bf16 %v2245_v58  ;;  %v2246_v17 = vunpack.i.l.bf16 %v2245_v58  ;;  %v2240_v24 = vpop.permute.xlu0 %2239 }
 0x14f   : > { %v2297_v23 = vunpack.i.h.bf16 %v2295_v18  ;;  %v2296_v22 = vunpack.i.l.bf16 %v2295_v18  ;;  %v2242_v4 = vunpack.i.h.bf16 %v2240_v24  ;;  %v2241_v16 = vunpack.i.l.bf16 %v2240_v24 }
 0x150   : > { %v709_v10 = vsel %vm706_vm4, %v2247_v0, %v2251_v5 }
 0x151   : > { %v761_v27 = vsel %vm757_vm8, %v2296_v22, %v2297_v23  ;;  %v2388_v61 = vpack.i.bf16 %v709_v10, %v2246_v17  ;;  %v707_v12 = vsel %vm706_vm4, %v2241_v16, %v2242_v4  ;;  %v708_v26 = vsel %vm706_vm4, %v2242_v4, %v2246_v17 }
 0x152   : > { %v2438_v14 = vpack.i.bf16 %v2297_v23, %v761_v27  ;;  %v2383_v3 = vpack.i.bf16 %v708_v26, %v707_v12  ;;  %v4888_v4 = vunpack.i.l.bf16 %v3436_v7  ;;  %vm534_vm4 = vcmask 867328  }
 0x153   : > { %2389 = vrot.lane.b32.xlu0 %v2388_v61, %s3005_s8 }
 0x154   : > { %2439 = vrot.lane.b32.xlu1 %v2438_v14, %s3005_s8  ;;  %2384 = vrot.lane.b32.xlu2 %v2383_v3, %s3005_s8 }
 0x155   : > { %v2260_v6 = vpop.permute.xlu1 %2259 }
 0x156   : > { %v2310_v29 = vpop.permute.xlu2 %2309  ;;  %v2262_v58 = vunpack.i.h.bf16 %v2260_v6  ;;  %v2261_v5 = vunpack.i.l.bf16 %v2260_v6  ;;  %v2255_v18 = vpop.permute.xlu0 %2254 }
 0x157   : > { %v2312_v0 = vunpack.i.h.bf16 %v2310_v29  ;;  %v2311_v24 = vunpack.i.l.bf16 %v2310_v29  ;;  %v2257_v10 = vunpack.i.h.bf16 %v2255_v18  ;;  %v2256_v16 = vunpack.i.l.bf16 %v2255_v18 }
 0x158   : > { %v726_v23 = vsel %vm723_vm6, %v2262_v58, %v4888_v4 }
 0x159   : > { %v778_v17 = vsel %vm774_vm9, %v2311_v24, %v2312_v0  ;;  %v2403_v27 = vpack.i.bf16 %v726_v23, %v2261_v5  ;;  %v724_v61 = vsel %vm723_vm6, %v2256_v16, %v2257_v10  ;;  %v725_v12 = vsel %vm723_vm6, %v2257_v10, %v2261_v5 }
 0x15a   : > { %v2453_v26 = vpack.i.bf16 %v2312_v0, %v778_v17  ;;  %v2398_v14 = vpack.i.bf16 %v725_v12, %v724_v61  ;;  %v3006_v17 = vmov 0   ;;  %vm585_vm6 = vcmask 375808  }
 0x15b   : > { %2404 = vrot.lane.b32.xlu0 %v2403_v27, %s3005_s8  ;;  %2488 = vset.pattern.permute.xlu2 %v3006_v17 }
 0x15c   : > { %2454 = vrot.lane.b32.xlu1 %v2453_v26, %s3005_s8  ;;  %2399 = vrot.lane.b32.xlu2 %v2398_v14, %s3005_s8 }
 0x15d   : > { %v2275_v3 = vpop.permute.xlu1 %2274  ;;  %2894 = vset.pattern.permute.xlu0 %v3006_v17 }
 0x15e   : > { %v2277_v6 = vunpack.i.h.bf16 %v2275_v3  ;;  %v2276_v7 = vunpack.i.l.bf16 %v2275_v3  ;;  %v2270_v29 = vpop.permute.xlu0 %2269 }
 0x15f   : > { %v2272_v58 = vunpack.i.h.bf16 %v2270_v29  ;;  %v2271_v18 = vunpack.i.l.bf16 %v2270_v29 }
 0x160   : > { %v743_v4 = vsel %vm740_vm7, %v2277_v6, %v2281_v55 }
 0x161   : > { %v2418_v23 = vpack.i.bf16 %v743_v4, %v2276_v7  ;;  %v741_v16 = vsel %vm740_vm7, %v2271_v18, %v2272_v58  ;;  %v742_v5 = vsel %vm740_vm7, %v2272_v58, %v2276_v7  ;;  %vm602_vm7 = vcmask 310272  }
 0x162   : > { %v2413_v0 = vpack.i.bf16 %v742_v5, %v741_v16 }
 0x163   : > { %2419 = vrot.lane.b32.xlu0 %v2418_v23, %s3005_s8 }
 0x164   : > { %2414 = vrot.lane.b32.xlu2 %v2413_v0, %s3005_s8 }
 0x165   : > { %v2290_v10 = vpop.permute.xlu1 %2289 }
 0x166   : > { %v2292_v27 = vunpack.i.h.bf16 %v2290_v10  ;;  %v2291_v61 = vunpack.i.l.bf16 %v2290_v10  ;;  %v2285_v12 = vpop.permute.xlu0 %2284 }
 0x167   : > { %v2287_v26 = vunpack.i.h.bf16 %v2285_v12  ;;  %v2286_v14 = vunpack.i.l.bf16 %v2285_v12  ;;  %v4816_v12 = vunpack.i.l.bf16 %v3301_v46 }
 0x168   : > { %v760_v55 = vsel %vm757_vm8, %v2292_v27, %v2296_v22 }
 0x169   : > { %v2433_v3 = vpack.i.bf16 %v760_v55, %v2291_v61  ;;  %v758_v6 = vsel %vm757_vm8, %v2286_v14, %v2287_v26  ;;  %v759_v7 = vsel %vm757_vm8, %v2287_v26, %v2291_v61  ;;  %v3491_v61 = vunpack.i.h.bf16 %v3301_v46 }
 0x16a   : > { %v2428_v29 = vpack.i.bf16 %v759_v7, %v758_v6  ;;  %v3496_v26 = vunpack.i.l.bf16 %v3327_v54  ;;  %vm615_vm8 = vcmask 302080  }
 0x16b   : > { %2434 = vrot.lane.b32.xlu0 %v2433_v3, %s3005_s8  ;;  %v3503_v7 = vsel %vm551_vm10, %v4816_v12, %v3491_v61 }
 0x16c   : > { %2429 = vrot.lane.b32.xlu2 %v2428_v29, %s3005_s8 }
 0x16d   : > { %v2305_v58 = vpop.permute.xlu1 %2304 }
 0x16e   : > { %v2307_v18 = vunpack.i.h.bf16 %v2305_v58  ;;  %v2306_v4 = vunpack.i.l.bf16 %v2305_v58  ;;  %v2300_v23 = vpop.permute.xlu0 %2299 }
 0x16f   : > { %v2302_v16 = vunpack.i.h.bf16 %v2300_v23  ;;  %v2301_v5 = vunpack.i.l.bf16 %v2300_v23 }
 0x170   : > { %v777_v0 = vsel %vm774_vm9, %v2307_v18, %v2311_v24  ;;  %v4817_v24 = vunpack.i.h.bf16 %v3331_v56 }
 0x171   : > { %v2448_v10 = vpack.i.bf16 %v777_v0, %v2306_v4  ;;  %v775_v22 = vsel %vm774_vm9, %v2301_v5, %v2302_v16  ;;  %v776_v17 = vsel %vm774_vm9, %v2302_v16, %v2306_v4  ;;  %vm1312_vm9 = vcmask 744448  }
 0x172   : > { %v2443_v27 = vpack.i.bf16 %v776_v17, %v775_v22  ;;  %v3512_v18 = vsel %vm551_vm10, %v4817_v24, %v3496_v26  ;;  %v4821_v22 = vunpack.i.l.bf16 %v3310_v49  ;;  %v3522_v17 = vpop.permute.xlu2 %2324 }
 0x173   : > { %2449 = vrot.lane.b32.xlu0 %v2448_v10, %s3005_s8  ;;  %v3519_v10 = vunpack.i.h.bf16 %v3310_v49  ;;  %v4892_v62 = vunpack.i.h.bf16 %v3522_v17 }
 0x174   : > { %2444 = vrot.lane.b32.xlu2 %v2443_v27, %s3005_s8  ;;  %v3527_v27 = vunpack.i.l.bf16 %v3337_v57 }
 0x175   : > { %v2320_v14 = vpop.permute.xlu1 %2319  ;;  %4889 = vst [vmem:[#allocation22_spill] sm:$0xff] %v3519_v10  ;;  %v3539_v24 = vsel %vm568_vm11, %v4821_v22, %v3519_v10 }
 0x176   : > { %v2315_v55 = vpop.permute.xlu0 %2314  ;;  %v2322_v5 = vunpack.i.h.bf16 %v2320_v14  ;;  %v2321_v0 = vunpack.i.l.bf16 %v2320_v14 }
 0x177   : > { %v2317_v3 = vunpack.i.h.bf16 %v2315_v55  ;;  %v2316_v6 = vunpack.i.l.bf16 %v2315_v55 }
 0x178   : > { %v2478_v55 = vpack.i.bf16 %v3539_v24, %v2321_v0 }
 0x179   : > { %v784_v29 = vsel %vm551_vm10, %v3491_v61, %v2317_v3  ;;  %v2463_v58 = vpack.i.bf16 %v3503_v7, %v2316_v6  ;;  %v783_v4 = vsel %vm551_vm10, %v3496_v26, %v2316_v6 }
 0x17a   : > { %v2468_v23 = vpack.i.bf16 %v2317_v3, %v784_v29  ;;  %v2458_v16 = vpack.i.bf16 %v783_v4, %v3512_v18  ;;  %v790_v4 = vsel %vm568_vm11, %v3519_v10, %v2322_v5 }
 0x17b   : > { %2464 = vrot.lane.b32.xlu0 %v2463_v58, %s3005_s8  ;;  %v2483_v22 = vpack.i.bf16 %v2322_v5, %v790_v4  ;;  %v4894_v5 = vunpack.i.l.bf16 %v3254_v30  ;;  %v2001_v4 = vunpack.i.l.bf16 %v3263_v33 }
 0x17c   : > { %2469 = vrot.lane.b32.xlu1 %v2468_v23, %s3005_s8  ;;  %2459 = vrot.lane.b32.xlu2 %v2458_v16, %s3005_s8  ;;  %v789_v23 = vsel %vm568_vm11, %v3527_v27, %v2321_v0 }
 0x17d   : > { %v2335_v3 = vpop.permute.xlu1 %2334 }
 0x17e   : > { %v2330_v6 = vpop.permute.xlu0 %2329  ;;  %v2337_v29 = vunpack.i.h.bf16 %v2335_v3  ;;  %v2336_v58 = vunpack.i.l.bf16 %v2335_v3  ;;  %v4891_v3 = vunpack.i.h.bf16 %v3341_v59  ;;  %v3586_v30 = vpop.permute.xlu2 %2339 }
 0x17f   : > { %v2332_v16 = vunpack.i.h.bf16 %v2330_v6  ;;  %v2331_v12 = vunpack.i.l.bf16 %v2330_v6 }
 0x180   : > { %v3542_v14 = vsel %vm923_vm12, %v2336_v58, %v2337_v29  ;;  %v3549_v2 = vsel %vm568_vm11, %v4891_v3, %v3527_v27 }
 0x181   : > { %4890 = vst [vmem:[#allocation23_spill] sm:$0xff] %v3542_v14  ;;  %v3554_v6 = vsel %vm923_vm12, %v4892_v62, %v2331_v12  ;;  %v926_v60 = vsel %vm923_vm12, %v2332_v16, %v2336_v58  ;;  %v2473_v10 = vpack.i.bf16 %v789_v23, %v3549_v2  ;;  %v970_v62 = vld [vmem:[%s4791_s4] sm:$0x7]  ;;  %v1992_v12 = vunpack.i.h.bf16 %v3267_v35 }
 0x182   : > { %4893 = vst [vmem:[#allocation24_spill] sm:$0xff] %v3554_v6  ;;  %v3558_v29 = vpack.i.bf16 %v926_v60, %v2332_v16  ;;  %v1986_v60 = vunpack.i.l.bf16 %v3258_v32  ;;  %v2011_v58 = vunpack.i.l.bf16 %v3238_v25  ;;  %v2006_v16 = vunpack.i.l.bf16 %v3231_v21 }
 0x183   : > { %2479 = vrot.lane.b32.xlu0 %v2478_v55, %s3005_s8  ;;  %v4895_v55 = vunpack.i.h.bf16 %v3258_v32  ;;  %v4898_v14 = vunpack.i.h.bf16 %v3331_v56 }
 0x184   : > { %2484 = vrot.lane.b32.xlu1 %v2483_v22, %s3005_s8  ;;  %2474 = vrot.lane.b32.xlu2 %v2473_v10, %s3005_s8  ;;  %v418_v10 = vsel %vm415_vm0, %v1992_v12, %v4894_v5  ;;  %v2007_v22 = vunpack.i.h.bf16 %v3231_v21  ;;  %v2012_v5 = vunpack.i.h.bf16 %v3238_v25  ;;  %v2016_v25 = vunpack.i.l.bf16 %v3276_v38  ;;  %s5000_s8 = sld [smem:[#allocation28_spill]] }
 0x185   : > { %v416_v35 = vsel %vm415_vm0, %v1986_v60, %v4895_v55  ;;  %v2514_v55 = vpack.i.bf16 %v3350_v63, %v3365_v8  ;;  %vm483_vm0 = vcmask 949248  }
 0x186   : > { %v2504_v23 = vpack.i.bf16 %v3374_v11, %v416_v35  ;;  %v435_v3 = vsel %vm432_vm13, %v2007_v22, %v2011_v58  ;;  %v2342_v11 = vunpack.i.h.bf16 %v3586_v30 }
 0x187   : > { %v2524_v22 = vpack.i.bf16 %v435_v3, %v2006_v16 }
 0x18a   : > { %s387_s3 = scalar_lea.vmem %s5000_s8, %s1865_s11 }
 0x18b   : > { %2490 = vrot.lane.b32.xlu0 %v3183_v20, %s3007_s24  ;;  %v2002_v20 = vunpack.i.h.bf16 %v3263_v33 }
 0x18c   : > { %2495 = vrot.lane.b32.xlu1 %v3181_v19, %s3007_s24  ;;  %973 = vperm.xlu2 %2488, %v970_v62   ;;  %v2509_v19 = vpack.i.bf16 %v418_v10, %v3354_v1 }
 0x18d   : > { %v433_v33 = vsel %vm432_vm13, %v2001_v4, %v2002_v20  ;;  %v434_v60 = vsel %vm432_vm13, %v2002_v20, %v2006_v16  ;;  %v2021_v20 = vunpack.i.l.bf16 %v3272_v36  ;;  %v2017_v4 = vunpack.i.h.bf16 %v3276_v38 }
 0x18e   : > { %v2519_v35 = vpack.i.bf16 %v434_v60, %v433_v33  ;;  %v436_v16 = vsel %vm432_vm13, %v2011_v58, %v2012_v5  ;;  %v2036_v60 = vunpack.i.l.bf16 %v3281_v39  ;;  %v2037_v58 = vunpack.i.h.bf16 %v3281_v39 }
 0x18f   : > { %v450_v38 = vsel %vm449_vm14, %v2016_v25, %v2017_v4  ;;  %v451_v3 = vsel %vm449_vm14, %v2017_v4, %v2021_v20 }
 0x193   : > { %2505 = vrot.lane.b32.xlu0 %v2504_v23, %s3007_s24 }
 0x194   : > { %2510 = vrot.lane.b32.xlu1 %v2509_v19, %s3007_s24  ;;  %2500 = vrot.lane.b32.xlu2 %v3179_v15, %s3007_s24  ;;  %v2026_v19 = vunpack.i.l.bf16 %v3249_v28 }
 0x195   : > { %v2345_v32 = vpop.permute.xlu0 %2344 }
 0x196   : > { %v2347_v1 = vunpack.i.h.bf16 %v2345_v32  ;;  %v2346_v62 = vunpack.i.l.bf16 %v2345_v32  ;;  %v3596_v12 = vpop.permute.xlu1 %2349  ;;  %v2022_v32 = vunpack.i.h.bf16 %v3272_v36  ;;  %v2027_v36 = vunpack.i.h.bf16 %v3249_v28 }
 0x197   : > { %v4827_v21 = vunpack.i.l.bf16 %v3596_v12 }
 0x198   : > { %v3604_v15 = vsel %vm923_vm12, %v2342_v11, %v2346_v62  ;;  %v452_v33 = vsel %vm449_vm14, %v2022_v32, %v2026_v19  ;;  %v2534_v62 = vpack.i.bf16 %v451_v3, %v450_v38  ;;  %v453_v4 = vsel %vm449_vm14, %v2026_v19, %v2027_v36 }
 0x199   : > { %4896 = vst [vmem:[#allocation25_spill] sm:$0xff] %v3604_v15  ;;  %v930_v10 = vsel %vm923_vm12, %v2347_v1, %v4827_v21  ;;  %v2544_v39 = vpack.i.bf16 %v2027_v36, %v453_v4  ;;  %v2047_v38 = vunpack.i.h.bf16 %v3294_v44  ;;  %v2046_v3 = vunpack.i.l.bf16 %v3294_v44 }
 0x19a   : > { %v3614_v23 = vpack.i.bf16 %v930_v10, %v2347_v1  ;;  %v2529_v1 = vpack.i.bf16 %v2012_v5, %v436_v16  ;;  %v2032_v10 = vunpack.i.h.bf16 %v3285_v41  ;;  %v2051_v16 = vunpack.i.l.bf16 %v3290_v42 }
 0x19b   : > { %2520 = vrot.lane.b32.xlu0 %v2519_v35, %s3007_s24  ;;  %v2041_v35 = vunpack.i.l.bf16 %v3256_v31  ;;  %v2052_v19 = vunpack.i.h.bf16 %v3290_v42  ;;  %v484_v44 = vsel %vm483_vm0, %v2046_v3, %v2047_v38  ;;  %v2061_v4 = vunpack.i.l.bf16 %v3303_v47 }
 0x19c   : > { %2525 = vrot.lane.b32.xlu1 %v2524_v22, %s3007_s24  ;;  %2515 = vrot.lane.b32.xlu2 %v2514_v55, %s3007_s24  ;;  %v2031_v22 = vunpack.i.l.bf16 %v3285_v41  ;;  %v2539_v55 = vpack.i.bf16 %v452_v33, %v2021_v20  ;;  %v468_v20 = vsel %vm466_vm15, %v2032_v10, %v2036_v60  ;;  %v2097_v21 = vunpack.i.h.bf16 %v3317_v51 }
 0x19d   : > { %v469_v25 = vsel %vm466_vm15, %v2037_v58, %v2041_v35  ;;  %v2062_v58 = vunpack.i.h.bf16 %v3303_v47 }
 0x19e   : > { %v3621_v63 = vpop.permute.xlu1 %2364  ;;  %v3623_v8 = vpop.permute.xlu2 %2354  ;;  %v467_v41 = vsel %vm466_vm15, %v2031_v22, %v2032_v10  ;;  %v2554_v33 = vpack.i.bf16 %v469_v25, %v2036_v60  ;;  %v485_v60 = vsel %vm483_vm0, %v2047_v38, %v2051_v16 }
 0x19f   : > { %v2549_v32 = vpack.i.bf16 %v468_v20, %v467_v41  ;;  %v2564_v41 = vpack.i.bf16 %v485_v60, %v484_v44  ;;  %v4823_v38 = vunpack.i.l.bf16 %v3621_v63  ;;  %v501_v47 = vsel %vm500_vm1, %v2061_v4, %v2062_v58 }
 0x1a0   : > { %v2077_v4 = vunpack.i.h.bf16 %v3312_v50 }
 0x1a3   : > { %2535 = vrot.lane.b32.xlu0 %v2534_v62, %s3007_s24  ;;  %v2056_v62 = vunpack.i.l.bf16 %v3265_v34 }
 0x1a4   : > { %2540 = vrot.lane.b32.xlu1 %v2539_v55, %s3007_s24  ;;  %2530 = vrot.lane.b32.xlu2 %v2529_v1, %s3007_s24  ;;  %v2042_v1 = vunpack.i.h.bf16 %v3256_v31  ;;  %v2057_v31 = vunpack.i.h.bf16 %v3265_v34  ;;  %v2066_v55 = vunpack.i.l.bf16 %v3299_v45 }
 0x1a5   : > { %v486_v22 = vsel %vm483_vm0, %v2052_v19, %v2056_v62 }
 0x1a6   : > { %v3638_v28 = vpop.permute.xlu1 %2379  ;;  %v3640_v5 = vpop.permute.xlu2 %2369  ;;  %v470_v42 = vsel %vm466_vm15, %v2041_v35, %v2042_v1  ;;  %v2569_v20 = vpack.i.bf16 %v486_v22, %v2051_v16  ;;  %v487_v34 = vsel %vm483_vm0, %v2056_v62, %v2057_v31  ;;  %v2202_v35 = vunpack.i.h.bf16 %v3416_v13 }
 0x1a7   : > { %v2559_v25 = vpack.i.bf16 %v2042_v1, %v470_v42  ;;  %v502_v16 = vsel %vm500_vm1, %v2062_v58, %v2066_v55  ;;  %v2574_v44 = vpack.i.bf16 %v2057_v31, %v487_v34  ;;  %v4897_v31 = vunpack.i.l.bf16 %v3416_v13 }
 0x1a8   : > { %v2076_v34 = vunpack.i.l.bf16 %v3312_v50  ;;  %v2072_v13 = vunpack.i.h.bf16 %v3274_v37  ;;  %v2086_v50 = vunpack.i.l.bf16 %v3283_v40 }
 0x1ab   : > { %2550 = vrot.lane.b32.xlu0 %v2549_v32, %s3007_s24  ;;  %v2067_v32 = vunpack.i.h.bf16 %v3299_v45 }
 0x1ac   : > { %2555 = vrot.lane.b32.xlu1 %v2554_v33, %s3007_s24  ;;  %2545 = vrot.lane.b32.xlu2 %v2544_v39, %s3007_s24  ;;  %v2071_v39 = vunpack.i.l.bf16 %v3274_v37  ;;  %v4825_v33 = vunpack.i.h.bf16 %v3623_v8 }
 0x1ae   : > { %v3655_v36 = vpop.permute.xlu1 %2394  ;;  %v3657_v10 = vpop.permute.xlu2 %2384  ;;  %v503_v42 = vsel %vm500_vm1, %v2067_v32, %v2071_v39 }
 0x1af   : > { %v2584_v0 = vpack.i.bf16 %v503_v42, %v2066_v55  ;;  %v4828_v55 = vunpack.i.h.bf16 %v3640_v5 }
 0x1b3   : > { %2565 = vrot.lane.b32.xlu0 %v2564_v41, %s3007_s24  ;;  %v2579_v41 = vpack.i.bf16 %v502_v16, %v501_v47  ;;  %v2081_v16 = vunpack.i.l.bf16 %v3308_v48 }
 0x1b4   : > { %2570 = vrot.lane.b32.xlu1 %v2569_v20, %s3007_s24  ;;  %2560 = vrot.lane.b32.xlu2 %v2559_v25, %s3007_s24  ;;  %v653_v25 = vsel %vm649_vm5, %v4897_v31, %v2202_v35  ;;  %v2082_v35 = vunpack.i.h.bf16 %v3308_v48 }
 0x1b5   : > { %v2360_v3 = vpop.permute.xlu0 %2359  ;;  %v519_v48 = vsel %vm517_vm3, %v2077_v4, %v2081_v16 }
 0x1b6   : > { %v3678_v45 = vpop.permute.xlu1 %2409  ;;  %v2362_v1 = vunpack.i.h.bf16 %v2360_v3  ;;  %v2361_v19 = vunpack.i.l.bf16 %v2360_v3  ;;  %v3680_v62 = vpop.permute.xlu2 %2399 }
 0x1b7   : > { %v4824_v60 = vunpack.i.h.bf16 %v3680_v62  ;;  %v2401_v22 = vunpack.i.l.bf16 %v3680_v62 }
 0x1b8   : > { %v934_v58 = vsel %vm923_vm12, %v2362_v1, %v4823_v38  ;;  %v3692_v20 = vsel %vm923_vm12, %v4825_v33, %v2361_v19  ;;  %v504_v19 = vsel %vm500_vm1, %v2071_v39, %v2072_v13  ;;  %v2087_v33 = vunpack.i.h.bf16 %v3283_v40 }
 0x1b9   : > { %v3698_v3 = vpack.i.bf16 %v934_v58, %v2362_v1  ;;  %v3703_v32 = vsel %vm923_vm12, %v2401_v22, %v4824_v60  ;;  %v3705_v47 = vpack.i.bf16 %v2401_v22, %v653_v25  ;;  %v4826_v1 = vunpack.i.l.bf16 %v3638_v28 }
 0x1ba   : > { %v518_v58 = vsel %vm517_vm3, %v2076_v34, %v2077_v4  ;;  %v2092_v34 = vunpack.i.h.bf16 %v3321_v53  ;;  %v2589_v39 = vpack.i.bf16 %v2072_v13, %v504_v19  ;;  %v2387_v40 = vunpack.i.h.bf16 %v3657_v10 }
 0x1bb   : > { %2580 = vrot.lane.b32.xlu0 %v2579_v41, %s3007_s24  ;;  %v520_v41 = vsel %vm517_vm3, %v2082_v35, %v2086_v50  ;;  %v2594_v4 = vpack.i.bf16 %v519_v48, %v518_v58  ;;  %v2096_v35 = vunpack.i.l.bf16 %v3317_v51 }
 0x1bc   : > { %2585 = vrot.lane.b32.xlu1 %v2584_v0, %s3007_s24  ;;  %2575 = vrot.lane.b32.xlu2 %v2574_v44, %s3007_s24  ;;  %v2599_v60 = vpack.i.bf16 %v520_v41, %v2081_v16  ;;  %v2102_v16 = vunpack.i.h.bf16 %v3292_v43 }
 0x1bd   : > { %v2375_v22 = vpop.permute.xlu0 %2374  ;;  %v536_v41 = vsel %vm534_vm4, %v2092_v34, %v2096_v35 }
 0x1be   : > { %v3719_v42 = vpop.permute.xlu1 %2424  ;;  %v2377_v37 = vunpack.i.h.bf16 %v2375_v22  ;;  %v2376_v31 = vunpack.i.l.bf16 %v2375_v22  ;;  %v3721_v25 = vpop.permute.xlu2 %2414  ;;  %v2091_v22 = vunpack.i.l.bf16 %v3321_v53  ;;  %v2396_v53 = vunpack.i.l.bf16 %v3655_v36 }
 0x1c0   : > { %v938_v0 = vsel %vm923_vm12, %v2377_v37, %v4826_v1  ;;  %v3732_v44 = vsel %vm923_vm12, %v4828_v55, %v2376_v31  ;;  %v2101_v1 = vunpack.i.l.bf16 %v3292_v43  ;;  %v2341_v31 = vunpack.i.l.bf16 %v3586_v30 }
 0x1c1   : > { %v3736_v38 = vpack.i.bf16 %v938_v0, %v2377_v37  ;;  %v535_v13 = vsel %vm534_vm4, %v2091_v22, %v2092_v34  ;;  %v2106_v0 = vunpack.i.l.bf16 %v3331_v56 }
 0x1c2   : > { %v3761_v43 = vsel %vm923_vm12, %v2341_v31, %v2342_v11  ;;  %v538_v11 = vsel %vm534_vm4, %v2101_v1, %v2102_v16 }
 0x1c3   : > { %2595 = vrot.lane.b32.xlu0 %v2594_v4, %s3007_s24  ;;  %v521_v4 = vsel %vm517_vm3, %v2086_v50, %v2087_v33  ;;  %v2112_v50 = vunpack.i.h.bf16 %v3327_v54  ;;  %v552_v6 = vsel %vm551_vm10, %v2106_v0, %v4898_v14  ;;  %v2397_v54 = vunpack.i.h.bf16 %v3655_v36 }
 0x1c4   : > { %2600 = vrot.lane.b32.xlu1 %v2599_v60, %s3007_s24  ;;  %2590 = vrot.lane.b32.xlu2 %v2589_v39, %s3007_s24  ;;  %v537_v60 = vsel %vm534_vm4, %v2097_v21, %v2101_v1  ;;  %v2609_v21 = vpack.i.bf16 %v536_v41, %v535_v13  ;;  %v2604_v30 = vpack.i.bf16 %v2087_v33, %v521_v4  ;;  %v2127_v1 = vunpack.i.h.bf16 %v3337_v57 }
 0x1c5   : > { %v2390_v19 = vpop.permute.xlu0 %2389  ;;  %v2614_v55 = vpack.i.bf16 %v537_v60, %v2096_v35  ;;  %v2619_v33 = vpack.i.bf16 %v2102_v16, %v538_v11  ;;  %v4899_v41 = vunpack.i.l.bf16 %v3301_v46  ;;  %v2121_v4 = vunpack.i.l.bf16 %v3341_v59 }
 0x1c6   : > { %v3750_v58 = vpop.permute.xlu1 %2439  ;;  %v2392_v51 = vunpack.i.h.bf16 %v2390_v19  ;;  %v2391_v37 = vunpack.i.l.bf16 %v2390_v19  ;;  %v3752_v48 = vpop.permute.xlu2 %2429  ;;  %v4902_v46 = vunpack.i.h.bf16 %v3623_v8  ;;  %v943_v11 = vsel %vm923_vm12, %v2396_v53, %v2397_v54 }
 0x1c7   : > { %v554_v0 = vsel %vm551_vm10, %v2112_v50, %v4899_v41  ;;  %v4904_v54 = vunpack.i.l.bf16 %v3310_v49  ;;  %v2146_v49 = vunpack.i.l.bf16 %v3319_v52 }
 0x1c8   : > { %v942_v22 = vsel %vm923_vm12, %v2392_v51, %v2396_v53  ;;  %v3767_v39 = vsel %vm923_vm12, %v2387_v40, %v2391_v37  ;;  %v2352_v37 = vunpack.i.h.bf16 %v3596_v12  ;;  %v2629_v41 = vpack.i.bf16 %v554_v0, %v3496_v26 }
 0x1c9   : > { %v3769_v19 = vpack.i.bf16 %v942_v22, %v2392_v51  ;;  %v2356_v51 = vunpack.i.l.bf16 %v3623_v8  ;;  %v4900_v22 = vunpack.i.l.bf16 %v3596_v12  ;;  %v4832_v53 = vunpack.i.l.bf16 %v3678_v45 }
 0x1ca   : > { %v4905_v26 = vunpack.i.h.bf16 %v3341_v59  ;;  %v4839_v12 = vunpack.i.l.bf16 %v3719_v42 }
 0x1cb   : > { %2610 = vrot.lane.b32.xlu0 %v2609_v21, %s3007_s24  ;;  %v3804_v21 = vsel %vm923_vm12, %v4900_v22, %v2352_v37  ;;  %v3809_v50 = vsel %vm923_vm12, %v2356_v51, %v4902_v46  ;;  %v2412_v22 = vunpack.i.h.bf16 %v3678_v45 }
 0x1cc   : > { %2615 = vrot.lane.b32.xlu1 %v2614_v55, %s3007_s24  ;;  %2605 = vrot.lane.b32.xlu2 %v2604_v30, %s3007_s24  ;;  %v2624_v55 = vpack.i.bf16 %v3512_v18, %v552_v6  ;;  %4901 = vst [vmem:[#allocation26_spill] sm:$0xff] %v3804_v21  ;;  %v4903_v18 = vunpack.i.h.bf16 %v3680_v62  ;;  %v569_v0 = vsel %vm568_vm11, %v2121_v4, %v4905_v26  ;;  %v4906_v4 = vunpack.i.h.bf16 %v3640_v5 }
 0x1cd   : > { %v3784_v35 = vpop.permute.xlu0 %2404 }
 0x1ce   : > { %v3787_v13 = vpop.permute.xlu1 %2454  ;;  %v2406_v56 = vunpack.i.l.bf16 %v3784_v35  ;;  %v3790_v14 = vpop.permute.xlu2 %2444 }
 0x1cf   : > { %v2457_v60 = vunpack.i.h.bf16 %v3787_v13  ;;  %v4836_v36 = vunpack.i.l.bf16 %v3787_v13  ;;  %v4835_v16 = vunpack.i.h.bf16 %v3790_v14  ;;  %v2446_v57 = vunpack.i.l.bf16 %v3790_v14 }
 0x1d0   : > { %v3814_v6 = vsel %vm923_vm12, %v4903_v18, %v2406_v56 }
 0x1d1   : > { %v3819_v30 = vsel %vm923_vm12, %v4836_v36, %v2457_v60  ;;  %v956_v8 = vsel %vm923_vm12, %v2446_v57, %v4835_v16  ;;  %v3829_v37 = vpack.i.bf16 %v2446_v57, %v943_v11  ;;  %v2371_v60 = vunpack.i.l.bf16 %v3640_v5  ;;  %v4911_v36 = vld [vmem:[#allocation14_spill] sm:$0xff] }
 0x1d2   : > { %v3831_v56 = vpack.i.bf16 %v2341_v31, %v956_v8  ;;  %v571_v57 = vsel %vm568_vm11, %v2127_v1, %v4904_v54  ;;  %v2634_v11 = vpack.i.bf16 %v3491_v61, %v3503_v7  ;;  %v947_v61 = vsel %vm923_vm12, %v4832_v53, %v2412_v22  ;;  %v4907_v54 = vld [vmem:[#allocation10_spill] sm:$0xff] }
 0x1d3   : > { %2625 = vrot.lane.b32.xlu0 %v2624_v55, %s3007_s24  ;;  %v4831_v55 = vunpack.i.h.bf16 %v3721_v25  ;;  %v2644_v59 = vpack.i.bf16 %v571_v57, %v3527_v27  ;;  %v3861_v8 = vsel %vm923_vm12, %v2371_v60, %v4906_v4  ;;  %v2639_v7 = vpack.i.bf16 %v3549_v2, %v569_v0  ;;  %v4908_v4 = vld [vmem:[#allocation12_spill] sm:$0xff] }
 0x1d4   : > { %2630 = vrot.lane.b32.xlu1 %v2629_v41, %s3007_s24  ;;  %2620 = vrot.lane.b32.xlu2 %v2619_v33, %s3007_s24  ;;  %v2142_v26 = vunpack.i.h.bf16 %v4907_v54  ;;  %v2137_v62 = vunpack.i.h.bf16 %v4908_v4  ;;  %v2136_v34 = vunpack.i.l.bf16 %v4908_v4  ;;  %v4834_v2 = vunpack.i.l.bf16 %v3657_v10 }
 0x1d5   : > { %v3843_v31 = vpop.permute.xlu0 %2419  ;;  %v2427_v0 = vunpack.i.h.bf16 %v3719_v42 }
 0x1d6   : > { %v2421_v46 = vunpack.i.l.bf16 %v3843_v31  ;;  %v3850_v18 = vpop.permute.xlu2 %2459 }
 0x1d7   : > { %v4833_v33 = vunpack.i.h.bf16 %v3850_v18  ;;  %v2461_v1 = vunpack.i.l.bf16 %v3850_v18 }
 0x1d8   : > { %v3866_v41 = vsel %vm923_vm12, %v4831_v55, %v2421_v46  ;;  %v2141_v46 = vunpack.i.l.bf16 %v4907_v54  ;;  %v4837_v54 = vunpack.i.h.bf16 %v3752_v48 }
 0x1d9   : > { %v960_v5 = vsel %vm923_vm12, %v2461_v1, %v4833_v33  ;;  %v3878_v57 = vpack.i.bf16 %v2461_v1, %v947_v61  ;;  %v588_v61 = vsel %vm585_vm6, %v2142_v26, %v2146_v49  ;;  %v3909_v26 = vsel %vm923_vm12, %v4834_v2, %v2387_v40  ;;  %v4910_v2 = vld [vmem:[#allocation13_spill] sm:$0xff] }
 0x1da   : > { %v3883_v22 = vpack.i.bf16 %v2356_v51, %v960_v5  ;;  %v587_v4 = vsel %vm585_vm6, %v2137_v62, %v2141_v46  ;;  %v2659_v53 = vpack.i.bf16 %v588_v61, %v2141_v46  ;;  %v2156_v16 = vunpack.i.l.bf16 %v4910_v2 }
 0x1db   : > { %2640 = vrot.lane.b32.xlu0 %v2639_v7, %s3007_s24  ;;  %v586_v7 = vsel %vm585_vm6, %v2136_v34, %v2137_v62  ;;  %v951_v62 = vsel %vm923_vm12, %v4839_v12, %v2427_v0  ;;  %v2147_v46 = vunpack.i.h.bf16 %v3319_v52  ;;  %v4912_v0 = vld [vmem:[#allocation8_spill] sm:$0xff] }
 0x1dc   : > { %2645 = vrot.lane.b32.xlu1 %v2644_v59, %s3007_s24  ;;  %2635 = vrot.lane.b32.xlu2 %v2634_v11, %s3007_s24  ;;  %v4909_v11 = vld [vmem:[#allocation22_spill] sm:$0xff]  ;;  %v2654_v40 = vpack.i.bf16 %v587_v4, %v586_v7  ;;  %v2161_v61 = vunpack.i.l.bf16 %v4912_v0 }
 0x1dd   : > { %v3891_v1 = vpop.permute.xlu0 %2434  ;;  %v2649_v55 = vpack.i.bf16 %v4909_v11, %v3539_v24  ;;  %v2157_v24 = vunpack.i.h.bf16 %v4910_v2  ;;  %v589_v2 = vsel %vm585_vm6, %v2146_v49, %v2147_v46 }
 0x1de   : > { %v2436_v51 = vunpack.i.l.bf16 %v3891_v1  ;;  %v3896_v5 = vpop.permute.xlu2 %2474 }
 0x1df   : > { %v4840_v27 = vunpack.i.h.bf16 %v3896_v5  ;;  %v2476_v59 = vunpack.i.l.bf16 %v3896_v5 }
 0x1e0   : > { %v3914_v34 = vsel %vm923_vm12, %v4837_v54, %v2436_v51  ;;  %v2152_v51 = vunpack.i.h.bf16 %v4911_v36  ;;  %v2151_v54 = vunpack.i.l.bf16 %v4911_v36 }
 0x1e1   : > { %v964_v11 = vsel %vm923_vm12, %v2476_v59, %v4840_v27  ;;  %v3924_v33 = vpack.i.bf16 %v2476_v59, %v951_v62 }
 0x1e2   : > { %v3929_v21 = vpack.i.bf16 %v2371_v60, %v964_v11  ;;  %v603_v36 = vsel %vm602_vm7, %v2151_v54, %v2152_v51  ;;  %v604_v52 = vsel %vm602_vm7, %v2152_v51, %v2156_v16  ;;  %v605_v60 = vsel %vm602_vm7, %v2157_v24, %v2161_v61 }
 0x1e3   : > { %2655 = vrot.lane.b32.xlu0 %v2654_v40, %s3007_s24  ;;  %v4914_v11 = vunpack.i.l.bf16 %v3787_v13  ;;  %v2669_v51 = vpack.i.bf16 %v604_v52, %v603_v36  ;;  %v2162_v24 = vunpack.i.h.bf16 %v4912_v0  ;;  %v2674_v49 = vpack.i.bf16 %v605_v60, %v2156_v16 }
 0x1e4   : > { %2660 = vrot.lane.b32.xlu1 %v2659_v53, %s3007_s24  ;;  %2650 = vrot.lane.b32.xlu2 %v2649_v55, %s3007_s24  ;;  %v4915_v53 = vunpack.i.h.bf16 %v3790_v14  ;;  %v2664_v13 = vpack.i.bf16 %v2147_v46, %v589_v2  ;;  %v2367_v14 = vunpack.i.h.bf16 %v3621_v63 }
 0x1e5   : > { %v2450_v7 = vpop.permute.xlu0 %2449  ;;  %v606_v46 = vsel %vm602_vm7, %v2161_v61, %v2162_v24 }
 0x1e6   : > { %v2452_v4 = vunpack.i.h.bf16 %v2450_v7  ;;  %v2451_v59 = vunpack.i.l.bf16 %v2450_v7  ;;  %v3937_v62 = vpop.permute.xlu2 %973  ;;  %v4917_v7 = vld [vmem:[#allocation16_spill] sm:$0xff] }
 0x1e7   : > { %4913 = vst [vmem:[#allocation10_spill] sm:$0xff] %v3937_v62  ;;  %v2166_v12 = vunpack.i.l.bf16 %v4917_v7 }
 0x1e8   : > { %v958_v40 = vsel %vm923_vm12, %v2452_v4, %v4914_v11  ;;  %v3949_v55 = vsel %vm923_vm12, %v4915_v53, %v2451_v59 }
 0x1e9   : > { %4916 = vst [vmem:[#allocation12_spill] sm:$0xff] %v3949_v55  ;;  %v3952_v27 = vpack.i.bf16 %v958_v40, %v2452_v4  ;;  %v4918_v4 = vunpack.i.h.bf16 %v4917_v7  ;;  %v4919_v40 = vld [vmem:[#allocation9_spill] sm:$0xff]  ;;  %v2422_v55 = vunpack.i.h.bf16 %v3843_v31 }
 0x1ea   : > { %v2176_v36 = vunpack.i.l.bf16 %v4919_v40 }
 0x1eb   : > { %2670 = vrot.lane.b32.xlu0 %v2669_v51, %s3007_s24  ;;  %v616_v59 = vsel %vm615_vm8, %v2166_v12, %v4918_v4  ;;  %v4921_v4 = vunpack.i.h.bf16 %v3850_v18 }
 0x1ec   : > { %2675 = vrot.lane.b32.xlu1 %v2674_v49, %s3007_s24  ;;  %2665 = vrot.lane.b32.xlu2 %v2664_v13, %s3007_s24  ;;  %v2684_v49 = vpack.i.bf16 %v616_v59, %v2166_v12  ;;  %v4920_v13 = vunpack.i.l.bf16 %v3621_v63  ;;  %v4923_v63 = vld [vmem:[#allocation15_spill] sm:$0xff] }
 0x1ed   : > { %v2465_v11 = vpop.permute.xlu0 %2464 }
 0x1ee   : > { %v2470_v52 = vpop.permute.xlu1 %2469  ;;  %v2467_v0 = vunpack.i.h.bf16 %v2465_v11  ;;  %v2466_v53 = vunpack.i.l.bf16 %v2465_v11  ;;  %v2501_v16 = vpop.permute.xlu2 %2500  ;;  %v3969_v7 = vsel %vm923_vm12, %v4920_v13, %v2367_v14  ;;  %v2172_v14 = vunpack.i.h.bf16 %v4923_v63 }
 0x1ef   : > { %v2472_v60 = vunpack.i.h.bf16 %v2470_v52  ;;  %v2471_v2 = vunpack.i.l.bf16 %v2470_v52  ;;  %v2503_v51 = vunpack.i.h.bf16 %v2501_v16  ;;  %v2502_v54 = vunpack.i.l.bf16 %v2501_v16  ;;  %v4924_v16 = vld [vmem:[#allocation17_spill] sm:$0xff] }
 0x1f0   : > { %v3974_v62 = vsel %vm923_vm12, %v4921_v4, %v2466_v53  ;;  %v2679_v53 = vpack.i.bf16 %v2162_v24, %v606_v46  ;;  %v4926_v4 = vunpack.i.l.bf16 %v4923_v63  ;;  %v4927_v52 = vunpack.i.h.bf16 %v3896_v5 }
 0x1f1   : > { %v3977_v11 = vsel %vm923_vm12, %v2471_v2, %v2472_v60  ;;  %v962_v61 = vsel %vm923_vm12, %v2467_v0, %v2471_v2  ;;  %v3983_v12 = vsel %vm1312_vm9, %v2502_v54, %v2503_v51  ;;  %v4925_v60 = vunpack.i.h.bf16 %v4919_v40 }
 0x1f2   : > { %4922 = vst [vmem:[#allocation22_spill] sm:$0xff] %v3983_v12  ;;  %v3988_v59 = vpack.i.bf16 %v962_v61, %v2467_v0  ;;  %v2382_v51 = vunpack.i.h.bf16 %v3638_v28  ;;  %v617_v0 = vsel %vm615_vm8, %v4926_v4, %v2172_v14  ;;  %v4928_v63 = vunpack.i.l.bf16 %v3638_v28 }
 0x1f3   : > { %2685 = vrot.lane.b32.xlu0 %v2684_v49, %s3007_s24  ;;  %v633_v2 = vsel %vm632_vm2, %v2176_v36, %v4925_v60  ;;  %v2694_v5 = vpack.i.bf16 %v2172_v14, %v617_v0  ;;  %v4931_v14 = vunpack.i.h.bf16 %v3752_v48  ;;  %vm1694_vm2 = vcmask 1043456  }
 0x1f4   : > { %2690 = vrot.lane.b32.xlu1 %v4924_v16, %s3007_s24  ;;  %2680 = vrot.lane.b32.xlu2 %v2679_v53, %s3007_s24  ;;  %v2699_v60 = vpack.i.bf16 %v633_v2, %v2176_v36  ;;  %v4016_v4 = vsel %vm923_vm12, %v4928_v63, %v2382_v51  ;;  %v2437_v2 = vunpack.i.h.bf16 %v3891_v1  ;;  %v4844_v51 = vunpack.i.l.bf16 %v3750_v58 }
 0x1f5   : > { %v3998_v13 = vpop.permute.xlu0 %2479 }
 0x1f6   : > { %v4003_v24 = vpop.permute.xlu1 %2484  ;;  %v2481_v46 = vunpack.i.l.bf16 %v3998_v13  ;;  %v2516_v49 = vpop.permute.xlu2 %2515  ;;  %v954_v1 = vsel %vm923_vm12, %v2437_v2, %v4844_v51  ;;  %v4934_v51 = vld [vmem:[#allocation11_spill] sm:$0xff] }
 0x1f7   : > { %v2487_v61 = vunpack.i.h.bf16 %v4003_v24  ;;  %v4843_v53 = vunpack.i.l.bf16 %v4003_v24  ;;  %v2518_v40 = vunpack.i.h.bf16 %v2516_v49  ;;  %v2517_v16 = vunpack.i.l.bf16 %v2516_v49 }
 0x1f8   : > { %v4011_v18 = vsel %vm923_vm12, %v4927_v52, %v2481_v46  ;;  %v2431_v52 = vunpack.i.l.bf16 %v3752_v48  ;;  %v4930_v46 = vld [vmem:[#allocation20_spill] sm:$0xff]  ;;  %v2714_v28 = vpack.i.bf16 %v954_v1, %v2437_v2  ;;  %v4936_v2 = vld [vmem:[#allocation19_spill] sm:$0xff] }
 0x1f9   : > { %v4021_v12 = vsel %vm923_vm12, %v4843_v53, %v2487_v61  ;;  %v4026_v36 = vsel %vm1312_vm9, %v2517_v16, %v2518_v40 }
 0x1fa   : > { %4929 = vst [vmem:[#allocation13_spill] sm:$0xff] %v4026_v36  ;;  %v952_v0 = vsel %vm923_vm12, %v2431_v52, %v4931_v14 }
 0x1fb   : > { %2700 = vrot.lane.b32.xlu0 %v2699_v60, %s3007_s24  ;;  %v2719_v36 = vpack.i.bf16 %v952_v0, %v2431_v52 }
 0x1fc   : > { %2705 = vrot.lane.b32.xlu1 %v4930_v46, %s3007_s24  ;;  %2695 = vrot.lane.b32.xlu2 %v2694_v5, %s3007_s24 }
 0x1fd   : > { %v4037_v49 = vpop.permute.xlu0 %2490 }
 0x1fe   : > { %v2496_v61 = vpop.permute.xlu1 %2495  ;;  %v4846_v40 = vunpack.i.h.bf16 %v4037_v49  ;;  %v4046_v60 = vpop.permute.xlu2 %2530 }
 0x1ff   : > { %v2498_v63 = vunpack.i.h.bf16 %v2496_v61  ;;  %v2497_v15 = vunpack.i.l.bf16 %v2496_v61  ;;  %v2533_v46 = vunpack.i.h.bf16 %v4046_v60  ;;  %v4847_v5 = vunpack.i.l.bf16 %v4046_v60 }
 0x200   : > { %v2191_v61 = vunpack.i.l.bf16 %v4934_v51 }
 0x201   : > { %v4051_v48 = vsel %vm1312_vm9, %v2498_v63, %v2502_v54  ;;  %v4056_v14 = vsel %vm1312_vm9, %v4847_v5, %v2533_v46  ;;  %v4061_v53 = vsel %vm1312_vm9, %v4846_v40, %v2497_v15  ;;  %v4935_v54 = vld [vmem:[#allocation18_spill] sm:$0xff]  ;;  %v4938_v46 = vunpack.i.h.bf16 %v4934_v51 }
 0x202   : > { %4932 = vst [vmem:[#allocation14_spill] sm:$0xff] %v4056_v14  ;;  %v4937_v1 = vpack.i.bf16 %v4935_v54, %v4936_v2  ;;  %v4939_v40 = vunpack.i.l.bf16 %v3719_v42 }
 0x203   : > { %4933 = vst [vmem:[#allocation8_spill] sm:$0xff] %v4061_v53  ;;  %2715 = vrot.lane.b32.xlu0 %v2714_v28, %s3007_s24  ;;  %v650_v15 = vsel %vm649_vm5, %v2191_v61, %v4938_v46  ;;  %v2416_v53 = vunpack.i.l.bf16 %v3721_v25 }
 0x204   : > { %2710 = vrot.lane.b32.xlu2 %v4937_v1, %s3007_s24  ;;  %2720 = vrot.lane.b32.xlu1 %v2719_v36, %s3007_s24  ;;  %v950_v52 = vsel %vm923_vm12, %v2422_v55, %v4939_v40  ;;  %v2734_v46 = vpack.i.bf16 %v650_v15, %v2191_v61  ;;  %v4943_v15 = vunpack.i.h.bf16 %v3721_v25 }
 0x205   : > { %v4071_v63 = vpop.permute.xlu0 %2505  ;;  %v2729_v1 = vpack.i.bf16 %v950_v52, %v2422_v55  ;;  %v4941_v55 = vld [vmem:[#allocation21_spill] sm:$0xff] }
 0x206   : > { %v2511_v31 = vpop.permute.xlu1 %2510  ;;  %v4079_v0 = vpop.permute.xlu2 %2545  ;;  %v4848_v28 = vunpack.i.h.bf16 %v4071_v63 }
 0x207   : > { %v2513_v5 = vunpack.i.h.bf16 %v2511_v31  ;;  %v2512_v54 = vunpack.i.l.bf16 %v2511_v31  ;;  %v2548_v2 = vunpack.i.h.bf16 %v4079_v0  ;;  %v4849_v36 = vunpack.i.l.bf16 %v4079_v0 }
 0x208   : > { %v2407_v31 = vunpack.i.h.bf16 %v3784_v35 }
 0x209   : > { %v4085_v51 = vsel %vm1312_vm9, %v2513_v5, %v2517_v16  ;;  %v4090_v42 = vsel %vm1312_vm9, %v4849_v36, %v2548_v2  ;;  %v4095_v40 = vsel %vm1312_vm9, %v4848_v28, %v2512_v54  ;;  %v4942_v5 = vunpack.i.l.bf16 %v3678_v45 }
 0x20a   : > { %4940 = vst [vmem:[#allocation16_spill] sm:$0xff] %v4095_v40  ;;  %v948_v2 = vsel %vm923_vm12, %v2416_v53, %v4943_v15  ;;  %v2442_v15 = vunpack.i.h.bf16 %v3750_v58 }
 0x20b   : > { %2730 = vrot.lane.b32.xlu0 %v2729_v1, %s3007_s24  ;;  %v946_v52 = vsel %vm923_vm12, %v2407_v31, %v4942_v5  ;;  %v2739_v25 = vpack.i.bf16 %v948_v2, %v2416_v53 }
 0x20c   : > { %2725 = vrot.lane.b32.xlu2 %v4941_v55, %s3007_s24  ;;  %2735 = vrot.lane.b32.xlu1 %v2734_v46, %s3007_s24  ;;  %v2744_v28 = vpack.i.bf16 %v946_v52, %v2407_v31 }
 0x20d   : > { %v4103_v16 = vpop.permute.xlu0 %2520 }
 0x20e   : > { %v4108_v54 = vpop.permute.xlu1 %2525  ;;  %v4110_v61 = vpop.permute.xlu2 %2560  ;;  %v4850_v35 = vunpack.i.h.bf16 %v4103_v16 }
 0x20f   : > { %v2527_v1 = vunpack.i.l.bf16 %v4108_v54  ;;  %v2563_v46 = vunpack.i.h.bf16 %v4110_v61  ;;  %v4851_v55 = vunpack.i.l.bf16 %v4110_v61 }
 0x211   : > { %v4122_v45 = vsel %vm1312_vm9, %v4851_v55, %v2563_v46  ;;  %v4127_v5 = vsel %vm1312_vm9, %v4850_v35, %v2527_v1  ;;  %v4945_v1 = vunpack.i.l.bf16 %v3750_v58  ;;  %v4946_v58 = vunpack.i.l.bf16 %v3657_v10 }
 0x212   : > { %4944 = vst [vmem:[#allocation9_spill] sm:$0xff] %v4127_v5 }
 0x213   : > { %2745 = vrot.lane.b32.xlu0 %v2744_v28, %s3007_s24  ;;  %v955_v53 = vsel %vm923_vm12, %v4945_v1, %v2442_v15  ;;  %v2482_v15 = vunpack.i.h.bf16 %v3998_v13  ;;  %v4947_v1 = vpack.i.bf16 %v3431_v9, %v3703_v32 }
 0x214   : > { %2740 = vrot.lane.b32.xlu2 %v2739_v25, %s3007_s24  ;;  %2750 = vrot.lane.b32.xlu1 %v3705_v47, %s3007_s24  ;;  %v2764_v55 = vpack.i.bf16 %v4946_v58, %v955_v53 }
 0x215   : > { %v4134_v31 = vpop.permute.xlu0 %2535 }
 0x216   : > { %v4136_v52 = vpop.permute.xlu1 %2540  ;;  %v4138_v46 = vpop.permute.xlu2 %2575  ;;  %v4852_v36 = vunpack.i.h.bf16 %v4134_v31 }
 0x217   : > { %v2542_v2 = vunpack.i.l.bf16 %v4136_v52  ;;  %v2578_v28 = vunpack.i.h.bf16 %v4138_v46  ;;  %v4853_v25 = vunpack.i.l.bf16 %v4138_v46 }
 0x219   : > { %v4150_v47 = vsel %vm1312_vm9, %v4853_v25, %v2578_v28  ;;  %v4155_v35 = vsel %vm1312_vm9, %v4852_v36, %v2542_v2  ;;  %v4948_v2 = vunpack.i.l.bf16 %v4003_v24  ;;  %v4949_v24 = vpack.i.bf16 %v3914_v34, %v3909_v26 }
 0x21b   : > { %2760 = vrot.lane.b32.xlu0 %v3769_v19, %s3007_s24  ;;  %v966_v36 = vsel %vm923_vm12, %v2482_v15, %v4948_v2 }
 0x21c   : > { %2755 = vrot.lane.b32.xlu2 %v4947_v1, %s3007_s24  ;;  %2765 = vrot.lane.b32.xlu1 %v2764_v55, %s3007_s24  ;;  %v2774_v40 = vpack.i.bf16 %v966_v36, %v2482_v15 }
 0x21d   : > { %v4167_v28 = vpop.permute.xlu0 %2550 }
 0x21e   : > { %v4172_v10 = vpop.permute.xlu1 %2555  ;;  %v2591_v53 = vpop.permute.xlu2 %2590  ;;  %v4854_v13 = vunpack.i.h.bf16 %v4167_v28 }
 0x21f   : > { %v2557_v19 = vunpack.i.l.bf16 %v4172_v10  ;;  %v2593_v58 = vunpack.i.h.bf16 %v2591_v53  ;;  %v2592_v25 = vunpack.i.l.bf16 %v2591_v53 }
 0x221   : > { %v4177_v9 = vsel %vm1312_vm9, %v2592_v25, %v2593_v58  ;;  %v4182_v32 = vsel %vm1312_vm9, %v4854_v13, %v2557_v19 }
 0x223   : > { %2775 = vrot.lane.b32.xlu0 %v2774_v40, %s3007_s24 }
 0x224   : > { %2770 = vrot.lane.b32.xlu2 %v4949_v24, %s3007_s24  ;;  %2780 = vrot.lane.b32.xlu1 %v3736_v38, %s3007_s24  ;;  %v4950_v38 = vpack.i.bf16 %v3866_v41, %v3861_v8 }
 0x225   : > { %v4191_v55 = vpop.permute.xlu0 %2565 }
 0x226   : > { %v2571_v36 = vpop.permute.xlu1 %2570  ;;  %v2606_v15 = vpop.permute.xlu2 %2605  ;;  %v2568_v1 = vunpack.i.h.bf16 %v4191_v55 }
 0x227   : > { %v2572_v2 = vunpack.i.l.bf16 %v2571_v36  ;;  %v2608_v53 = vunpack.i.h.bf16 %v2606_v15  ;;  %v2607_v19 = vunpack.i.l.bf16 %v2606_v15 }
 0x229   : > { %v4195_v58 = vsel %vm1312_vm9, %v2607_v19, %v2608_v53  ;;  %v4198_v40 = vsel %vm1312_vm9, %v2568_v1, %v2572_v2  ;;  %v968_v2 = vld [vmem:[%s4951_s29] sm:$0x77] }
 0x22a   : > { %978 = vst [vmem:[#allocation1] ss:$2 sm:$0xff] %v968_v2 }
 0x22b   : > { %2790 = vrot.lane.b32.xlu0 %v3929_v21, %s3007_s24 }
 0x22c   : > { %2785 = vrot.lane.b32.xlu2 %v3924_v33, %s3007_s24  ;;  %2795 = vrot.lane.b32.xlu1 %v4950_v38, %s3007_s24 }
 0x22d   : > { %v2581_v26 = vpop.permute.xlu0 %2580 }
 0x22e   : > { %v2586_v34 = vpop.permute.xlu1 %2585  ;;  %v4208_v24 = vpop.permute.xlu2 %2620  ;;  %v2583_v15 = vunpack.i.h.bf16 %v2581_v26 }
 0x22f   : > { %v2587_v53 = vunpack.i.l.bf16 %v2586_v34 }
 0x231   : > { %v4214_v21 = vsel %vm1312_vm9, %v2583_v15, %v2587_v53 }
 0x233   : > { %2805 = vrot.lane.b32.xlu0 %v3698_v3, %s3007_s24  ;;  %v2588_v3 = vunpack.i.h.bf16 %v2586_v34 }
 0x234   : > { %2800 = vrot.lane.b32.xlu2 %v3988_v59, %s3007_s24  ;;  %2810 = vrot.lane.b32.xlu1 %v3878_v57, %s3007_s24  ;;  %v4952_v59 = vpack.i.bf16 %v3814_v6, %v3809_v50  ;;  %v2582_v57 = vunpack.i.l.bf16 %v2581_v26  ;;  %v4855_v6 = vunpack.i.l.bf16 %v4208_v24 }
 0x235   : > { %v2596_v33 = vpop.permute.xlu0 %2595  ;;  %v1339_v50 = vsel %vm1312_vm9, %v2588_v3, %v2592_v25  ;;  %v2558_v25 = vunpack.i.h.bf16 %v4172_v10 }
 0x236   : > { %v2601_v8 = vpop.permute.xlu1 %2600  ;;  %v4222_v41 = vpop.permute.xlu2 %2635  ;;  %v2598_v38 = vunpack.i.h.bf16 %v2596_v33  ;;  %v2597_v14 = vunpack.i.l.bf16 %v2596_v33 }
 0x237   : > { %v2603_v13 = vunpack.i.h.bf16 %v2601_v8  ;;  %v2602_v5 = vunpack.i.l.bf16 %v2601_v8 }
 0x238   : > { %v1341_v33 = vsel %vm1312_vm9, %v2597_v14, %v2598_v38  ;;  %v1337_v14 = vsel %vm1312_vm9, %v2582_v57, %v2583_v15 }
 0x239   : > { %v1343_v53 = vsel %vm1312_vm9, %v2603_v13, %v2607_v19  ;;  %v4226_v2 = vsel %vm1312_vm9, %v2598_v38, %v2602_v5  ;;  %v2573_v5 = vunpack.i.h.bf16 %v2571_v36 }
 0x23a   : > { %1531 = vmatpush.msra.mxu0 %v1343_v53  ;;  %v4953_v53 = vunpack.i.l.bf16 %v4138_v46  ;;  %v2543_v46 = vunpack.i.h.bf16 %v4136_v52 }
 0x23b   : > { %2820 = vrot.lane.b32.xlu0 %v4952_v59, %s3007_s24 }
 0x23c   : > { %2825 = vrot.lane.b32.xlu1 %v3952_v27, %s3007_s24  ;;  %2815 = vrot.lane.b32.xlu2 %v3883_v22, %s3007_s24  ;;  %v2567_v22 = vunpack.i.l.bf16 %v4191_v55  ;;  %v1335_v3 = vsel %vm1312_vm9, %v2573_v5, %v4953_v53  ;;  %v2552_v55 = vunpack.i.l.bf16 %v4167_v28  ;;  %v4957_v53 = vpack.i.bf16 %v3767_v39, %v3761_v43 }
 0x23d   : > { %1532 = vmatpush.msra.mxu0 %v1341_v33  ;;  %v4237_v13 = vpop.permute.xlu0 %2610  ;;  %v4954_v33 = vunpack.i.l.bf16 %v4110_v61  ;;  %v4960_v43 = vunpack.i.l.bf16 %v4046_v60 }
 0x23e   : > { %v2616_v19 = vpop.permute.xlu1 %2615  ;;  %v4239_v34 = vpop.permute.xlu2 %2650  ;;  %v4862_v8 = vunpack.i.h.bf16 %v4237_v13  ;;  %v1333_v15 = vsel %vm1312_vm9, %v2567_v22, %v2568_v1  ;;  %v2537_v1 = vunpack.i.l.bf16 %v4134_v31  ;;  %v4956_v22 = vunpack.i.l.bf16 %v4079_v0 }
 0x23f   : > { %v2618_v26 = vunpack.i.h.bf16 %v2616_v19  ;;  %v2617_v27 = vunpack.i.l.bf16 %v2616_v19  ;;  %1533 = vmatpush.msra.mxu0 %v1339_v50  ;;  %v1331_v5 = vsel %vm1312_vm9, %v2558_v25, %v4954_v33  ;;  %v4955_v50 = vunpack.i.h.bf16 %v4167_v28 }
 0x240   : > { %v2326_v28 = vunpack.i.l.bf16 %v3522_v17  ;;  %v2522_v25 = vunpack.i.l.bf16 %v4103_v16  ;;  %v4959_v0 = vunpack.i.h.bf16 %v4134_v31 }
 0x241   : > { %1534 = vmatpush.msra.mxu0 %v1337_v14  ;;  %v4249_v36 = vsel %vm1312_vm9, %v2618_v26, %v4855_v6  ;;  %v4254_v38 = vsel %vm1312_vm9, %v4862_v8, %v2617_v27  ;;  %v1329_v52 = vsel %vm1312_vm9, %v2552_v55, %v4955_v50  ;;  %v2528_v27 = vunpack.i.h.bf16 %v4108_v54 }
 0x242   : > { %v1327_v14 = vsel %vm1312_vm9, %v2543_v46, %v4956_v22  ;;  %v4958_v54 = vpack.i.bf16 %v4021_v12, %v4016_v4  ;;  %v4861_v4 = vunpack.i.l.bf16 %v4239_v34  ;;  %v2492_v50 = vunpack.i.l.bf16 %v4037_v49 }
 0x243   : > { %1535 = vmatpush.msra.mxu0 %v1335_v3  ;;  %2835 = vrot.lane.b32.xlu0 %v3829_v37, %s3007_s24  ;;  %v1325_v3 = vsel %vm1312_vm9, %v2537_v1, %v4959_v0  ;;  %v1323_v39 = vsel %vm1312_vm9, %v2528_v27, %v4960_v43  ;;  %v4965_v27 = vunpack.i.h.bf16 %v4071_v63 }
 0x244   : > { %2830 = vrot.lane.b32.xlu2 %v3614_v23, %s3007_s24  ;;  %2840 = vrot.lane.b32.xlu1 %v3831_v56, %s3007_s24  ;;  %v4856_v23 = vunpack.i.l.bf16 %v4222_v41 }
 0x245   : > { %1536 = vmatpush.msra.mxu0 %v1333_v15  ;;  %v4268_v10 = vpop.permute.xlu0 %2625 }
 0x246   : > { %v2631_v59 = vpop.permute.xlu1 %2630  ;;  %v4271_v57 = vpop.permute.xlu2 %2665  ;;  %v4863_v37 = vunpack.i.h.bf16 %v4268_v10 }
 0x247   : > { %v2633_v19 = vunpack.i.h.bf16 %v2631_v59  ;;  %v2632_v56 = vunpack.i.l.bf16 %v2631_v59  ;;  %1537 = vmatpush.msra.mxu0 %v1331_v5  ;;  %v4961_v59 = vunpack.i.h.bf16 %v3522_v17  ;;  %v2507_v5 = vunpack.i.l.bf16 %v4071_v63 }
 0x249   : > { %1538 = vmatpush.msra.mxu0 %v1329_v52  ;;  %v4285_v26 = vsel %vm1312_vm9, %v2633_v19, %v4856_v23  ;;  %v4290_v61 = vsel %vm1312_vm9, %v4863_v37, %v2632_v56  ;;  %v924_v12 = vsel %vm923_vm12, %v2326_v28, %v4961_v59  ;;  %v4962_v19 = vunpack.i.h.bf16 %v4103_v16 }
 0x24a   : > { %v2859_v1 = vpack.i.bf16 %v924_v12, %v2326_v28  ;;  %v4963_v16 = vpack.i.bf16 %v4011_v18, %v3732_v44  ;;  %v4964_v52 = vpack.i.bf16 %v3977_v11, %v3969_v7  ;;  %v1317_v22 = vsel %vm1312_vm9, %v2507_v5, %v4965_v27  ;;  %v4358_v18 = vld.sshfl [vmem:[#allocation1] sm:$0xff pattern:$0x75316420]  ;;  %v4967_v11 = vld [vmem:[#allocation26_spill] sm:$0xff] }
 0x24b   : > { %1539 = vmatpush.msra.mxu0 %v1327_v14  ;;  %2850 = vrot.lane.b32.xlu0 %v3558_v29, %s3007_s24  ;;  %v1321_v56 = vsel %vm1312_vm9, %v2522_v25, %v4962_v19  ;;  %v4966_v28 = vunpack.i.h.bf16 %v4037_v49  ;;  %v4968_v63 = vpack.i.bf16 %v3819_v30, %v4967_v11  ;;  %v4969_v25 = vpack.i.bf16 %v3974_v62, %v3692_v20  ;;  %v4974_v30 = vld [vmem:[#allocation23_spill] sm:$0xff] }
 0x24c   : > { %2845 = vrot.lane.b32.xlu2 %v4957_v53, %s3007_s24  ;;  %2855 = vrot.lane.b32.xlu1 %v4958_v54, %s3007_s24  ;;  %v4971_v53 = vld [vmem:[#allocation25_spill] sm:$0xff] }
 0x24d   : > { %1540 = vmatpush.msra.mxu0 %v1325_v3  ;;  %v4311_v55 = vpop.permute.xlu0 %2640  ;;  %v1313_v7 = vsel %vm1312_vm9, %v2492_v50, %v4966_v28 }
 0x24e   : > { %v2646_v29 = vpop.permute.xlu1 %2645  ;;  %v4313_v15 = vpop.permute.xlu2 %2680  ;;  %v4864_v46 = vunpack.i.h.bf16 %v4311_v55 }
 0x24f   : > { %v2648_v31 = vunpack.i.h.bf16 %v2646_v29  ;;  %v2647_v33 = vunpack.i.l.bf16 %v2646_v29  ;;  %1541 = vmatpush.msra.mxu0 %v1323_v39  ;;  %v4973_v29 = vld [vmem:[#allocation24_spill] sm:$0xff] }
 0x250   : > { %v4975_v43 = vpack.i.bf16 %v4973_v29, %v4974_v30 }
 0x251   : > { %1542 = vmatpush.msra.mxu0 %v1321_v56  ;;  %v4330_v60 = vsel %vm1312_vm9, %v2648_v31, %v4861_v4  ;;  %v4335_v17 = vsel %vm1312_vm9, %v4864_v46, %v2647_v33 }
 0x253   : > { %1543 = vmatpush.msra.mxu0 %v4085_v51  ;;  %2865 = vrot.lane.b32.xlu0 %v4963_v16, %s3007_s24 }
 0x254   : > { %2860 = vrot.lane.b32.xlu2 %v2859_v1, %s3007_s24  ;;  %2870 = vrot.lane.b32.xlu1 %v4964_v52, %s3007_s24 }
 0x255   : > { %1544 = vmatpush.msra.mxu0 %v1317_v22  ;;  %v4351_v51 = vpop.permute.xlu0 %2655 }
 0x256   : > { %v4353_v14 = vpop.permute.xlu1 %2660  ;;  %v4355_v44 = vpop.permute.xlu2 %2695 }
 0x257   : > { %1545 = vmatpush.msra.mxu0 %v4051_v48  ;;  %v4970_v48 = vld [vmem:[#allocation12_spill] sm:$0xff] }
 0x258   : > { %v4972_v54 = vpack.i.bf16 %v4970_v48, %v4971_v53 }
 0x259   : > { %1546 = vmatpush.msra.mxu0 %v1313_v7 }
 0x25a   : > { %1547 = vmatmul.f32.vlgmr.msra.gmra.mxu0 %v4358_v18 }
 0x25b   : > { %2880 = vrot.lane.b32.xlu0 %v4968_v63, %s3007_s24 }
 0x25c   : > { %2875 = vrot.lane.b32.xlu2 %v4969_v25, %s3007_s24  ;;  %2885 = vrot.lane.b32.xlu1 %v4972_v54, %s3007_s24 }
 0x25d   : > { %v4376_v49 = vpop.permute.xlu0 %2670 }
 0x25e   : > { %v4378_v0 = vpop.permute.xlu1 %2675  ;;  %v4380_v3 = vpop.permute.xlu2 %2710 }
 0x264   : > { %2890 = vrot.lane.b32.xlu2 %v4975_v43, %s3007_s24 }
 0x265   : > { %v4386_v39 = vpop.permute.xlu0 %2685 }
 0x266   : > { %v4388_v20 = vpop.permute.xlu1 %2690  ;;  %v4390_v62 = vpop.permute.xlu2 %2725 }
 0x267   : > { %v2728_v59 = vunpack.i.h.bf16 %v4390_v62  ;;  %v2727_v12 = vunpack.i.l.bf16 %v4390_v62  ;;  %v2667_v62 = vunpack.i.l.bf16 %v4271_v57 }
 0x269   : > { %v1375_v31 = vsel %vm1312_vm9, %v2727_v12, %v2728_v59 }
 0x26a   : > { %1551 = vmatpush.msra.mxu1 %v1375_v31 }
 0x26d   : > { %v4397_v33 = vpop.permute.xlu0 %2700 }
 0x26e   : > { %v4399_v5 = vpop.permute.xlu1 %2705  ;;  %v4401_v19 = vpop.permute.xlu2 %2740 }
 0x26f   : > { %v4859_v63 = vunpack.i.h.bf16 %v4401_v19  ;;  %v2742_v25 = vunpack.i.l.bf16 %v4401_v19  ;;  %v2708_v30 = vunpack.i.h.bf16 %v4399_v5 }
 0x271   : > { %v1401_v6 = vsel %vm1312_vm9, %v2742_v25, %v4859_v63 }
 0x275   : > { %v4403_v56 = vpop.permute.xlu0 %2715 }
 0x276   : > { %v4405_v1 = vpop.permute.xlu1 %2720  ;;  %v4407_v16 = vpop.permute.xlu2 %2755  ;;  %v4860_v50 = vunpack.i.h.bf16 %v4403_v56  ;;  %v2717_v52 = vunpack.i.l.bf16 %v4403_v56 }
 0x277   : > { %v4858_v27 = vunpack.i.h.bf16 %v4405_v1  ;;  %v2722_v22 = vunpack.i.l.bf16 %v4405_v1  ;;  %v2757_v37 = vunpack.i.l.bf16 %v4407_v16 }
 0x278   : > { %v1407_v28 = vsel %vm1312_vm9, %v2717_v52, %v4860_v50  ;;  %v2712_v52 = vunpack.i.l.bf16 %v4380_v3 }
 0x279   : > { %1571 = vmatpush.msra.mxu2 %v1407_v28  ;;  %v1405_v7 = vsel %vm1312_vm9, %v2722_v22, %v4858_v27  ;;  %v2703_v22 = vunpack.i.h.bf16 %v4397_v33  ;;  %v2702_v28 = vunpack.i.l.bf16 %v4397_v33  ;;  %v2687_v33 = vunpack.i.l.bf16 %v4386_v39 }
 0x27a   : > { %v1371_v23 = vsel %vm1312_vm9, %v2708_v30, %v2712_v52 }
 0x27b   : > { %1572 = vmatpush.msra.mxu2 %v1405_v7 }
 0x27d   : > { %v4419_v11 = vpop.permute.xlu0 %2730 }
 0x27e   : > { %v2736_v48 = vpop.permute.xlu1 %2735  ;;  %v4423_v53 = vpop.permute.xlu2 %2770  ;;  %v4857_v54 = vunpack.i.h.bf16 %v4419_v11  ;;  %v2732_v29 = vunpack.i.l.bf16 %v4419_v11 }
 0x27f   : > { %v2738_v43 = vunpack.i.h.bf16 %v2736_v48  ;;  %v2737_v12 = vunpack.i.l.bf16 %v2736_v48  ;;  %v2693_v48 = vunpack.i.h.bf16 %v4388_v20 }
 0x280   : > { %v1403_v31 = vsel %vm1312_vm9, %v2732_v29, %v4857_v54  ;;  %v2697_v29 = vunpack.i.l.bf16 %v4355_v44  ;;  %v2688_v54 = vunpack.i.h.bf16 %v4386_v39 }
 0x281   : > { %v1373_v7 = vsel %vm1312_vm9, %v2737_v12, %v2738_v43  ;;  %1573 = vmatpush.msra.mxu2 %v1403_v31  ;;  %v1369_v12 = vsel %vm1312_vm9, %v2702_v28, %v2703_v22  ;;  %v2672_v28 = vunpack.i.l.bf16 %v4376_v49  ;;  %v2758_v31 = vunpack.i.h.bf16 %v4407_v16 }
 0x282   : > { %1552 = vmatpush.msra.mxu1 %v1373_v7  ;;  %v1367_v4 = vsel %vm1312_vm9, %v2693_v48, %v2697_v29 }
 0x283   : > { %1574 = vmatpush.msra.mxu2 %v1401_v6  ;;  %v2678_v6 = vunpack.i.h.bf16 %v4378_v0 }
 0x284   : > { %1553 = vmatpush.msra.mxu1 %v1371_v23 }
 0x285   : > { %v4443_v27 = vpop.permute.xlu0 %2745 }
 0x286   : > { %v2751_v7 = vpop.permute.xlu1 %2750  ;;  %v4865_v25 = vunpack.i.h.bf16 %v4443_v27  ;;  %v2747_v63 = vunpack.i.l.bf16 %v4443_v27  ;;  %1554 = vmatpush.msra.mxu1 %v1369_v12  ;;  %v4450_v50 = vpop.permute.xlu2 %2785  ;;  %v2713_v12 = vunpack.i.h.bf16 %v4380_v3  ;;  %v2707_v3 = vunpack.i.l.bf16 %v4399_v5 }
 0x287   : > { %v2753_v23 = vunpack.i.h.bf16 %v2751_v7  ;;  %v2752_v30 = vunpack.i.l.bf16 %v2751_v7  ;;  %v1365_v7 = vsel %vm1312_vm9, %v2687_v33, %v2688_v54  ;;  %v2698_v33 = vunpack.i.h.bf16 %v4355_v44 }
 0x288   : > { %1555 = vmatpush.msra.mxu1 %v1367_v4  ;;  %v1399_v46 = vsel %vm1312_vm9, %v2747_v63, %v4865_v25  ;;  %v2663_v63 = vunpack.i.h.bf16 %v4353_v14  ;;  %v4976_v25 = vunpack.i.l.bf16 %v4313_v15  ;;  %v4977_v5 = vunpack.i.h.bf16 %v4376_v49 }
 0x289   : > { %1575 = vmatpush.msra.mxu2 %v1399_v46  ;;  %v1376_v48 = vsel %vm1312_vm9, %v2728_v59, %v2752_v30  ;;  %v1397_v4 = vsel %vm1312_vm9, %v2753_v23, %v2757_v37  ;;  %v1374_v46 = vsel %vm1312_vm9, %v2738_v43, %v2758_v31  ;;  %v2658_v59 = vunpack.i.h.bf16 %v4351_v51 }
 0x28a   : > { %1556 = vmatpush.msra.mxu1 %v1365_v7  ;;  %1631 = vmatpush.msrb.mxu0 %v1376_v48  ;;  %v1363_v8 = vsel %vm1312_vm9, %v2678_v6, %v4976_v25  ;;  %v2657_v23 = vunpack.i.l.bf16 %v4351_v51  ;;  %v1361_v7 = vsel %vm1312_vm9, %v2672_v28, %v4977_v5  ;;  %v1372_v25 = vsel %vm1312_vm9, %v2712_v52, %v2713_v12  ;;  %v969_v51 = vld [vmem:[%s4951_s29 + $0x8] sm:$0x77] }
 0x28b   : > { %1576 = vmatpush.msra.mxu2 %v1397_v4  ;;  %v1359_v48 = vsel %vm1312_vm9, %v2663_v63, %v2667_v62  ;;  %v1370_v4 = vsel %vm1312_vm9, %v2703_v22, %v2707_v3  ;;  %v2772_v28 = vunpack.i.l.bf16 %v4423_v53  ;;  %v2683_v12 = vunpack.i.h.bf16 %v4313_v15  ;;  %980 = vst [vmem:[#allocation1 + $0x10] ss:$2 sm:$0xff] %v969_v51 }
 0x28c   : > { %1557 = vmatpush.msra.mxu1 %v1363_v8  ;;  %1632 = vmatpush.msrb.mxu0 %v1374_v46  ;;  %v2692_v8 = vunpack.i.l.bf16 %v4388_v20  ;;  %v2642_v46 = vunpack.i.l.bf16 %v4311_v55  ;;  %v1357_v20 = vsel %vm1312_vm9, %v2657_v23, %v2658_v59  ;;  %v1368_v22 = vsel %vm1312_vm9, %v2697_v29, %v2698_v33 }
 0x28d   : > { %v4480_v30 = vpop.permute.xlu0 %2760  ;;  %v2677_v3 = vunpack.i.l.bf16 %v4378_v0  ;;  %v2627_v23 = vunpack.i.l.bf16 %v4268_v10  ;;  %v4978_v29 = vunpack.i.h.bf16 %v4311_v55 }
 0x28e   : > { %v4486_v6 = vpop.permute.xlu1 %2765  ;;  %v2763_v43 = vunpack.i.h.bf16 %v4480_v30  ;;  %v2762_v31 = vunpack.i.l.bf16 %v4480_v30  ;;  %1558 = vmatpush.msra.mxu1 %v1361_v7  ;;  %1633 = vmatpush.msrb.mxu0 %v1372_v25  ;;  %v4500_v5 = vpop.permute.xlu2 %2800  ;;  %v1366_v7 = vsel %vm1312_vm9, %v2688_v54, %v2692_v8 }
 0x28f   : > { %v2768_v44 = vunpack.i.h.bf16 %v4486_v6  ;;  %v1353_v33 = vsel %vm1312_vm9, %v2642_v46, %v4978_v29  ;;  %v4981_v46 = vunpack.i.h.bf16 %v4268_v10 }
 0x290   : > { %1559 = vmatpush.msra.mxu1 %v1359_v48  ;;  %1634 = vmatpush.msrb.mxu0 %v1370_v4  ;;  %v1395_v52 = vsel %vm1312_vm9, %v2762_v31, %v2763_v43  ;;  %v4979_v31 = vunpack.i.l.bf16 %v4313_v15  ;;  %v4980_v48 = vunpack.i.h.bf16 %v4376_v49  ;;  %v2662_v4 = vunpack.i.l.bf16 %v4353_v14 }
 0x291   : > { %1577 = vmatpush.msra.mxu2 %v1395_v52  ;;  %v1393_v63 = vsel %vm1312_vm9, %v2768_v44, %v2772_v28  ;;  %v2668_v44 = vunpack.i.h.bf16 %v4271_v57  ;;  %v2653_v52 = vunpack.i.h.bf16 %v4239_v34  ;;  %v2767_v14 = vunpack.i.l.bf16 %v4486_v6 }
 0x292   : > { %1560 = vmatpush.msra.mxu1 %v1357_v20  ;;  %1635 = vmatpush.msrb.mxu0 %v1368_v22  ;;  %v1364_v0 = vsel %vm1312_vm9, %v4979_v31, %v2683_v12  ;;  %v1362_v15 = vsel %vm1312_vm9, %v4980_v48, %v2677_v3  ;;  %v2612_v12 = vunpack.i.l.bf16 %v4237_v13  ;;  %v1349_v20 = vsel %vm1312_vm9, %v2627_v23, %v4981_v46  ;;  %v982_v3 = vld.sshfl [vmem:[#allocation1 + $0x8] sm:$0xff pattern:$0x75316420] }
 0x293   : > { %1578 = vmatpush.msra.mxu2 %v1393_v63  ;;  %v2638_v63 = vunpack.i.h.bf16 %v4222_v41  ;;  %v1358_v10 = vsel %vm1312_vm9, %v2658_v59, %v2662_v4  ;;  %v2788_v23 = vunpack.i.h.bf16 %v4450_v50  ;;  %v4982_v6 = vunpack.i.h.bf16 %v4237_v13 }
 0x294   : > { %1561 = vmatpush.msra.mxu1 %v4330_v60  ;;  %1636 = vmatpush.msrb.mxu0 %v1366_v7  ;;  %v2773_v7 = vunpack.i.h.bf16 %v4423_v53  ;;  %v2803_v59 = vunpack.i.h.bf16 %v4500_v5  ;;  %v2802_v31 = vunpack.i.l.bf16 %v4500_v5 }
 0x295   : > { %v4515_v25 = vpop.permute.xlu0 %2775  ;;  %v1345_v29 = vsel %vm1312_vm9, %v2612_v12, %v4982_v6  ;;  %v4986_v12 = vunpack.i.l.bf16 %v4222_v41 }
 0x296   : > { %v4524_v39 = vpop.permute.xlu1 %2780  ;;  %v2778_v54 = vunpack.i.h.bf16 %v4515_v25  ;;  %v2777_v60 = vunpack.i.l.bf16 %v4515_v25  ;;  %1562 = vmatpush.msra.mxu1 %v1353_v33  ;;  %1637 = vmatpush.msrb.mxu0 %v1364_v0  ;;  %v4548_v22 = vpop.permute.xlu2 %2815  ;;  %v4983_v33 = vunpack.i.l.bf16 %v4239_v34  ;;  %v2787_v34 = vunpack.i.l.bf16 %v4450_v50 }
 0x297   : > { %v2783_v8 = vunpack.i.h.bf16 %v4524_v39  ;;  %v2782_v55 = vunpack.i.l.bf16 %v4524_v39  ;;  %v1352_v46 = vsel %vm1312_vm9, %v4986_v12, %v2638_v63  ;;  %v2817_v6 = vunpack.i.l.bf16 %v4548_v22 }
 0x298   : > { %1563 = vmatpush.msra.mxu1 %v4285_v26  ;;  %1638 = vmatpush.msrb.mxu0 %v1362_v15  ;;  %v1419_v57 = vsel %vm1312_vm9, %v2777_v60, %v2778_v54  ;;  %v1360_v26 = vsel %vm1312_vm9, %v2667_v62, %v2668_v44  ;;  %v2818_v51 = vunpack.i.h.bf16 %v4548_v22  ;;  %v4992_v22 = vld [vmem:[#allocation9_spill] sm:$0xff] }
 0x299   : > { %v1391_v49 = vsel %vm1312_vm9, %v2782_v55, %v2783_v8  ;;  %1601 = vmatpush.msra.mxu3 %v1419_v57  ;;  %v4984_v55 = vunpack.i.h.bf16 %v4403_v56  ;;  %v4985_v57 = vunpack.i.h.bf16 %v4405_v1  ;;  %v2623_v56 = vunpack.i.h.bf16 %v4208_v24 }
 0x29a   : > { %1564 = vmatpush.msra.mxu1 %v1349_v20  ;;  %1579 = vmatpush.msra.mxu2 %v1391_v49  ;;  %v4987_v1 = vunpack.i.h.bf16 %v4419_v11 }
 0x29b   : > { %1639 = vmatpush.msrb.mxu0 %v1360_v26  ;;  %v1408_v48 = vsel %vm1312_vm9, %v4984_v55, %v2767_v14  ;;  %v1406_v50 = vsel %vm1312_vm9, %v4985_v57, %v2773_v7  ;;  %v4988_v26 = vunpack.i.h.bf16 %v4401_v19  ;;  %v4989_v7 = vunpack.i.l.bf16 %v4208_v24 }
 0x29c   : > { %1565 = vmatpush.msra.mxu1 %v4249_v36  ;;  %v1356_v36 = vsel %vm1312_vm9, %v4983_v33, %v2653_v52  ;;  %v1404_v20 = vsel %vm1312_vm9, %v4987_v1, %v2787_v34  ;;  %v4990_v24 = vunpack.i.h.bf16 %v4443_v27 }
 0x29d   : > { %1640 = vmatpush.msrb.mxu0 %v1358_v10  ;;  %v4557_v62 = vpop.permute.xlu0 %2790 }
 0x29e   : > { %v4570_v0 = vpop.permute.xlu1 %2795  ;;  %v2793_v44 = vunpack.i.h.bf16 %v4557_v62  ;;  %v2792_v13 = vunpack.i.l.bf16 %v4557_v62  ;;  %1566 = vmatpush.msra.mxu1 %v1345_v29  ;;  %v4600_v49 = vpop.permute.xlu2 %2830 }
 0x29f   : > { %v2797_v60 = vunpack.i.l.bf16 %v4570_v0  ;;  %1641 = vmatpush.msrb.mxu0 %v1356_v36  ;;  %1567 = vmatmul.f32.vlgmr.msra.gmra.mxu1 %v982_v3  ;;  %v2798_v4 = vunpack.i.h.bf16 %v4570_v0 }
 0x2a0   : > { %1651 = vmatpush.msrb.mxu1 %v1408_v48  ;;  %v1417_v15 = vsel %vm1312_vm9, %v2788_v23, %v2792_v13  ;;  %v1348_v23 = vsel %vm1312_vm9, %v4989_v7, %v2623_v56  ;;  %v4666_v7 = vld.sshfl [vmem:[#allocation1 + $0x18] sm:$0xff pattern:$0x75316420] }
 0x2a1   : > { %1642 = vmatpush.msrb.mxu0 %v4335_v17  ;;  %v1389_v52 = vsel %vm1312_vm9, %v2793_v44, %v2797_v60  ;;  %1602 = vmatpush.msra.mxu3 %v1417_v15  ;;  %v1415_v17 = vsel %vm1312_vm9, %v2802_v31, %v2803_v59  ;;  %v1402_v41 = vsel %vm1312_vm9, %v4988_v26, %v2798_v4  ;;  %v2833_v44 = vunpack.i.h.bf16 %v4600_v49 }
 0x2a2   : > { %1652 = vmatpush.msrb.mxu1 %v1406_v50  ;;  %1580 = vmatpush.msra.mxu2 %v1389_v52 }
 0x2a3   : > { %1643 = vmatpush.msrb.mxu0 %v1352_v46  ;;  %1603 = vmatpush.msra.mxu3 %v1415_v17 }
 0x2a4   : > { %1653 = vmatpush.msrb.mxu1 %v1404_v20 }
 0x2a5   : > { %1644 = vmatpush.msrb.mxu0 %v4290_v61  ;;  %v4606_v14 = vpop.permute.xlu0 %2805 }
 0x2a6   : > { %1654 = vmatpush.msrb.mxu1 %v1402_v41  ;;  %v2811_v63 = vpop.permute.xlu1 %2810  ;;  %v2808_v10 = vunpack.i.h.bf16 %v4606_v14  ;;  %v2807_v11 = vunpack.i.l.bf16 %v4606_v14  ;;  %v4633_v27 = vpop.permute.xlu2 %2845 }
 0x2a7   : > { %v2813_v29 = vunpack.i.h.bf16 %v2811_v63  ;;  %v2812_v61 = vunpack.i.l.bf16 %v2811_v63  ;;  %1645 = vmatpush.msrb.mxu0 %v1348_v23  ;;  %v2848_v12 = vunpack.i.h.bf16 %v4633_v27 }
 0x2a8   : > { %v1387_v19 = vsel %vm1312_vm9, %v2807_v11, %v2808_v10 }
 0x2a9   : > { %1646 = vmatpush.msrb.mxu0 %v4254_v38  ;;  %1581 = vmatpush.msra.mxu2 %v1387_v19  ;;  %v1413_v33 = vsel %vm1312_vm9, %v2813_v29, %v2817_v6  ;;  %v1400_v36 = vsel %vm1312_vm9, %v4990_v24, %v2812_v61  ;;  %v2832_v38 = vunpack.i.l.bf16 %v4600_v49  ;;  %v1394_v30 = vsel %vm1312_vm9, %v2772_v28, %v2848_v12  ;;  %v983_v24 = vld.sshfl [vmem:[#allocation1 + $0x10] sm:$0xff pattern:$0x75316420] }
 0x2aa   : > { %1604 = vmatpush.msra.mxu3 %v1413_v33  ;;  %1655 = vmatpush.msrb.mxu1 %v1400_v36 }
 0x2ab   : > { %1647 = vmatmul.f32.vlgmr.msrb.gmra.mxu0 %v982_v3  ;;  %v1383_v52 = vsel %vm1312_vm9, %v2832_v38, %v2833_v44 }
 0x2ad   : > { %v4625_v31 = vpop.permute.xlu0 %2820 }
 0x2ae   : > { %v4629_v34 = vpop.permute.xlu1 %2825  ;;  %v2823_v55 = vunpack.i.h.bf16 %v4625_v31  ;;  %v2822_v48 = vunpack.i.l.bf16 %v4625_v31  ;;  %v4658_v41 = vpop.permute.xlu2 %2860 }
 0x2af   : > { %v2828_v15 = vunpack.i.h.bf16 %v4629_v34  ;;  %v2827_v3 = vunpack.i.l.bf16 %v4629_v34  ;;  %v2863_v23 = vunpack.i.h.bf16 %v4658_v41  ;;  %v2862_v29 = vunpack.i.l.bf16 %v4658_v41  ;;  %v4996_v34 = vld [vmem:[#allocation16_spill] sm:$0xff] }
 0x2b0   : > { %v1385_v4 = vsel %vm1312_vm9, %v2818_v51, %v2822_v48  ;;  %v1398_v57 = vsel %vm1312_vm9, %v2757_v37, %v2823_v55  ;;  %v2847_v37 = vunpack.i.l.bf16 %v4633_v27 }
 0x2b1   : > { %1582 = vmatpush.msra.mxu2 %v1385_v4  ;;  %v1411_v50 = vsel %vm1312_vm9, %v2827_v3, %v2828_v15  ;;  %1656 = vmatpush.msrb.mxu1 %v1398_v57  ;;  %v1377_v36 = vsel %vm1312_vm9, %v2862_v29, %v2863_v23 }
 0x2b2   : > { %1605 = vmatpush.msra.mxu3 %v1411_v50  ;;  %v4993_v50 = vld [vmem:[#allocation13_spill] sm:$0xff] }
 0x2b3   : > { %1583 = vmatpush.msra.mxu2 %v1383_v52  ;;  %v4998_v52 = vld [vmem:[#allocation8_spill] sm:$0xff] }
 0x2b5   : > { %v2836_v56 = vpop.permute.xlu0 %2835 }
 0x2b6   : > { %v4650_v46 = vpop.permute.xlu1 %2840  ;;  %v2838_v16 = vunpack.i.h.bf16 %v2836_v56  ;;  %v2837_v17 = vunpack.i.l.bf16 %v2836_v56  ;;  %v2876_v51 = vpop.permute.xlu2 %2875 }
 0x2b7   : > { %v2843_v1 = vunpack.i.h.bf16 %v4650_v46  ;;  %v2842_v20 = vunpack.i.l.bf16 %v4650_v46  ;;  %v2877_v4 = vunpack.i.l.bf16 %v2876_v51 }
 0x2b8   : > { %v1396_v26 = vsel %vm1312_vm9, %v2763_v43, %v2837_v17 }
 0x2b9   : > { %v1381_v63 = vsel %vm1312_vm9, %v2843_v1, %v2847_v37  ;;  %v1409_v11 = vsel %vm1312_vm9, %v2838_v16, %v2842_v20  ;;  %1657 = vmatpush.msrb.mxu1 %v1396_v26  ;;  %v1386_v62 = vsel %vm1312_vm9, %v2822_v48, %v2877_v4  ;;  %v4999_v1 = vld [vmem:[#allocation10_spill] sm:$0xff] }
 0x2ba   : > { %1584 = vmatpush.msra.mxu2 %v1381_v63  ;;  %1606 = vmatpush.msra.mxu3 %v1409_v11 }
 0x2bb   : > { %1658 = vmatpush.msrb.mxu1 %v1394_v30  ;;  %1866 = vmatmul.msk.f32.vlgmr.msra.gmra.mxu3 %vm551_vm10, %v4666_v7 }
 0x2bc   : > { %1611 = vmatpush.msrb.mxu3 %v4195_v58 }
 0x2bd   : > { %v4675_v43 = vpop.permute.xlu0 %2850 }
 0x2be   : > { %1612 = vmatpush.msrb.mxu3 %v4226_v2  ;;  %v2856_v61 = vpop.permute.xlu1 %2855  ;;  %v2853_v19 = vunpack.i.h.bf16 %v4675_v43  ;;  %v2852_v53 = vunpack.i.l.bf16 %v4675_v43  ;;  %v2891_v0 = vpop.permute.xlu2 %2890 }
 0x2bf   : > { %v2857_v28 = vunpack.i.l.bf16 %v2856_v61  ;;  %v2858_v58 = vunpack.i.h.bf16 %v2856_v61  ;;  %v2892_v31 = vunpack.i.l.bf16 %v2891_v0 }
 0x2c0   : > { %1613 = vmatpush.msrb.mxu3 %v4177_v9  ;;  %v1379_v33 = vsel %vm1312_vm9, %v2852_v53, %v2853_v19 }
 0x2c1   : > { %1585 = vmatpush.msra.mxu2 %v1379_v33  ;;  %v1392_v2 = vsel %vm1312_vm9, %v2783_v8, %v2857_v28  ;;  %v1420_v9 = vsel %vm1312_vm9, %v2778_v54, %v2858_v58  ;;  %v2878_v54 = vunpack.i.h.bf16 %v2876_v51 }
 0x2c2   : > { %1614 = vmatpush.msrb.mxu3 %v4214_v21  ;;  %1659 = vmatpush.msrb.mxu1 %v1392_v2 }
 0x2c3   : > { %1586 = vmatpush.msra.mxu2 %v1377_v36 }
 0x2c4   : > { %1615 = vmatpush.msrb.mxu3 %v4150_v47  ;;  %1587 = vmatmul.f32.vlgmr.msra.gmra.mxu2 %v983_v24 }
 0x2c5   : > { %1681 = vmatpush.msrb.mxu2 %v1420_v9  ;;  %v2866_v21 = vpop.permute.xlu0 %2865 }
 0x2c6   : > { %1616 = vmatpush.msrb.mxu3 %v4198_v40  ;;  %v2871_v39 = vpop.permute.xlu1 %2870  ;;  %v2868_v8 = vunpack.i.h.bf16 %v2866_v21  ;;  %v2867_v38 = vunpack.i.l.bf16 %v2866_v21 }
 0x2c7   : > { %v2873_v55 = vunpack.i.h.bf16 %v2871_v39  ;;  %v2872_v3 = vunpack.i.l.bf16 %v2871_v39 }
 0x2c8   : > { %1617 = vmatpush.msrb.mxu3 %v4122_v45  ;;  %v1390_v47 = vsel %vm1312_vm9, %v2797_v60, %v2867_v38  ;;  %v1418_v25 = vsel %vm1312_vm9, %v2792_v13, %v2868_v8  ;;  %v1414_v13 = vsel %vm1312_vm9, %v2817_v6, %v2878_v54  ;;  %v2893_v6 = vunpack.i.h.bf16 %v2891_v0 }
 0x2c9   : > { %1660 = vmatpush.msrb.mxu1 %v1390_v47  ;;  %1682 = vmatpush.msrb.mxu2 %v1418_v25  ;;  %v1388_v40 = vsel %vm1312_vm9, %v2808_v10, %v2872_v3  ;;  %v1416_v45 = vsel %vm1312_vm9, %v2803_v59, %v2873_v55  ;;  %v4991_v10 = vld [vmem:[#allocation14_spill] sm:$0xff] }
 0x2ca   : > { %1618 = vmatpush.msrb.mxu3 %v4182_v32  ;;  %v1378_v27 = vsel %vm1312_vm9, %v2863_v23, %v2893_v6 }
 0x2cb   : > { %1661 = vmatpush.msrb.mxu1 %v1388_v40  ;;  %1683 = vmatpush.msrb.mxu2 %v1416_v45 }
 0x2cc   : > { %1619 = vmatpush.msrb.mxu3 %v4090_v42 }
 0x2cd   : > { %v2881_v32 = vpop.permute.xlu0 %2880  ;;  %1662 = vmatpush.msrb.mxu1 %v1386_v62  ;;  %1684 = vmatpush.msrb.mxu2 %v1414_v13 }
 0x2ce   : > { %1620 = vmatpush.msrb.mxu3 %v4155_v35  ;;  %v2886_v42 = vpop.permute.xlu1 %2885  ;;  %v2883_v60 = vunpack.i.h.bf16 %v2881_v32  ;;  %v2882_v14 = vunpack.i.l.bf16 %v2881_v32 }
 0x2cf   : > { %v2888_v5 = vunpack.i.h.bf16 %v2886_v42  ;;  %v2887_v59 = vunpack.i.l.bf16 %v2886_v42 }
 0x2d0   : > { %1621 = vmatpush.msrb.mxu3 %v4991_v10  ;;  %v1384_v48 = vsel %vm1312_vm9, %v2833_v44, %v2882_v14  ;;  %v1412_v35 = vsel %vm1312_vm9, %v2828_v15, %v2883_v60  ;;  %v1380_v44 = vsel %vm1312_vm9, %v2853_v19, %v2892_v31  ;;  %v4997_v15 = vld [vmem:[#allocation22_spill] sm:$0xff] }
 0x2d1   : > { %1663 = vmatpush.msrb.mxu1 %v1384_v48  ;;  %1685 = vmatpush.msrb.mxu2 %v1412_v35  ;;  %v1382_v57 = vsel %vm1312_vm9, %v2847_v37, %v2887_v59  ;;  %v1410_v49 = vsel %vm1312_vm9, %v2842_v20, %v2888_v5 }
 0x2d2   : > { %1622 = vmatpush.msrb.mxu3 %v4992_v22 }
 0x2d3   : > { %1664 = vmatpush.msrb.mxu1 %v1382_v57  ;;  %1686 = vmatpush.msrb.mxu2 %v1410_v49 }
 0x2d4   : > { %1623 = vmatpush.msrb.mxu3 %v4993_v50  ;;  %1867 = vmatmul.msk.f32.vlgmr.msrb.gmra.mxu2 %vm551_vm10, %v4666_v7 }
 0x2d5   : > { %1665 = vmatpush.msrb.mxu1 %v1380_v44 }
 0x2d6   : > { %1624 = vmatpush.msrb.mxu3 %v4996_v34 }
 0x2d7   : > { %1666 = vmatpush.msrb.mxu1 %v1378_v27  ;;  %v1548_v56 = vpop.f32.mrf.mxu0 }
 0x2d8   : > { %1625 = vmatpush.msrb.mxu3 %v4997_v15  ;;  %1667 = vmatmul.f32.vlgmr.msrb.gmra.mxu1 %v983_v24  ;;  %v1549_v20 = vadd.f32 %v1548_v56, %v4999_v1 }
 0x2da   : > { %1626 = vmatpush.msrb.mxu3 %v4998_v52 }
 0x2db   : > { %1627 = vmatmul.f32.vlgmr.msrb.gmra.mxu3 %v4358_v18 }
 0x31c   : > { %v1568_v46 = vpop.f32.mrf.mxu1 }
 0x31d   : > { %v1569_v63 = vadd.f32 %v1568_v46, %v1549_v20 }
 0x328   : > { %v1648_v37 = vpop.f32.mrf.mxu0 }
 0x33e   : > { %v1608_v12 = vpop.f32.mrf.mxu3 }
 0x347   : > { %v1588_v16 = vpop.f32.mrf.mxu2 }
 0x348   : > { %v1589_v7 = vadd.f32 %v1588_v16, %v1569_v63 }
 0x34a   : > { %v1609_v23 = vadd.f32 %v1608_v12, %v1589_v7 }
 0x355   : > { %v1668_v41 = vpop.f32.mrf.mxu1 }
 0x357   : > { %v1688_v18 = vpop.f32.mrf.mxu2 }
 0x35e   : > { %v1628_v17 = vpop.f32.mrf.mxu3 }
 0x35f   : > { %v1629_v26 = vadd.f32 %v1628_v17, %v4999_v1 }
 0x361   : > { %v1649_v11 = vadd.f32 %v1648_v37, %v1629_v26 }
 0x363   : > { %v1669_v30 = vadd.f32 %v1668_v41, %v1649_v11 }
 0x365   : > { %v1689_v43 = vadd.f32 %v1688_v18, %v1669_v30 }
 0x367   : > { %v1693_v29 = vrot.slane %v1689_v43, 4 }
 0x369   : > { %v1695_v61 = vsel %vm1694_vm2, %v1609_v23, %v1693_v29 }
 0x36a   : > { %1697 = vst [vmem:[%s387_s3] sm:$0x77] %v1695_v61 }
 0x36b PF: > { %s15_s28 = sadd.s32 1, %s2981_s28   ;;  %s5001_s13 = sld [smem:[#allocation7_spill]] }
 0x36c   : > { %p12_p4 = scmp.ge.s32.totalorder %s15_s28, 6   ;;  %s5002_s18 = smov %s2945_s19 }
 0x36d   : > { %s5003_s19 = smov %s3136_s30  ;;  %s5004_s20 = smov %s2953_s21 }
 0x36e   : > { %s5005_s21 = smov %s3130_s25  ;;  %s5006_s22 = smov %s2961_s23 }
 0x36f   : > { %s5007_s23 = smov %s3127_s5  ;;  %s5008_s24 = smov %s2973_s26 }
 0x370   : > { %s5009_s25 = smov %s2977_s27  ;;  %s5010_s26 = smov %s3099_s7 }
 0x371   : > { %s5011_s27 = smov %s5001_s13  ;;  %14 = sbr.rel (!%p12_p4) target bundleno = 9 (0x9), region = 161 }

</bundles_post_ra>
